<compile_context>
chip_gen: v5e
topology: v5e:2x2
jax: 0.10.0
libtpu: 0.0.40
codegen_flags: <defaults>
</compile_context>

<pallas_src>
import jax
import jax.numpy as jnp
from jax.experimental import pallas as pl
from jax.experimental.pallas import tpu as pltpu


# -----------------------------------------------------------------------------
# Pallas kernel factory:  out = maybe_relu(A @ W + t) [+ residual]
# -----------------------------------------------------------------------------
def _make_kernel(relu: bool, has_residual: bool, multi_k: bool):
    """Build a kernel specialized on static Python flags (no traced booleans)."""

    def kernel(*refs):
        if multi_k:
            acc_ref = refs[-1]
            refs = refs[:-1]
        if has_residual:
            a_ref, w_ref, t_ref, r_ref, o_ref = refs
        else:
            a_ref, w_ref, t_ref, o_ref = refs
            r_ref = None

        def epilogue(acc):
            out = acc + t_ref[...]                      # (1,TN) broadcast shift
            if relu:
                out = jnp.maximum(out, 0.0)
            if r_ref is not None:                       # residual AFTER relu
                out = out + r_ref[...].astype(jnp.float32)
            return out.astype(o_ref.dtype)

        if multi_k:
            k = pl.program_id(2)

            @pl.when(k == 0)
            def _():
                acc_ref[...] = jnp.zeros_like(acc_ref)

            acc_ref[...] += jnp.dot(a_ref[...], w_ref[...],
                                    preferred_element_type=jnp.float32)

            @pl.when(k == pl.num_programs(2) - 1)
            def _():
                o_ref[...] = epilogue(acc_ref[...])
        else:
            acc = jnp.dot(a_ref[...], w_ref[...],
                          preferred_element_type=jnp.float32)
            o_ref[...] = epilogue(acc)

    return kernel


def _pick_tm(m):
    """Largest tile in {256,...,8} that divides M; otherwise full-dim block."""
    if m % 8 != 0:
        return m
    for tm in (256, 128, 64, 32, 16, 8):
        if m % tm == 0:
            return tm
    return m


_K_TILE = 1024          # K tile when the reduction is long (classifier K=8192)
_K_FULL_MAX = 2048      # below this, take the whole K in one block (nk == 1)


def fused_matmul(a, w, shift, residual=None, relu=True, out_dtype=jnp.bfloat16):
    """a: (M, K), w: (K, N) with BN scale pre-folded, shift: (N,), residual: (M, N)|None."""
    M, K = a.shape
    Kw, N = w.shape
    assert K == Kw

    a = a.astype(jnp.bfloat16)
    w = w.astype(jnp.bfloat16)
    t = shift.reshape(1, N).astype(jnp.float32)

    # --- N blocking: N <= 128 -> single full-width block, no padding/slicing ---
    if N <= 128:
        TN, Np = N, N
    else:
        TN = 128
        Np = pl.cdiv(N, TN) * TN
        if Np != N:
            w = jnp.pad(w, ((0, 0), (0, Np - N)))
            t = jnp.pad(t, ((0, 0), (0, Np - N)))
            if residual is not None:
                residual = jnp.pad(residual, ((0, 0), (0, Np - N)))

    # --- K blocking: pad up with pl.cdiv so no K tail is ever dropped ---
    if K <= _K_FULL_MAX:
        TK, Kp = K, K
    else:
        TK = _K_TILE
        Kp = pl.cdiv(K, TK) * TK
        if Kp != K:
            a = jnp.pad(a, ((0, 0), (0, Kp - K)))
            w = jnp.pad(w, ((0, Kp - K), (0, 0)))

    TM = _pick_tm(M)
    nm, nn, nk = M // TM, Np // TN, Kp // TK

    has_residual = residual is not None
    multi_k = nk > 1

    in_specs = [
        pl.BlockSpec((TM, TK), lambda i, j, k: (i, k)),
        pl.BlockSpec((TK, TN), lambda i, j, k: (k, j)),
        pl.BlockSpec((1, TN), lambda i, j, k: (0, j)),
    ]
    args = [a, w, t]
    if has_residual:
        in_specs.append(pl.BlockSpec((TM, TN), lambda i, j, k: (i, j)))
        args.append(residual)

    scratch = [pltpu.VMEM((TM, TN), jnp.float32)] if multi_k else []

    out = pl.pallas_call(
        _make_kernel(relu, has_residual, multi_k),
        out_shape=jax.ShapeDtypeStruct((M, Np), out_dtype),
        grid_spec=pltpu.PrefetchScalarGridSpec(
            num_scalar_prefetch=0,
            grid=(nm, nn, nk),
            in_specs=in_specs,
            out_specs=pl.BlockSpec((TM, TN), lambda i, j, k: (i, j)),
            scratch_shapes=scratch,
        ),
        compiler_params=pltpu.CompilerParams(
            dimension_semantics=("parallel", "parallel", "arbitrary"),
            vmem_limit_bytes=32 * 1024 * 1024,
        ),
    )(*args)

    if Np != N:
        out = out[:, :N]
    return out


# -----------------------------------------------------------------------------
# Conv as im2col (bf16) + fused Pallas matmul
# -----------------------------------------------------------------------------
def im2col(x_nhwc, kh, kw, stride, pad):
    B, H, W, C = x_nhwc.shape
    xp = jnp.pad(x_nhwc, ((0, 0), (pad, pad), (pad, pad), (0, 0)))
    Ho = (H + 2 * pad - kh) // stride + 1
    Wo = (W + 2 * pad - kw) // stride + 1
    cols = []
    for i in range(kh):
        for j in range(kw):
            cols.append(xp[:, i:i + Ho * stride:stride,
                           j:j + Wo * stride:stride, :])
    p = jnp.concatenate(cols, axis=-1)      # (B, Ho, Wo, kh*kw*C), (i, j, c) order
    return p.reshape(B * Ho * Wo, kh * kw * C), Ho, Wo


def conv_layer(x_nhwc, w_mat, shift, kh, kw, stride, pad, relu,
               residual=None, out_dtype=jnp.bfloat16):
    patches, Ho, Wo = im2col(x_nhwc, kh, kw, stride, pad)
    B = x_nhwc.shape[0]
    cout = w_mat.shape[1]
    res = None
    if residual is not None:
        res = residual.reshape(B * Ho * Wo, cout)
    out = fused_matmul(patches, w_mat, shift, res, relu, out_dtype)
    return out.reshape(B, Ho, Wo, cout)


# -----------------------------------------------------------------------------
# Deterministic parameter initialization (synthetic, no checkpoint)
# -----------------------------------------------------------------------------
def _conv_init(key, cin, cout, k):
    k1, k2 = jax.random.split(key)
    fan_in = cin * k * k
    w = jax.random.normal(k1, (cout, cin, k, k), jnp.float32) / jnp.sqrt(fan_in)
    b = 0.01 * jax.random.normal(k2, (cout,), jnp.float32)
    return w, b


def _linear_init(key, cin, cout):
    k1, k2 = jax.random.split(key)
    w = jax.random.normal(k1, (cout, cin), jnp.float32) / jnp.sqrt(cin)
    b = 0.01 * jax.random.normal(k2, (cout,), jnp.float32)
    return w, b


def _bn_fold(key, c, bias, eps=1e-5):
    """Eval-mode BN folded into per-output-channel (scale, shift)."""
    k1, k2 = jax.random.split(key)
    gamma = 1.0 + 0.1 * jax.random.normal(k1, (c,), jnp.float32)
    beta = 0.1 * jax.random.normal(k2, (c,), jnp.float32)
    running_mean = jnp.zeros((c,), jnp.float32)
    running_var = jnp.ones((c,), jnp.float32)
    s = gamma / jnp.sqrt(running_var + eps)
    t = (bias - running_mean) * s + beta
    return s, t


def _conv_to_matmul(w_oihw, scale):
    """(O,I,kh,kw) -> (kh*kw*I, O) matching im2col (i,j,c) order; BN scale folded; bf16."""
    cout, cin, kh, kw = w_oihw.shape
    w_mat = jnp.transpose(w_oihw, (2, 3, 1, 0)).reshape(kh * kw * cin, cout)
    return (w_mat * scale[None, :]).astype(jnp.bfloat16)


def _linear_to_matmul(w_oi, scale):
    return (w_oi.T * scale[None, :]).astype(jnp.bfloat16)


def init_params(key, in_ch=3, out_ch=128, n_blocks=4, n_features=64):
    keys = iter(jax.random.split(key, 64))
    params = {}

    w, b = _conv_init(next(keys), in_ch, n_features, 4)
    s, t = _bn_fold(next(keys), n_features, b)
    params["stem"] = (_conv_to_matmul(w, s), t)

    blocks = []
    for _ in range(n_blocks):
        w1, b1 = _conv_init(next(keys), n_features, n_features, 3)
        s1, t1 = _bn_fold(next(keys), n_features, b1)
        w2, b2 = _conv_init(next(keys), n_features, n_features, 3)
        s2, t2 = _bn_fold(next(keys), n_features, b2)
        blocks.append((_conv_to_matmul(w1, s1), t1, _conv_to_matmul(w2, s2), t2))
    params["blocks"] = blocks

    # final conv: no BN, just bias
    w, b = _conv_init(next(keys), n_features, out_ch, 4)
    params["final_conv"] = (_conv_to_matmul(w, jnp.ones((out_ch,), jnp.float32)), b)

    w, b = _linear_init(next(keys), out_ch * 8 * 8, 128)
    s, t = _bn_fold(next(keys), 128, b)
    lin1 = (_linear_to_matmul(w, s), t)
    w, b = _linear_init(next(keys), 128, 64)
    s, t = _bn_fold(next(keys), 64, b)
    lin2 = (_linear_to_matmul(w, s), t)
    w, b = _linear_init(next(keys), 64, 10)
    lin3 = (_linear_to_matmul(w, jnp.ones((10,), jnp.float32)), b)
    params["classifier"] = (lin1, lin2, lin3)
    return params


# -----------------------------------------------------------------------------
# Full forward pass (cifar10_Resnet).  Layer structure / relu flags are static
# Python (NOT pytree leaves), so nothing boolean is ever traced.
# -----------------------------------------------------------------------------
def model_forward(params, x_nchw):
    x = jnp.transpose(x_nchw, (0, 2, 3, 1)).astype(jnp.bfloat16)   # -> NHWC bf16

    w, t = params["stem"]
    x = conv_layer(x, w, t, 4, 4, stride=2, pad=1, relu=True)      # (B,16,16,64)

    for (w1, t1, w2, t2) in params["blocks"]:
        h = conv_layer(x, w1, t1, 3, 3, stride=1, pad=1, relu=True)
        # residual added AFTER the block's final ReLU: conv_block(x) + x
        x = conv_layer(h, w2, t2, 3, 3, stride=1, pad=1, relu=True, residual=x)

    w, t = params["final_conv"]
    x = conv_layer(x, w, t, 4, 4, stride=2, pad=1, relu=True)      # (B,8,8,128)

    B = x.shape[0]
    # match PyTorch x.view(-1, C*8*8) on an NCHW tensor
    x = jnp.transpose(x, (0, 3, 1, 2)).reshape(B, -1)              # (B, 8192)

    (w1, t1), (w2, t2), (w3, t3) = params["classifier"]
    x = fused_matmul(x, w1, t1, relu=True)
    x = fused_matmul(x, w2, t2, relu=True)
    x = fused_matmul(x, w3, t3, relu=False, out_dtype=jnp.float32)
    return x                                                       # (B, 10) f32


if __name__ == "__main__":
    key = jax.random.PRNGKey(0)
    k_param, k_x = jax.random.split(key)

    params = init_params(k_param, in_ch=3, out_ch=128, n_blocks=4)
    x = jax.random.normal(k_x, (2, 3, 32, 32), jnp.float32)        # small batch

    fwd = jax.jit(model_forward)
    out = jax.block_until_ready(fwd(params, x))
    assert out.shape == (2, 10) and out.dtype == jnp.float32
    print("KERNEL_OK")
</pallas_src>

<mosaic_0001>
module attributes {stable_mosaic.version = 11 : i64} {
  func.func @kernel(%arg0: i32, %arg1: i32, %arg2: i32, %arg3: memref<256x48xbf16, #tpu.memory_space<vmem>>, %arg4: memref<48x64xbf16, #tpu.memory_space<vmem>>, %arg5: memref<1x64xf32, #tpu.memory_space<vmem>>, %arg6: memref<256x64xbf16, #tpu.memory_space<vmem>>) attributes {dimension_semantics = [#tpu.dimension_semantics<parallel>, #tpu.dimension_semantics<parallel>, #tpu.dimension_semantics<arbitrary>], iteration_bounds = array<i64: 2, 1, 1>, scalar_prefetch = 0 : i64, scratch_operands = 0 : i64, tpu.core_type = #tpu.core_type<tc>, window_params = [{transform_indices = @transform_0, window_bounds = array<i64: 256, 48>}, {transform_indices = @transform_1, window_bounds = array<i64: 48, 64>}, {transform_indices = @transform_2, window_bounds = array<i64: 1, 64>}, {transform_indices = @transform_3, window_bounds = array<i64: 256, 64>}]} {
    %c0 = arith.constant 0 : index
    %c0_0 = arith.constant 0 : index
    %0 = vector.load %arg3[%c0, %c0_0] : memref<256x48xbf16, #tpu.memory_space<vmem>>, vector<256x48xbf16>
    %c0_1 = arith.constant 0 : index
    %c0_2 = arith.constant 0 : index
    %1 = vector.load %arg4[%c0_1, %c0_2] : memref<48x64xbf16, #tpu.memory_space<vmem>>, vector<48x64xbf16>
    %cst = arith.constant dense<0.000000e+00> : vector<256x64xf32>
    %2 = tpu.matmul %0, %1, %cst {dimension_numbers = #tpu.dot_dimension_numbers<[1], [0], [0], [1], [0, 0, 1, 1], [], []>} : vector<256x48xbf16>, vector<48x64xbf16>, vector<256x64xf32> -> vector<256x64xf32>
    %c0_3 = arith.constant 0 : index
    %c0_4 = arith.constant 0 : index
    %3 = vector.load %arg5[%c0_3, %c0_4] : memref<1x64xf32, #tpu.memory_space<vmem>>, vector<1x64xf32>
    %4 = vector.broadcast %3 : vector<1x64xf32> to vector<256x64xf32>
    %5 = arith.addf %2, %4 : vector<256x64xf32>
    %cst_5 = arith.constant 0.000000e+00 : f32
    %6 = vector.broadcast %cst_5 : f32 to vector<256x64xf32>
    %7 = arith.maximumf %5, %6 : vector<256x64xf32>
    %8 = arith.truncf %7 : vector<256x64xf32> to vector<256x64xbf16>
    %c0_6 = arith.constant 0 : index
    %c0_7 = arith.constant 0 : index
    %9 = vector.load %arg6[%c0_6, %c0_7] : memref<256x64xbf16, #tpu.memory_space<vmem>>, vector<256x64xbf16>
    tpu.vector_store %arg6[%c0_6, %c0_7], %8 {strides = array<i32>} : memref<256x64xbf16, #tpu.memory_space<vmem>>, vector<256x64xbf16>,
    return
  }
  func.func @transform_0(%arg0: i32, %arg1: i32, %arg2: i32) -> (i32, i32) {
    %c0_i32 = arith.constant 0 : i32
    return %arg0, %arg2 : i32, i32
  }
  func.func @transform_1(%arg0: i32, %arg1: i32, %arg2: i32) -> (i32, i32) {
    %c0_i32 = arith.constant 0 : i32
    return %arg2, %arg1 : i32, i32
  }
  func.func @transform_2(%arg0: i32, %arg1: i32, %arg2: i32) -> (i32, i32) {
    %c0_i32 = arith.constant 0 : i32
    %c0_i32_0 = arith.constant 0 : i32
    return %c0_i32, %arg1 : i32, i32
  }
  func.func @transform_3(%arg0: i32, %arg1: i32, %arg2: i32) -> (i32, i32) {
    %c0_i32 = arith.constant 0 : i32
    return %arg0, %arg1 : i32, i32
  }
}

module attributes {stable_mosaic.version = 11 : i64} {
  func.func @kernel(%arg0: i32, %arg1: i32, %arg2: i32, %arg3: memref<256x576xbf16, #tpu.memory_space<vmem>>, %arg4: memref<576x64xbf16, #tpu.memory_space<vmem>>, %arg5: memref<1x64xf32, #tpu.memory_space<vmem>>, %arg6: memref<256x64xbf16, #tpu.memory_space<vmem>>) attributes {dimension_semantics = [#tpu.dimension_semantics<parallel>, #tpu.dimension_semantics<parallel>, #tpu.dimension_semantics<arbitrary>], iteration_bounds = array<i64: 2, 1, 1>, scalar_prefetch = 0 : i64, scratch_operands = 0 : i64, tpu.core_type = #tpu.core_type<tc>, window_params = [{transform_indices = @transform_0, window_bounds = array<i64: 256, 576>}, {transform_indices = @transform_1, window_bounds = array<i64: 576, 64>}, {transform_indices = @transform_2, window_bounds = array<i64: 1, 64>}, {transform_indices = @transform_3, window_bounds = array<i64: 256, 64>}]} {
    %c0 = arith.constant 0 : index
    %c0_0 = arith.constant 0 : index
    %0 = vector.load %arg3[%c0, %c0_0] : memref<256x576xbf16, #tpu.memory_space<vmem>>, vector<256x576xbf16>
    %c0_1 = arith.constant 0 : index
    %c0_2 = arith.constant 0 : index
    %1 = vector.load %arg4[%c0_1, %c0_2] : memref<576x64xbf16, #tpu.memory_space<vmem>>, vector<576x64xbf16>
    %cst = arith.constant dense<0.000000e+00> : vector<256x64xf32>
    %2 = tpu.matmul %0, %1, %cst {dimension_numbers = #tpu.dot_dimension_numbers<[1], [0], [0], [1], [0, 0, 1, 1], [], []>} : vector<256x576xbf16>, vector<576x64xbf16>, vector<256x64xf32> -> vector<256x64xf32>
    %c0_3 = arith.constant 0 : index
    %c0_4 = arith.constant 0 : index
    %3 = vector.load %arg5[%c0_3, %c0_4] : memref<1x64xf32, #tpu.memory_space<vmem>>, vector<1x64xf32>
    %4 = vector.broadcast %3 : vector<1x64xf32> to vector<256x64xf32>
    %5 = arith.addf %2, %4 : vector<256x64xf32>
    %cst_5 = arith.constant 0.000000e+00 : f32
    %6 = vector.broadcast %cst_5 : f32 to vector<256x64xf32>
    %7 = arith.maximumf %5, %6 : vector<256x64xf32>
    %8 = arith.truncf %7 : vector<256x64xf32> to vector<256x64xbf16>
    %c0_6 = arith.constant 0 : index
    %c0_7 = arith.constant 0 : index
    %9 = vector.load %arg6[%c0_6, %c0_7] : memref<256x64xbf16, #tpu.memory_space<vmem>>, vector<256x64xbf16>
    tpu.vector_store %arg6[%c0_6, %c0_7], %8 {strides = array<i32>} : memref<256x64xbf16, #tpu.memory_space<vmem>>, vector<256x64xbf16>,
    return
  }
  func.func @transform_0(%arg0: i32, %arg1: i32, %arg2: i32) -> (i32, i32) {
    %c0_i32 = arith.constant 0 : i32
    return %arg0, %arg2 : i32, i32
  }
  func.func @transform_1(%arg0: i32, %arg1: i32, %arg2: i32) -> (i32, i32) {
    %c0_i32 = arith.constant 0 : i32
    return %arg2, %arg1 : i32, i32
  }
  func.func @transform_2(%arg0: i32, %arg1: i32, %arg2: i32) -> (i32, i32) {
    %c0_i32 = arith.constant 0 : i32
    %c0_i32_0 = arith.constant 0 : i32
    return %c0_i32, %arg1 : i32, i32
  }
  func.func @transform_3(%arg0: i32, %arg1: i32, %arg2: i32) -> (i32, i32) {
    %c0_i32 = arith.constant 0 : i32
    return %arg0, %arg1 : i32, i32
  }
}

module attributes {stable_mosaic.version = 11 : i64} {
  func.func @kernel(%arg0: i32, %arg1: i32, %arg2: i32, %arg3: memref<256x576xbf16, #tpu.memory_space<vmem>>, %arg4: memref<576x64xbf16, #tpu.memory_space<vmem>>, %arg5: memref<1x64xf32, #tpu.memory_space<vmem>>, %arg6: memref<256x64xbf16, #tpu.memory_space<vmem>>, %arg7: memref<256x64xbf16, #tpu.memory_space<vmem>>) attributes {dimension_semantics = [#tpu.dimension_semantics<parallel>, #tpu.dimension_semantics<parallel>, #tpu.dimension_semantics<arbitrary>], iteration_bounds = array<i64: 2, 1, 1>, scalar_prefetch = 0 : i64, scratch_operands = 0 : i64, tpu.core_type = #tpu.core_type<tc>, window_params = [{transform_indices = @transform_0, window_bounds = array<i64: 256, 576>}, {transform_indices = @transform_1, window_bounds = array<i64: 576, 64>}, {transform_indices = @transform_2, window_bounds = array<i64: 1, 64>}, {transform_indices = @transform_3, window_bounds = array<i64: 256, 64>}, {transform_indices = @transform_4, window_bounds = array<i64: 256, 64>}]} {
    %c0 = arith.constant 0 : index
    %c0_0 = arith.constant 0 : index
    %0 = vector.load %arg3[%c0, %c0_0] : memref<256x576xbf16, #tpu.memory_space<vmem>>, vector<256x576xbf16>
    %c0_1 = arith.constant 0 : index
    %c0_2 = arith.constant 0 : index
    %1 = vector.load %arg4[%c0_1, %c0_2] : memref<576x64xbf16, #tpu.memory_space<vmem>>, vector<576x64xbf16>
    %cst = arith.constant dense<0.000000e+00> : vector<256x64xf32>
    %2 = tpu.matmul %0, %1, %cst {dimension_numbers = #tpu.dot_dimension_numbers<[1], [0], [0], [1], [0, 0, 1, 1], [], []>} : vector<256x576xbf16>, vector<576x64xbf16>, vector<256x64xf32> -> vector<256x64xf32>
    %c0_3 = arith.constant 0 : index
    %c0_4 = arith.constant 0 : index
    %3 = vector.load %arg5[%c0_3, %c0_4] : memref<1x64xf32, #tpu.memory_space<vmem>>, vector<1x64xf32>
    %4 = vector.broadcast %3 : vector<1x64xf32> to vector<256x64xf32>
    %5 = arith.addf %2, %4 : vector<256x64xf32>
    %cst_5 = arith.constant 0.000000e+00 : f32
    %6 = vector.broadcast %cst_5 : f32 to vector<256x64xf32>
    %7 = arith.maximumf %5, %6 : vector<256x64xf32>
    %c0_6 = arith.constant 0 : index
    %c0_7 = arith.constant 0 : index
    %8 = vector.load %arg6[%c0_6, %c0_7] : memref<256x64xbf16, #tpu.memory_space<vmem>>, vector<256x64xbf16>
    %9 = arith.extf %8 : vector<256x64xbf16> to vector<256x64xf32>
    %10 = arith.addf %7, %9 : vector<256x64xf32>
    %11 = arith.truncf %10 : vector<256x64xf32> to vector<256x64xbf16>
    %c0_8 = arith.constant 0 : index
    %c0_9 = arith.constant 0 : index
    %12 = vector.load %arg7[%c0_8, %c0_9] : memref<256x64xbf16, #tpu.memory_space<vmem>>, vector<256x64xbf16>
    tpu.vector_store %arg7[%c0_8, %c0_9], %11 {strides = array<i32>} : memref<256x64xbf16, #tpu.memory_space<vmem>>, vector<256x64xbf16>,
    return
  }
  func.func @transform_0(%arg0: i32, %arg1: i32, %arg2: i32) -> (i32, i32) {
    %c0_i32 = arith.constant 0 : i32
    return %arg0, %arg2 : i32, i32
  }
  func.func @transform_1(%arg0: i32, %arg1: i32, %arg2: i32) -> (i32, i32) {
    %c0_i32 = arith.constant 0 : i32
    return %arg2, %arg1 : i32, i32
  }
  func.func @transform_2(%arg0: i32, %arg1: i32, %arg2: i32) -> (i32, i32) {
    %c0_i32 = arith.constant 0 : i32
    %c0_i32_0 = arith.constant 0 : i32
    return %c0_i32, %arg1 : i32, i32
  }
  func.func @transform_3(%arg0: i32, %arg1: i32, %arg2: i32) -> (i32, i32) {
    %c0_i32 = arith.constant 0 : i32
    return %arg0, %arg1 : i32, i32
  }
  func.func @transform_4(%arg0: i32, %arg1: i32, %arg2: i32) -> (i32, i32) {
    %c0_i32 = arith.constant 0 : i32
    return %arg0, %arg1 : i32, i32
  }
}

module attributes {stable_mosaic.version = 11 : i64} {
  func.func @kernel(%arg0: i32, %arg1: i32, %arg2: i32, %arg3: memref<128x1024xbf16, #tpu.memory_space<vmem>>, %arg4: memref<1024x128xbf16, #tpu.memory_space<vmem>>, %arg5: memref<1x128xf32, #tpu.memory_space<vmem>>, %arg6: memref<128x128xbf16, #tpu.memory_space<vmem>>) attributes {dimension_semantics = [#tpu.dimension_semantics<parallel>, #tpu.dimension_semantics<parallel>, #tpu.dimension_semantics<arbitrary>], iteration_bounds = array<i64: 1, 1, 1>, scalar_prefetch = 0 : i64, scratch_operands = 0 : i64, tpu.core_type = #tpu.core_type<tc>, window_params = [{transform_indices = @transform_0, window_bounds = array<i64: 128, 1024>}, {transform_indices = @transform_1, window_bounds = array<i64: 1024, 128>}, {transform_indices = @transform_2, window_bounds = array<i64: 1, 128>}, {transform_indices = @transform_3, window_bounds = array<i64: 128, 128>}]} {
    %c0 = arith.constant 0 : index
    %c0_0 = arith.constant 0 : index
    %0 = vector.load %arg3[%c0, %c0_0] : memref<128x1024xbf16, #tpu.memory_space<vmem>>, vector<128x1024xbf16>
    %c0_1 = arith.constant 0 : index
    %c0_2 = arith.constant 0 : index
    %1 = vector.load %arg4[%c0_1, %c0_2] : memref<1024x128xbf16, #tpu.memory_space<vmem>>, vector<1024x128xbf16>
    %cst = arith.constant dense<0.000000e+00> : vector<128x128xf32>
    %2 = tpu.matmul %0, %1, %cst {dimension_numbers = #tpu.dot_dimension_numbers<[1], [0], [0], [1], [0, 0, 1, 1], [], []>} : vector<128x1024xbf16>, vector<1024x128xbf16>, vector<128x128xf32> -> vector<128x128xf32>
    %c0_3 = arith.constant 0 : index
    %c0_4 = arith.constant 0 : index
    %3 = vector.load %arg5[%c0_3, %c0_4] : memref<1x128xf32, #tpu.memory_space<vmem>>, vector<1x128xf32>
    %4 = vector.broadcast %3 : vector<1x128xf32> to vector<128x128xf32>
    %5 = arith.addf %2, %4 : vector<128x128xf32>
    %cst_5 = arith.constant 0.000000e+00 : f32
    %6 = vector.broadcast %cst_5 : f32 to vector<128x128xf32>
    %7 = arith.maximumf %5, %6 : vector<128x128xf32>
    %8 = arith.truncf %7 : vector<128x128xf32> to vector<128x128xbf16>
    %c0_6 = arith.constant 0 : index
    %c0_7 = arith.constant 0 : index
    %9 = vector.load %arg6[%c0_6, %c0_7] : memref<128x128xbf16, #tpu.memory_space<vmem>>, vector<128x128xbf16>
    tpu.vector_store %arg6[%c0_6, %c0_7], %8 {strides = array<i32>} : memref<128x128xbf16, #tpu.memory_space<vmem>>, vector<128x128xbf16>,
    return
  }
  func.func @transform_0(%arg0: i32, %arg1: i32, %arg2: i32) -> (i32, i32) {
    %c0_i32 = arith.constant 0 : i32
    return %arg0, %arg2 : i32, i32
  }
  func.func @transform_1(%arg0: i32, %arg1: i32, %arg2: i32) -> (i32, i32) {
    %c0_i32 = arith.constant 0 : i32
    return %arg2, %arg1 : i32, i32
  }
  func.func @transform_2(%arg0: i32, %arg1: i32, %arg2: i32) -> (i32, i32) {
    %c0_i32 = arith.constant 0 : i32
    %c0_i32_0 = arith.constant 0 : i32
    return %c0_i32, %arg1 : i32, i32
  }
  func.func @transform_3(%arg0: i32, %arg1: i32, %arg2: i32) -> (i32, i32) {
    %c0_i32 = arith.constant 0 : i32
    return %arg0, %arg1 : i32, i32
  }
}

module attributes {stable_mosaic.version = 11 : i64} {
  func.func @kernel(%arg0: i32, %arg1: i32, %arg2: i32, %arg3: memref<2x1024xbf16, #tpu.memory_space<vmem>>, %arg4: memref<1024x128xbf16, #tpu.memory_space<vmem>>, %arg5: memref<1x128xf32, #tpu.memory_space<vmem>>, %arg6: memref<2x128xbf16, #tpu.memory_space<vmem>>, %arg7: memref<2x128xf32, #tpu.memory_space<vmem>>) attributes {dimension_semantics = [#tpu.dimension_semantics<parallel>, #tpu.dimension_semantics<parallel>, #tpu.dimension_semantics<arbitrary>], iteration_bounds = array<i64: 1, 1, 8>, scalar_prefetch = 0 : i64, scratch_operands = 1 : i64, tpu.core_type = #tpu.core_type<tc>, window_params = [{transform_indices = @transform_0, window_bounds = array<i64: 2, 1024>}, {transform_indices = @transform_1, window_bounds = array<i64: 1024, 128>}, {transform_indices = @transform_2, window_bounds = array<i64: 1, 128>}, {transform_indices = @transform_3, window_bounds = array<i64: 2, 128>}]} {
    %c0_i32 = arith.constant 0 : i32
    %0 = arith.cmpi eq, %arg2, %c0_i32 : i32
    %1 = arith.extui %0 : i1 to i32
    %c0_i32_0 = arith.constant 0 : i32
    %2 = arith.cmpi ne, %1, %c0_i32_0 : i32
    scf.if %2 {
      %cst_9 = arith.constant 0.000000e+00 : f32
      %12 = vector.broadcast %cst_9 : f32 to vector<2x128xf32>
      %c0_10 = arith.constant 0 : index
      %c0_11 = arith.constant 0 : index
      %13 = vector.load %arg7[%c0_10, %c0_11] : memref<2x128xf32, #tpu.memory_space<vmem>>, vector<2x128xf32>
      tpu.vector_store %arg7[%c0_10, %c0_11], %12 {strides = array<i32>} : memref<2x128xf32, #tpu.memory_space<vmem>>, vector<2x128xf32>,
    } else {
    }
    %c0 = arith.constant 0 : index
    %c0_1 = arith.constant 0 : index
    %3 = vector.load %arg7[%c0, %c0_1] : memref<2x128xf32, #tpu.memory_space<vmem>>, vector<2x128xf32>
    %c0_2 = arith.constant 0 : index
    %c0_3 = arith.constant 0 : index
    %4 = vector.load %arg3[%c0_2, %c0_3] : memref<2x1024xbf16, #tpu.memory_space<vmem>>, vector<2x1024xbf16>
    %c0_4 = arith.constant 0 : index
    %c0_5 = arith.constant 0 : index
    %5 = vector.load %arg4[%c0_4, %c0_5] : memref<1024x128xbf16, #tpu.memory_space<vmem>>, vector<1024x128xbf16>
    %cst = arith.constant dense<0.000000e+00> : vector<2x128xf32>
    %6 = tpu.matmul %4, %5, %cst {dimension_numbers = #tpu.dot_dimension_numbers<[1], [0], [0], [1], [0, 0, 1, 1], [], []>} : vector<2x1024xbf16>, vector<1024x128xbf16>, vector<2x128xf32> -> vector<2x128xf32>
    %7 = arith.addf %3, %6 : vector<2x128xf32>
    %c0_6 = arith.constant 0 : index
    %c0_7 = arith.constant 0 : index
    %8 = vector.load %arg7[%c0_6, %c0_7] : memref<2x128xf32, #tpu.memory_space<vmem>>, vector<2x128xf32>
    tpu.vector_store %arg7[%c0_6, %c0_7], %7 {strides = array<i32>} : memref<2x128xf32, #tpu.memory_space<vmem>>, vector<2x128xf32>,
    %c7_i32 = arith.constant 7 : i32
    %9 = arith.cmpi eq, %arg2, %c7_i32 : i32
    %10 = arith.extui %9 : i1 to i32
    %c0_i32_8 = arith.constant 0 : i32
    %11 = arith.cmpi ne, %10, %c0_i32_8 : i32
    scf.if %11 {
      %c0_9 = arith.constant 0 : index
      %c0_10 = arith.constant 0 : index
      %12 = vector.load %arg7[%c0_9, %c0_10] : memref<2x128xf32, #tpu.memory_space<vmem>>, vector<2x128xf32>
      %c0_11 = arith.constant 0 : index
      %c0_12 = arith.constant 0 : index
      %13 = vector.load %arg5[%c0_11, %c0_12] : memref<1x128xf32, #tpu.memory_space<vmem>>, vector<1x128xf32>
      %14 = vector.broadcast %13 : vector<1x128xf32> to vector<2x128xf32>
      %15 = arith.addf %12, %14 : vector<2x128xf32>
      %cst_13 = arith.constant 0.000000e+00 : f32
      %16 = vector.broadcast %cst_13 : f32 to vector<2x128xf32>
      %17 = arith.maximumf %15, %16 : vector<2x128xf32>
      %18 = arith.truncf %17 : vector<2x128xf32> to vector<2x128xbf16>
      %c0_14 = arith.constant 0 : index
      %c0_15 = arith.constant 0 : index
      %19 = vector.load %arg6[%c0_14, %c0_15] : memref<2x128xbf16, #tpu.memory_space<vmem>>, vector<2x128xbf16>
      tpu.vector_store %arg6[%c0_14, %c0_15], %18 {strides = array<i32>} : memref<2x128xbf16, #tpu.memory_space<vmem>>, vector<2x128xbf16>,
    } else {
    }
    return
  }
  func.func @transform_0(%arg0: i32, %arg1: i32, %arg2: i32) -> (i32, i32) {
    %c0_i32 = arith.constant 0 : i32
    return %arg0, %arg2 : i32, i32
  }
  func.func @transform_1(%arg0: i32, %arg1: i32, %arg2: i32) -> (i32, i32) {
    %c0_i32 = arith.constant 0 : i32
    return %arg2, %arg1 : i32, i32
  }
  func.func @transform_2(%arg0: i32, %arg1: i32, %arg2: i32) -> (i32, i32) {
    %c0_i32 = arith.constant 0 : i32
    %c0_i32_0 = arith.constant 0 : i32
    return %c0_i32, %arg1 : i32, i32
  }
  func.func @transform_3(%arg0: i32, %arg1: i32, %arg2: i32) -> (i32, i32) {
    %c0_i32 = arith.constant 0 : i32
    return %arg0, %arg1 : i32, i32
  }
}

module attributes {stable_mosaic.version = 11 : i64} {
  func.func @kernel(%arg0: i32, %arg1: i32, %arg2: i32, %arg3: memref<2x128xbf16, #tpu.memory_space<vmem>>, %arg4: memref<128x64xbf16, #tpu.memory_space<vmem>>, %arg5: memref<1x64xf32, #tpu.memory_space<vmem>>, %arg6: memref<2x64xbf16, #tpu.memory_space<vmem>>) attributes {dimension_semantics = [#tpu.dimension_semantics<parallel>, #tpu.dimension_semantics<parallel>, #tpu.dimension_semantics<arbitrary>], iteration_bounds = array<i64: 1, 1, 1>, scalar_prefetch = 0 : i64, scratch_operands = 0 : i64, tpu.core_type = #tpu.core_type<tc>, window_params = [{transform_indices = @transform_0, window_bounds = array<i64: 2, 128>}, {transform_indices = @transform_1, window_bounds = array<i64: 128, 64>}, {transform_indices = @transform_2, window_bounds = array<i64: 1, 64>}, {transform_indices = @transform_3, window_bounds = array<i64: 2, 64>}]} {
    %c0 = arith.constant 0 : index
    %c0_0 = arith.constant 0 : index
    %0 = vector.load %arg3[%c0, %c0_0] : memref<2x128xbf16, #tpu.memory_space<vmem>>, vector<2x128xbf16>
    %c0_1 = arith.constant 0 : index
    %c0_2 = arith.constant 0 : index
    %1 = vector.load %arg4[%c0_1, %c0_2] : memref<128x64xbf16, #tpu.memory_space<vmem>>, vector<128x64xbf16>
    %cst = arith.constant dense<0.000000e+00> : vector<2x64xf32>
    %2 = tpu.matmul %0, %1, %cst {dimension_numbers = #tpu.dot_dimension_numbers<[1], [0], [0], [1], [0, 0, 1, 1], [], []>} : vector<2x128xbf16>, vector<128x64xbf16>, vector<2x64xf32> -> vector<2x64xf32>
    %c0_3 = arith.constant 0 : index
    %c0_4 = arith.constant 0 : index
    %3 = vector.load %arg5[%c0_3, %c0_4] : memref<1x64xf32, #tpu.memory_space<vmem>>, vector<1x64xf32>
    %4 = vector.broadcast %3 : vector<1x64xf32> to vector<2x64xf32>
    %5 = arith.addf %2, %4 : vector<2x64xf32>
    %cst_5 = arith.constant 0.000000e+00 : f32
    %6 = vector.broadcast %cst_5 : f32 to vector<2x64xf32>
    %7 = arith.maximumf %5, %6 : vector<2x64xf32>
    %8 = arith.truncf %7 : vector<2x64xf32> to vector<2x64xbf16>
    %c0_6 = arith.constant 0 : index
    %c0_7 = arith.constant 0 : index
    %9 = vector.load %arg6[%c0_6, %c0_7] : memref<2x64xbf16, #tpu.memory_space<vmem>>, vector<2x64xbf16>
    tpu.vector_store %arg6[%c0_6, %c0_7], %8 {strides = array<i32>} : memref<2x64xbf16, #tpu.memory_space<vmem>>, vector<2x64xbf16>,
    return
  }
  func.func @transform_0(%arg0: i32, %arg1: i32, %arg2: i32) -> (i32, i32) {
    %c0_i32 = arith.constant 0 : i32
    return %arg0, %arg2 : i32, i32
  }
  func.func @transform_1(%arg0: i32, %arg1: i32, %arg2: i32) -> (i32, i32) {
    %c0_i32 = arith.constant 0 : i32
    return %arg2, %arg1 : i32, i32
  }
  func.func @transform_2(%arg0: i32, %arg1: i32, %arg2: i32) -> (i32, i32) {
    %c0_i32 = arith.constant 0 : i32
    %c0_i32_0 = arith.constant 0 : i32
    return %c0_i32, %arg1 : i32, i32
  }
  func.func @transform_3(%arg0: i32, %arg1: i32, %arg2: i32) -> (i32, i32) {
    %c0_i32 = arith.constant 0 : i32
    return %arg0, %arg1 : i32, i32
  }
}

module attributes {stable_mosaic.version = 11 : i64} {
  func.func @kernel(%arg0: i32, %arg1: i32, %arg2: i32, %arg3: memref<2x64xbf16, #tpu.memory_space<vmem>>, %arg4: memref<64x10xbf16, #tpu.memory_space<vmem>>, %arg5: memref<1x10xf32, #tpu.memory_space<vmem>>, %arg6: memref<2x10xf32, #tpu.memory_space<vmem>>) attributes {dimension_semantics = [#tpu.dimension_semantics<parallel>, #tpu.dimension_semantics<parallel>, #tpu.dimension_semantics<arbitrary>], iteration_bounds = array<i64: 1, 1, 1>, scalar_prefetch = 0 : i64, scratch_operands = 0 : i64, tpu.core_type = #tpu.core_type<tc>, window_params = [{transform_indices = @transform_0, window_bounds = array<i64: 2, 64>}, {transform_indices = @transform_1, window_bounds = array<i64: 64, 10>}, {transform_indices = @transform_2, window_bounds = array<i64: 1, 10>}, {transform_indices = @transform_3, window_bounds = array<i64: 2, 10>}]} {
    %c0 = arith.constant 0 : index
    %c0_0 = arith.constant 0 : index
    %0 = vector.load %arg3[%c0, %c0_0] : memref<2x64xbf16, #tpu.memory_space<vmem>>, vector<2x64xbf16>
    %c0_1 = arith.constant 0 : index
    %c0_2 = arith.constant 0 : index
    %1 = vector.load %arg4[%c0_1, %c0_2] : memref<64x10xbf16, #tpu.memory_space<vmem>>, vector<64x10xbf16>
    %cst = arith.constant dense<0.000000e+00> : vector<2x10xf32>
    %2 = tpu.matmul %0, %1, %cst {dimension_numbers = #tpu.dot_dimension_numbers<[1], [0], [0], [1], [0, 0, 1, 1], [], []>} : vector<2x64xbf16>, vector<64x10xbf16>, vector<2x10xf32> -> vector<2x10xf32>
    %c0_3 = arith.constant 0 : index
    %c0_4 = arith.constant 0 : index
    %3 = vector.load %arg5[%c0_3, %c0_4] : memref<1x10xf32, #tpu.memory_space<vmem>>, vector<1x10xf32>
    %4 = vector.broadcast %3 : vector<1x10xf32> to vector<2x10xf32>
    %5 = arith.addf %2, %4 : vector<2x10xf32>
    %c0_5 = arith.constant 0 : index
    %c0_6 = arith.constant 0 : index
    %6 = vector.load %arg6[%c0_5, %c0_6] : memref<2x10xf32, #tpu.memory_space<vmem>>, vector<2x10xf32>
    tpu.vector_store %arg6[%c0_5, %c0_6], %5 {strides = array<i32>} : memref<2x10xf32, #tpu.memory_space<vmem>>, vector<2x10xf32>,
    return
  }
  func.func @transform_0(%arg0: i32, %arg1: i32, %arg2: i32) -> (i32, i32) {
    %c0_i32 = arith.constant 0 : i32
    return %arg0, %arg2 : i32, i32
  }
  func.func @transform_1(%arg0: i32, %arg1: i32, %arg2: i32) -> (i32, i32) {
    %c0_i32 = arith.constant 0 : i32
    return %arg2, %arg1 : i32, i32
  }
  func.func @transform_2(%arg0: i32, %arg1: i32, %arg2: i32) -> (i32, i32) {
    %c0_i32 = arith.constant 0 : i32
    %c0_i32_0 = arith.constant 0 : i32
    return %c0_i32, %arg1 : i32, i32
  }
  func.func @transform_3(%arg0: i32, %arg1: i32, %arg2: i32) -> (i32, i32) {
    %c0_i32 = arith.constant 0 : i32
    return %arg0, %arg1 : i32, i32
  }
}

</mosaic_0001>

<bundles_post_ra>
// kernel: model_forward.13
= control target key start
LH: loop header
LB: loop body
LE: loop exit
PB: predicated region body
PF: predicated region fallthrough
CT: control target
= control target key end

     0   :  { %s948_s12 = smov 0   ;;  %s950_s13 = smov 0   ;;  %s1134_s0 = inlined_call_operand.vmem [shape: bf16[512,48], index: 0, kind: input, shape index: {}]   ;;  %s1135_s1 = inlined_call_operand.vmem [shape: bf16[48,64], index: 1, kind: input, shape index: {}]   ;;  %s1136_s2 = inlined_call_operand.vmem [shape: f32[1,64], index: 2, kind: input, shape index: {}]   ;;  %s1137_s3 = inlined_call_operand.vmem [shape: bf16[512,64], index: 3, kind: output, shape index: {}]  }
   0x1   :  { %s952_s14 = smov 0  }
   0x2 LB: > { %s32_s15 = sadd.s32 1, %s922_s13  ;;  %p752_p0 = scmp.ge.s32.totalorder %s926_s14, 1  ;;  %s926_s14 = sphi %s952_s14, %s13_s14   ;;  %s922_s13 = sphi %s950_s13, %s1139_s13   ;;  %s918_s12 = sphi %s948_s12, %s1138_s12  }
   0x3   : > { %p34_p1 = scmp.ge.s32.totalorder %s32_s15, 2  ;;  %p188_p2 = scmp.lt.s32.totalorder %s926_s14, 3 }
   0x5   : > { %s1141_s15 = smov (%p34_p1, %s32_s15), 0  ;;  %p189_p3 = pnand %p752_p0, %p188_p2 }
   0x6   : > { %s753_s18 = sshll.u32 (!%p189_p3), %s918_s12, 5 }
   0x7   : > { %192 = sbr.rel (%p189_p3) target bundleno = 221 (0xdd), region = 32  ;;  %p230_p4 = scmp.lt.s32.totalorder (!%p189_p3), %s753_s18, 63 }
   0xc   : > { %v869_v0 = vld [vmem:[%s1135_s1 + $0x10] sm:$0xff]  ;;  %v868_v1 = vld [vmem:[%s1135_s1 + $0x8] sm:$0xff]  ;;  %s1143_s18 = smov (!%p230_p4, %s753_s18), 63  ;;  %v867_v2 = vld [vmem:[%s1135_s1] sm:$0xff]  ;;  %vm400_vm0 = vcmask 392192   ;;  %vm602_vm1 = vcmask 519168  }
   0xd   : > { %454 = vmatpush.bf16.msra.mxu0 %v869_v0  ;;  %870 = vmatpush.bf16.msra.mxu1 %v869_v0  ;;  %s754_s21 = sshll.u32 %s1143_s18, 2  ;;  %v1020_v19 = vld [vmem:[%s1136_s2] ss:$0 sm:$0xff] }
   0xe   : > { %871 = vmatpush.bf16.msra.mxu2 %v869_v0  ;;  %872 = vmatpush.bf16.msra.mxu3 %v869_v0  ;;  %s983_s26 = scalar_lea.vmem %s1134_s0, %s754_s21  ;;  %s1029_s4 = scalar_lea.vmem %s1137_s3, %s754_s21 }
   0xf   : > { %v851_v3 = vld [vmem:[%s983_s26] sm:$0xff]  ;;  %v852_v7 = vld [vmem:[%s983_s26 + $0x8] sm:$0xff]  ;;  %v853_v11 = vld [vmem:[%s983_s26 + $0x10] sm:$0xff] }
  0x10   : > { %v855_v4 = vld [vmem:[%s983_s26 + $0x20] sm:$0xff]  ;;  %v856_v8 = vld [vmem:[%s983_s26 + $0x28] sm:$0xff]  ;;  %v857_v12 = vld [vmem:[%s983_s26 + $0x30] sm:$0xff] }
  0x11   : > { %455 = vmatpush.bf16.msra.mxu0 %v868_v1  ;;  %873 = vmatpush.bf16.msra.mxu1 %v868_v1  ;;  %v859_v5 = vld [vmem:[%s983_s26 + $0x40] sm:$0xff]  ;;  %v860_v9 = vld [vmem:[%s983_s26 + $0x48] sm:$0xff]  ;;  %v861_v13 = vld [vmem:[%s983_s26 + $0x50] sm:$0xff] }
  0x12   : > { %874 = vmatpush.bf16.msra.mxu2 %v868_v1  ;;  %875 = vmatpush.bf16.msra.mxu3 %v868_v1  ;;  %v863_v6 = vld [vmem:[%s983_s26 + $0x60] sm:$0xff]  ;;  %v864_v10 = vld [vmem:[%s983_s26 + $0x68] sm:$0xff]  ;;  %v865_v14 = vld [vmem:[%s983_s26 + $0x70] sm:$0xff] }
  0x13   : > { %v854_v15 = vld [vmem:[%s983_s26 + $0x18] sm:$0xff] }
  0x14   : > { %v858_v16 = vld [vmem:[%s983_s26 + $0x38] sm:$0xff] }
  0x15   : > { %456 = vmatpush.bf16.msra.mxu0 %v867_v2  ;;  %876 = vmatpush.bf16.msra.mxu1 %v867_v2  ;;  %v862_v17 = vld [vmem:[%s983_s26 + $0x58] sm:$0xff] }
  0x16   : > { %877 = vmatpush.bf16.msra.mxu2 %v867_v2  ;;  %878 = vmatpush.bf16.msra.mxu3 %v867_v2  ;;  %v866_v18 = vld [vmem:[%s983_s26 + $0x78] sm:$0xff] }
  0x18   : > { %833 = vmatmul.msk.bf16.vlgmr.msra.gmra.mxu0 %vm400_vm0, %v851_v3  ;;  %837 = vmatmul.msk.bf16.vlgmr.msra.gmra.mxu1 %vm400_vm0, %v855_v4 }
  0x19   : > { %841 = vmatmul.msk.bf16.vlgmr.msra.gmra.mxu2 %vm400_vm0, %v859_v5  ;;  %845 = vmatmul.msk.bf16.vlgmr.msra.gmra.mxu3 %vm400_vm0, %v863_v6 }
  0x28   : > { %834 = vmatmul.msk.bf16.gmra.mxu0 %vm400_vm0, %v852_v7  ;;  %838 = vmatmul.msk.bf16.gmra.mxu1 %vm400_vm0, %v856_v8 }
  0x29   : > { %842 = vmatmul.msk.bf16.gmra.mxu2 %vm400_vm0, %v860_v9  ;;  %846 = vmatmul.msk.bf16.gmra.mxu3 %vm400_vm0, %v864_v10 }
  0x38   : > { %835 = vmatmul.msk.bf16.gmra.mxu0 %vm400_vm0, %v853_v11  ;;  %839 = vmatmul.msk.bf16.gmra.mxu1 %vm400_vm0, %v857_v12 }
  0x39   : > { %843 = vmatmul.msk.bf16.gmra.mxu2 %vm400_vm0, %v861_v13  ;;  %847 = vmatmul.msk.bf16.gmra.mxu3 %vm400_vm0, %v865_v14 }
  0x48   : > { %836 = vmatmul.msk.bf16.gmra.mxu0 %vm400_vm0, %v854_v15  ;;  %840 = vmatmul.msk.bf16.gmra.mxu1 %vm400_vm0, %v858_v16 }
  0x49   : > { %844 = vmatmul.msk.bf16.gmra.mxu2 %vm400_vm0, %v862_v17  ;;  %848 = vmatmul.msk.bf16.gmra.mxu3 %vm400_vm0, %v866_v18 }
  0x95   : > { %v458_v20 = vpop.f32.mrf.mxu0  ;;  %v478_v21 = vpop.f32.mrf.mxu1 }
  0x96   : > { %v459_v22 = vadd.f32 %v1020_v19, %v458_v20  ;;  %v479_v23 = vadd.f32 %v1020_v19, %v478_v21 }
  0x98   : > { %v538_v24 = vmax.f32 %v459_v22, 0.0  ;;  %v546_v25 = vmax.f32 %v479_v23, 0.0 }
  0x9a   : > { %v570_v26 = vpack.c.bf16 %v538_v24, %v538_v24  ;;  %v578_v27 = vpack.c.bf16 %v546_v25, %v546_v25 }
  0x9c   : > { %603 = vst.msk [vmem:[%s1029_s4] sm:$0xf] %vm602_vm1, %v570_v26  ;;  %v498_v28 = vpop.f32.mrf.mxu2  ;;  %v518_v29 = vpop.f32.mrf.mxu3 }
  0x9d   : > { %611 = vst.msk [vmem:[%s1029_s4 + $0x20] sm:$0xf] %vm602_vm1, %v578_v27  ;;  %v499_v30 = vadd.f32 %v1020_v19, %v498_v28  ;;  %v519_v31 = vadd.f32 %v1020_v19, %v518_v29  ;;  %v460_v32 = vpop.f32.mrf.mxu0  ;;  %v480_v33 = vpop.f32.mrf.mxu1 }
  0x9e   : > { %v461_v34 = vadd.f32 %v1020_v19, %v460_v32  ;;  %v481_v35 = vadd.f32 %v1020_v19, %v480_v33 }
  0x9f   : > { %v554_v36 = vmax.f32 %v499_v30, 0.0  ;;  %v562_v37 = vmax.f32 %v519_v31, 0.0 }
  0xa0   : > { %v539_v38 = vmax.f32 %v461_v34, 0.0  ;;  %v547_v39 = vmax.f32 %v481_v35, 0.0 }
  0xa1   : > { %v586_v40 = vpack.c.bf16 %v554_v36, %v554_v36  ;;  %v594_v41 = vpack.c.bf16 %v562_v37, %v562_v37 }
  0xa2   : > { %v571_v42 = vpack.c.bf16 %v539_v38, %v539_v38  ;;  %v579_v43 = vpack.c.bf16 %v547_v39, %v547_v39 }
  0xa3   : > { %619 = vst.msk [vmem:[%s1029_s4 + $0x40] sm:$0xf] %vm602_vm1, %v586_v40 }
  0xa4   : > { %627 = vst.msk [vmem:[%s1029_s4 + $0x60] sm:$0xf] %vm602_vm1, %v594_v41  ;;  %v500_v44 = vpop.f32.mrf.mxu2  ;;  %v520_v45 = vpop.f32.mrf.mxu3 }
  0xa5   : > { %604 = vst.msk [vmem:[%s1029_s4 + $0x4] sm:$0xf] %vm602_vm1, %v571_v42  ;;  %v501_v46 = vadd.f32 %v1020_v19, %v500_v44  ;;  %v521_v47 = vadd.f32 %v1020_v19, %v520_v45  ;;  %v463_v48 = vpop.f32.mrf.mxu0  ;;  %v483_v49 = vpop.f32.mrf.mxu1 }
  0xa6   : > { %612 = vst.msk [vmem:[%s1029_s4 + $0x24] sm:$0xf] %vm602_vm1, %v579_v43  ;;  %v464_v50 = vadd.f32 %v1020_v19, %v463_v48  ;;  %v484_v51 = vadd.f32 %v1020_v19, %v483_v49 }
  0xa7   : > { %v555_v52 = vmax.f32 %v501_v46, 0.0  ;;  %v563_v53 = vmax.f32 %v521_v47, 0.0 }
  0xa8   : > { %v540_v54 = vmax.f32 %v464_v50, 0.0  ;;  %v548_v55 = vmax.f32 %v484_v51, 0.0 }
  0xa9   : > { %v587_v56 = vpack.c.bf16 %v555_v52, %v555_v52  ;;  %v595_v57 = vpack.c.bf16 %v563_v53, %v563_v53 }
  0xaa   : > { %v572_v58 = vpack.c.bf16 %v540_v54, %v540_v54  ;;  %v580_v59 = vpack.c.bf16 %v548_v55, %v548_v55 }
  0xab   : > { %620 = vst.msk [vmem:[%s1029_s4 + $0x44] sm:$0xf] %vm602_vm1, %v587_v56 }
  0xac   : > { %628 = vst.msk [vmem:[%s1029_s4 + $0x64] sm:$0xf] %vm602_vm1, %v595_v57  ;;  %v503_v60 = vpop.f32.mrf.mxu2  ;;  %v523_v61 = vpop.f32.mrf.mxu3 }
  0xad   : > { %605 = vst.msk [vmem:[%s1029_s4 + $0x8] sm:$0xf] %vm602_vm1, %v572_v58  ;;  %v504_v62 = vadd.f32 %v1020_v19, %v503_v60  ;;  %v524_v63 = vadd.f32 %v1020_v19, %v523_v61  ;;  %v465_v0 = vpop.f32.mrf.mxu0  ;;  %v485_v1 = vpop.f32.mrf.mxu1 }
  0xae   : > { %613 = vst.msk [vmem:[%s1029_s4 + $0x28] sm:$0xf] %vm602_vm1, %v580_v59  ;;  %v466_v2 = vadd.f32 %v1020_v19, %v465_v0  ;;  %v486_v3 = vadd.f32 %v1020_v19, %v485_v1 }
  0xaf   : > { %v556_v4 = vmax.f32 %v504_v62, 0.0  ;;  %v564_v5 = vmax.f32 %v524_v63, 0.0 }
  0xb0   : > { %v541_v6 = vmax.f32 %v466_v2, 0.0  ;;  %v549_v7 = vmax.f32 %v486_v3, 0.0 }
  0xb1   : > { %v588_v8 = vpack.c.bf16 %v556_v4, %v556_v4  ;;  %v596_v9 = vpack.c.bf16 %v564_v5, %v564_v5 }
  0xb2   : > { %v573_v10 = vpack.c.bf16 %v541_v6, %v541_v6  ;;  %v581_v11 = vpack.c.bf16 %v549_v7, %v549_v7 }
  0xb3   : > { %621 = vst.msk [vmem:[%s1029_s4 + $0x48] sm:$0xf] %vm602_vm1, %v588_v8 }
  0xb4   : > { %629 = vst.msk [vmem:[%s1029_s4 + $0x68] sm:$0xf] %vm602_vm1, %v596_v9  ;;  %v505_v12 = vpop.f32.mrf.mxu2  ;;  %v525_v13 = vpop.f32.mrf.mxu3 }
  0xb5   : > { %606 = vst.msk [vmem:[%s1029_s4 + $0xc] sm:$0xf] %vm602_vm1, %v573_v10  ;;  %v506_v14 = vadd.f32 %v1020_v19, %v505_v12  ;;  %v526_v15 = vadd.f32 %v1020_v19, %v525_v13  ;;  %v468_v16 = vpop.f32.mrf.mxu0  ;;  %v488_v17 = vpop.f32.mrf.mxu1 }
  0xb6   : > { %614 = vst.msk [vmem:[%s1029_s4 + $0x2c] sm:$0xf] %vm602_vm1, %v581_v11  ;;  %v469_v18 = vadd.f32 %v1020_v19, %v468_v16  ;;  %v489_v20 = vadd.f32 %v1020_v19, %v488_v17 }
  0xb7   : > { %v557_v21 = vmax.f32 %v506_v14, 0.0  ;;  %v565_v22 = vmax.f32 %v526_v15, 0.0 }
  0xb8   : > { %v542_v23 = vmax.f32 %v469_v18, 0.0  ;;  %v550_v24 = vmax.f32 %v489_v20, 0.0 }
  0xb9   : > { %v589_v25 = vpack.c.bf16 %v557_v21, %v557_v21  ;;  %v597_v26 = vpack.c.bf16 %v565_v22, %v565_v22 }
  0xba   : > { %v574_v27 = vpack.c.bf16 %v542_v23, %v542_v23  ;;  %v582_v28 = vpack.c.bf16 %v550_v24, %v550_v24 }
  0xbb   : > { %622 = vst.msk [vmem:[%s1029_s4 + $0x4c] sm:$0xf] %vm602_vm1, %v589_v25 }
  0xbc   : > { %630 = vst.msk [vmem:[%s1029_s4 + $0x6c] sm:$0xf] %vm602_vm1, %v597_v26  ;;  %v508_v29 = vpop.f32.mrf.mxu2  ;;  %v528_v30 = vpop.f32.mrf.mxu3 }
  0xbd   : > { %607 = vst.msk [vmem:[%s1029_s4 + $0x10] sm:$0xf] %vm602_vm1, %v574_v27  ;;  %v509_v31 = vadd.f32 %v1020_v19, %v508_v29  ;;  %v529_v32 = vadd.f32 %v1020_v19, %v528_v30  ;;  %v470_v33 = vpop.f32.mrf.mxu0  ;;  %v490_v34 = vpop.f32.mrf.mxu1 }
  0xbe   : > { %615 = vst.msk [vmem:[%s1029_s4 + $0x30] sm:$0xf] %vm602_vm1, %v582_v28  ;;  %v471_v35 = vadd.f32 %v1020_v19, %v470_v33  ;;  %v491_v36 = vadd.f32 %v1020_v19, %v490_v34 }
  0xbf   : > { %v558_v37 = vmax.f32 %v509_v31, 0.0  ;;  %v566_v38 = vmax.f32 %v529_v32, 0.0 }
  0xc0   : > { %v543_v39 = vmax.f32 %v471_v35, 0.0  ;;  %v551_v40 = vmax.f32 %v491_v36, 0.0 }
  0xc1   : > { %v590_v41 = vpack.c.bf16 %v558_v37, %v558_v37  ;;  %v598_v42 = vpack.c.bf16 %v566_v38, %v566_v38 }
  0xc2   : > { %v575_v43 = vpack.c.bf16 %v543_v39, %v543_v39  ;;  %v583_v44 = vpack.c.bf16 %v551_v40, %v551_v40 }
  0xc3   : > { %623 = vst.msk [vmem:[%s1029_s4 + $0x50] sm:$0xf] %vm602_vm1, %v590_v41 }
  0xc4   : > { %631 = vst.msk [vmem:[%s1029_s4 + $0x70] sm:$0xf] %vm602_vm1, %v598_v42  ;;  %v510_v45 = vpop.f32.mrf.mxu2  ;;  %v530_v46 = vpop.f32.mrf.mxu3 }
  0xc5   : > { %608 = vst.msk [vmem:[%s1029_s4 + $0x14] sm:$0xf] %vm602_vm1, %v575_v43  ;;  %v511_v47 = vadd.f32 %v1020_v19, %v510_v45  ;;  %v531_v48 = vadd.f32 %v1020_v19, %v530_v46  ;;  %v473_v49 = vpop.f32.mrf.mxu0  ;;  %v493_v50 = vpop.f32.mrf.mxu1 }
  0xc6   : > { %616 = vst.msk [vmem:[%s1029_s4 + $0x34] sm:$0xf] %vm602_vm1, %v583_v44  ;;  %v474_v51 = vadd.f32 %v1020_v19, %v473_v49  ;;  %v494_v52 = vadd.f32 %v1020_v19, %v493_v50 }
  0xc7   : > { %v559_v53 = vmax.f32 %v511_v47, 0.0  ;;  %v567_v54 = vmax.f32 %v531_v48, 0.0 }
  0xc8   : > { %v544_v55 = vmax.f32 %v474_v51, 0.0  ;;  %v552_v56 = vmax.f32 %v494_v52, 0.0 }
  0xc9   : > { %v591_v57 = vpack.c.bf16 %v559_v53, %v559_v53  ;;  %v599_v58 = vpack.c.bf16 %v567_v54, %v567_v54 }
  0xca   : > { %v576_v59 = vpack.c.bf16 %v544_v55, %v544_v55  ;;  %v584_v60 = vpack.c.bf16 %v552_v56, %v552_v56 }
  0xcb   : > { %624 = vst.msk [vmem:[%s1029_s4 + $0x54] sm:$0xf] %vm602_vm1, %v591_v57 }
  0xcc   : > { %632 = vst.msk [vmem:[%s1029_s4 + $0x74] sm:$0xf] %vm602_vm1, %v599_v58  ;;  %v513_v61 = vpop.f32.mrf.mxu2  ;;  %v533_v62 = vpop.f32.mrf.mxu3 }
  0xcd   : > { %609 = vst.msk [vmem:[%s1029_s4 + $0x18] sm:$0xf] %vm602_vm1, %v576_v59  ;;  %v514_v63 = vadd.f32 %v1020_v19, %v513_v61  ;;  %v534_v0 = vadd.f32 %v1020_v19, %v533_v62  ;;  %v475_v1 = vpop.f32.mrf.mxu0  ;;  %v495_v2 = vpop.f32.mrf.mxu1 }
  0xce   : > { %617 = vst.msk [vmem:[%s1029_s4 + $0x38] sm:$0xf] %vm602_vm1, %v584_v60  ;;  %v476_v3 = vadd.f32 %v1020_v19, %v475_v1  ;;  %v496_v4 = vadd.f32 %v1020_v19, %v495_v2 }
  0xcf   : > { %v560_v5 = vmax.f32 %v514_v63, 0.0  ;;  %v568_v6 = vmax.f32 %v534_v0, 0.0 }
  0xd0   : > { %v545_v7 = vmax.f32 %v476_v3, 0.0  ;;  %v553_v8 = vmax.f32 %v496_v4, 0.0 }
  0xd1   : > { %v592_v9 = vpack.c.bf16 %v560_v5, %v560_v5  ;;  %v600_v10 = vpack.c.bf16 %v568_v6, %v568_v6 }
  0xd2   : > { %v577_v11 = vpack.c.bf16 %v545_v7, %v545_v7  ;;  %v585_v12 = vpack.c.bf16 %v553_v8, %v553_v8 }
  0xd3   : > { %625 = vst.msk [vmem:[%s1029_s4 + $0x58] sm:$0xf] %vm602_vm1, %v592_v9 }
  0xd4   : > { %633 = vst.msk [vmem:[%s1029_s4 + $0x78] sm:$0xf] %vm602_vm1, %v600_v10  ;;  %v515_v13 = vpop.f32.mrf.mxu2  ;;  %v535_v14 = vpop.f32.mrf.mxu3 }
  0xd5   : > { %610 = vst.msk [vmem:[%s1029_s4 + $0x1c] sm:$0xf] %vm602_vm1, %v577_v11  ;;  %v516_v15 = vadd.f32 %v1020_v19, %v515_v13  ;;  %v536_v16 = vadd.f32 %v1020_v19, %v535_v14 }
  0xd6   : > { %618 = vst.msk [vmem:[%s1029_s4 + $0x3c] sm:$0xf] %vm602_vm1, %v585_v12 }
  0xd7   : > { %v561_v17 = vmax.f32 %v516_v15, 0.0  ;;  %v569_v18 = vmax.f32 %v536_v16, 0.0 }
  0xd9   : > { %v593_v20 = vpack.c.bf16 %v561_v17, %v561_v17  ;;  %v601_v21 = vpack.c.bf16 %v569_v18, %v569_v18 }
  0xdb   : > { %626 = vst.msk [vmem:[%s1029_s4 + $0x5c] sm:$0xf] %vm602_vm1, %v593_v20 }
  0xdc   : > { %634 = vst.msk [vmem:[%s1029_s4 + $0x7c] sm:$0xf] %vm602_vm1, %v601_v21 }
  0xdd PF: > { %s13_s14 = sadd.s32 1, %s926_s14   ;;  %s1138_s12 = smov %s922_s13 }
  0xde   : > { %p10_p5 = scmp.ge.s32.totalorder %s13_s14, 4   ;;  %s1139_s13 = smov %s1141_s15 }
  0xe0   :  { %12 = sbr.rel (!%p10_p5) target bundleno = 2 (0x2), region = 68 }

// kernel: model_forward.14
= control target key start
LH: loop header
LB: loop body
LE: loop exit
PB: predicated region body
PF: predicated region fallthrough
CT: control target
= control target key end

     0   :  { %s2464_s12 = smov 0   ;;  %s2466_s13 = smov 0   ;;  %s2989_s0 = inlined_call_operand.vmem [shape: bf16[512,576], index: 0, kind: input, shape index: {}]   ;;  %s2990_s1 = inlined_call_operand.vmem [shape: bf16[576,64], index: 1, kind: input, shape index: {}]   ;;  %s2991_s2 = inlined_call_operand.vmem [shape: f32[1,64], index: 2, kind: input, shape index: {}]   ;;  %s2992_s3 = inlined_call_operand.vmem [shape: bf16[512,64], index: 3, kind: output, shape index: {}]  }
   0x1   :  { %s2468_s14 = smov 0  }
   0x2 LB: > { %s32_s15 = sadd.s32 1, %s2438_s13  ;;  %p1767_p0 = scmp.ge.s32.totalorder %s2442_s14, 1  ;;  %s2442_s14 = sphi %s2468_s14, %s13_s14   ;;  %s2438_s13 = sphi %s2466_s13, %s2994_s13   ;;  %s2434_s12 = sphi %s2464_s12, %s2993_s12  }
   0x3   : > { %p34_p1 = scmp.ge.s32.totalorder %s32_s15, 2  ;;  %p191_p2 = scmp.lt.s32.totalorder %s2442_s14, 3 }
   0x5   : > { %s2996_s15 = smov (%p34_p1, %s32_s15), 0  ;;  %p192_p3 = pnand %p1767_p0, %p191_p2 }
   0x6   : > { %s1768_s22 = sshll.u32 (!%p192_p3), %s2434_s12, 5 }
   0x7   : > { %195 = sbr.rel (%p192_p3) target bundleno = 499 (0x1f3), region = 32  ;;  %p236_p4 = scmp.lt.s32.totalorder (!%p192_p3), %s1768_s22, 63 }
   0xc   : > { %v2341_v0 = vld [vmem:[%s2990_s1 + $0x38] sm:$0xff]  ;;  %v2340_v1 = vld [vmem:[%s2990_s1 + $0x30] sm:$0xff]  ;;  %v2339_v2 = vld [vmem:[%s2990_s1 + $0x28] sm:$0xff]  ;;  %s2998_s22 = smov (!%p236_p4, %s1768_s22), 63  ;;  %vm1056_vm0 = vcmask 523264   ;;  %vm1614_vm1 = vcmask 519168  }
   0xd   : > { %2370 = vmatpush.bf16.msra.mxu1 %v2341_v0  ;;  %2371 = vmatpush.bf16.msra.mxu2 %v2341_v0  ;;  %v2338_v3 = vld [vmem:[%s2990_s1 + $0x20] sm:$0xff]  ;;  %v2337_v4 = vld [vmem:[%s2990_s1 + $0x18] sm:$0xff]  ;;  %v2336_v5 = vld [vmem:[%s2990_s1 + $0x10] sm:$0xff]  ;;  %s2394_s29 = smul.u32 20, %s2998_s22  ;;  %s1771_s28 = sshll.u32 %s2998_s22, 2 }
   0xe   : > { %2372 = vmatpush.bf16.msra.mxu3 %v2341_v0  ;;  %1105 = vmatpush.bf16.msra.mxu0 %v2341_v0  ;;  %v2335_v6 = vld [vmem:[%s2990_s1 + $0x8] sm:$0xff]  ;;  %v2334_v7 = vld [vmem:[%s2990_s1] sm:$0xff]  ;;  %v2357_v16 = vld [vmem:[%s2990_s1 + $0xb8] sm:$0xff]  ;;  %s2823_s4 = scalar_lea.vmem %s2992_s3, %s1771_s28 }
   0xf   : > { %s2512_s7 = scalar_lea.vmem %s2989_s0, %s2394_s29  ;;  %v2365_v17 = vld [vmem:[%s2990_s1 + $0xf8] sm:$0xff]  ;;  %v2356_v24 = vld [vmem:[%s2990_s1 + $0xb0] sm:$0xff]  ;;  %v2355_v28 = vld [vmem:[%s2990_s1 + $0xa8] sm:$0xff] }
  0x10   : > { %v1854_v8 = vld [vmem:[%s2512_s7 + $0xa0] sm:$0xf]  ;;  %v2276_v9 = vld [vmem:[%s2512_s7 + $0xb0] sm:$0xf0]  ;;  %v2349_v22 = vld [vmem:[%s2990_s1 + $0x78] sm:$0xff] }
  0x11   : > { %2373 = vmatpush.bf16.msra.mxu1 %v2340_v1  ;;  %2374 = vmatpush.bf16.msra.mxu2 %v2340_v1  ;;  %v1934_v10 = vld [vmem:[%s2512_s7 + $0x140] sm:$0xf]  ;;  %v2296_v11 = vld [vmem:[%s2512_s7 + $0x150] sm:$0xf0]  ;;  %v1855_v18 = vor.u32 %v2276_v9, %v1854_v8  ;;  %v2369_v23 = vld [vmem:[%s2990_s1 + $0x118] sm:$0xff] }
  0x12   : > { %2375 = vmatpush.bf16.msra.mxu3 %v2340_v1  ;;  %1106 = vmatpush.bf16.msra.mxu0 %v2340_v1  ;;  %v2014_v12 = vld [vmem:[%s2512_s7 + $0x1e0] sm:$0xf]  ;;  %v2316_v13 = vld [vmem:[%s2512_s7 + $0x1f0] sm:$0xf0]  ;;  %v1935_v19 = vor.u32 %v2296_v11, %v1934_v10  ;;  %v2363_v29 = vld [vmem:[%s2990_s1 + $0xe8] sm:$0xff] }
  0x13   : > { %v1774_v14 = vld [vmem:[%s2512_s7] sm:$0xf]  ;;  %v2256_v15 = vld [vmem:[%s2512_s7 + $0x10] sm:$0xf0]  ;;  %v2015_v20 = vor.u32 %v2316_v13, %v2014_v12  ;;  %v2347_v30 = vld [vmem:[%s2990_s1 + $0x68] sm:$0xff] }
  0x14   : > { %v1775_v21 = vor.u32 %v2256_v15, %v1774_v14  ;;  %v2364_v25 = vld [vmem:[%s2990_s1 + $0xf0] sm:$0xff]  ;;  %v2367_v31 = vld [vmem:[%s2990_s1 + $0x108] sm:$0xff]  ;;  %v2354_v32 = vld [vmem:[%s2990_s1 + $0xa0] sm:$0xff] }
  0x15   : > { %2376 = vmatpush.bf16.msra.mxu1 %v2339_v2  ;;  %2377 = vmatpush.bf16.msra.mxu2 %v2339_v2  ;;  %v2348_v26 = vld [vmem:[%s2990_s1 + $0x70] sm:$0xff]  ;;  %v2362_v33 = vld [vmem:[%s2990_s1 + $0xe0] sm:$0xff]  ;;  %v1874_v34 = vld [vmem:[%s2512_s7 + $0xc8] sm:$0xf] }
  0x16   : > { %2378 = vmatpush.bf16.msra.mxu3 %v2339_v2  ;;  %1107 = vmatpush.bf16.msra.mxu0 %v2339_v2  ;;  %v2368_v27 = vld [vmem:[%s2990_s1 + $0x110] sm:$0xff]  ;;  %v2281_v35 = vld [vmem:[%s2512_s7 + $0xd8] sm:$0xf0]  ;;  %v1954_v36 = vld [vmem:[%s2512_s7 + $0x168] sm:$0xf] }
  0x17   : > { %v2301_v37 = vld [vmem:[%s2512_s7 + $0x178] sm:$0xf0]  ;;  %v2034_v38 = vld [vmem:[%s2512_s7 + $0x208] sm:$0xf]  ;;  %v2346_v42 = vld [vmem:[%s2990_s1 + $0x60] sm:$0xff]  ;;  %v1875_v45 = vor.u32 %v2281_v35, %v1874_v34 }
  0x18   : > { %v2321_v39 = vld [vmem:[%s2512_s7 + $0x218] sm:$0xf0]  ;;  %v1794_v40 = vld [vmem:[%s2512_s7 + $0x28] sm:$0xf]  ;;  %v1955_v46 = vor.u32 %v2301_v37, %v1954_v36  ;;  %v2352_v50 = vld [vmem:[%s2990_s1 + $0x90] sm:$0xff] }
  0x19   : > { %2379 = vmatpush.bf16.msra.mxu1 %v2338_v3  ;;  %2380 = vmatpush.bf16.msra.mxu2 %v2338_v3  ;;  %v2261_v41 = vld [vmem:[%s2512_s7 + $0x38] sm:$0xf0]  ;;  %v2035_v47 = vor.u32 %v2321_v39, %v2034_v38  ;;  %v2360_v51 = vld [vmem:[%s2990_s1 + $0xd0] sm:$0xff]  ;;  %v2366_v53 = vld [vmem:[%s2990_s1 + $0x100] sm:$0xff] }
  0x1a   : > { %2381 = vmatpush.bf16.msra.mxu3 %v2338_v3  ;;  %1108 = vmatpush.bf16.msra.mxu0 %v2338_v3  ;;  %v2353_v43 = vld [vmem:[%s2990_s1 + $0x98] sm:$0xff]  ;;  %v1795_v48 = vor.u32 %v2261_v41, %v1794_v40  ;;  %v2344_v52 = vld [vmem:[%s2990_s1 + $0x50] sm:$0xff]  ;;  %v2351_v54 = vld [vmem:[%s2990_s1 + $0x88] sm:$0xff] }
  0x1b   : > { %v2361_v44 = vld [vmem:[%s2990_s1 + $0xd8] sm:$0xff]  ;;  %v2359_v55 = vld [vmem:[%s2990_s1 + $0xc8] sm:$0xff]  ;;  %v2350_v57 = vld [vmem:[%s2990_s1 + $0x80] sm:$0xff] }
  0x1c   : > { %v2345_v49 = vld [vmem:[%s2990_s1 + $0x58] sm:$0xff]  ;;  %v2343_v56 = vld [vmem:[%s2990_s1 + $0x48] sm:$0xff]  ;;  %v2358_v58 = vld [vmem:[%s2990_s1 + $0xc0] sm:$0xff] }
  0x1d   : > { %2382 = vmatpush.bf16.msra.mxu1 %v2337_v4  ;;  %2383 = vmatpush.bf16.msra.mxu2 %v2337_v4  ;;  %v1894_v59 = vld [vmem:[%s2512_s7 + $0xf0] sm:$0xf]  ;;  %v2286_v60 = vld [vmem:[%s2512_s7 + $0x100] sm:$0xf0]  ;;  %v1914_v8 = vld [vmem:[%s2512_s7 + $0x118] sm:$0xf] }
  0x1e   : > { %2384 = vmatpush.bf16.msra.mxu3 %v2337_v4  ;;  %1109 = vmatpush.bf16.msra.mxu0 %v2337_v4  ;;  %v1974_v61 = vld [vmem:[%s2512_s7 + $0x190] sm:$0xf]  ;;  %v2306_v62 = vld [vmem:[%s2512_s7 + $0x1a0] sm:$0xf0]  ;;  %v1895_v4 = vor.u32 %v2286_v60, %v1894_v59  ;;  %v2291_v9 = vld [vmem:[%s2512_s7 + $0x128] sm:$0xf0] }
  0x1f   : > { %v2054_v63 = vld [vmem:[%s2512_s7 + $0x230] sm:$0xf]  ;;  %v2326_v0 = vld [vmem:[%s2512_s7 + $0x240] sm:$0xf0]  ;;  %v1994_v10 = vld [vmem:[%s2512_s7 + $0x1b8] sm:$0xf] }
  0x20   : > { %v1814_v1 = vld [vmem:[%s2512_s7 + $0x50] sm:$0xf]  ;;  %v2266_v2 = vld [vmem:[%s2512_s7 + $0x60] sm:$0xf0]  ;;  %v2311_v11 = vld [vmem:[%s2512_s7 + $0x1c8] sm:$0xf0] }
  0x21   : > { %2385 = vmatpush.bf16.msra.mxu1 %v2336_v5  ;;  %2386 = vmatpush.bf16.msra.mxu2 %v2336_v5  ;;  %v2342_v3 = vld [vmem:[%s2990_s1 + $0x40] sm:$0xff]  ;;  %v2074_v12 = vld [vmem:[%s2512_s7 + $0x258] sm:$0xf]  ;;  %v2331_v13 = vld [vmem:[%s2512_s7 + $0x268] sm:$0xf0] }
  0x22   : > { %2387 = vmatpush.bf16.msra.mxu3 %v2336_v5  ;;  %1110 = vmatpush.bf16.msra.mxu0 %v2336_v5  ;;  %v1975_v5 = vor.u32 %v2306_v62, %v1974_v61  ;;  %v1834_v14 = vld [vmem:[%s2512_s7 + $0x78] sm:$0xf]  ;;  %v2271_v15 = vld [vmem:[%s2512_s7 + $0x88] sm:$0xf0]  ;;  %v1802_v34 = vld [vmem:[%s2512_s7 + $0x30] sm:$0xf] }
  0x23   : > { %v2262_v35 = vld [vmem:[%s2512_s7 + $0x40] sm:$0xf0]  ;;  %v2260_v36 = vld [vmem:[%s2512_s7 + $0x34] sm:$0xf]  ;;  %v1804_v37 = vld [vmem:[%s2512_s7 + $0x44] sm:$0xf0] }
  0x24   : > { %v1810_v38 = vld [vmem:[%s2512_s7 + $0x38] sm:$0xf]  ;;  %v2263_v39 = vld [vmem:[%s2512_s7 + $0x48] sm:$0xf0]  ;;  %v1803_v41 = vor.u32 %v2262_v35, %v1802_v34  ;;  %v2272_v59 = vld [vmem:[%s2512_s7 + $0x90] sm:$0xf0] }
  0x25   : > { %2388 = vmatpush.bf16.msra.mxu1 %v2335_v6  ;;  %2389 = vmatpush.bf16.msra.mxu2 %v2335_v6  ;;  %v2270_v60 = vld [vmem:[%s2512_s7 + $0x84] sm:$0xf]  ;;  %v1844_v61 = vld [vmem:[%s2512_s7 + $0x94] sm:$0xf0]  ;;  %v1850_v62 = vld [vmem:[%s2512_s7 + $0x88] sm:$0xf] }
  0x26   : > { %2390 = vmatpush.bf16.msra.mxu3 %v2335_v6  ;;  %1111 = vmatpush.bf16.msra.mxu0 %v2335_v6  ;;  %v2055_v6 = vor.u32 %v2326_v0, %v2054_v63  ;;  %v2273_v63 = vld [vmem:[%s2512_s7 + $0x98] sm:$0xf0]  ;;  %v2283_v34 = vld [vmem:[%s2512_s7 + $0xe8] sm:$0xf0] }
  0x29   : > { %2391 = vmatpush.bf16.msra.mxu1 %v2334_v7  ;;  %2392 = vmatpush.bf16.msra.mxu2 %v2334_v7 }
  0x2a   : > { %2393 = vmatpush.bf16.msra.mxu3 %v2334_v7  ;;  %1112 = vmatpush.bf16.msra.mxu0 %v2334_v7  ;;  %v1815_v7 = vor.u32 %v2266_v2, %v1814_v1  ;;  %v1847_v2 = vor.u32 %v2270_v60, %v1844_v61  ;;  %v2288_v60 = vld [vmem:[%s2512_s7 + $0x110] sm:$0xf0] }
  0x2c   : > { %1133 = vmatmul.bf16.vlgmr.msra.gmra.mxu1 %v1855_v18  ;;  %1153 = vmatmul.bf16.vlgmr.msra.gmra.mxu2 %v1935_v19  ;;  %v2075_v18 = vor.u32 %v2331_v13, %v2074_v12  ;;  %v1835_v19 = vor.u32 %v2271_v15, %v1834_v14  ;;  %v2278_v12 = vld [vmem:[%s2512_s7 + $0xc0] sm:$0xf0] }
  0x2d   : > { %1283 = vmatpush.bf16.msrb.mxu2 %v2357_v16  ;;  %1173 = vmatmul.bf16.vlgmr.msra.gmra.mxu3 %v2015_v20  ;;  %v1915_v16 = vor.u32 %v2291_v9, %v1914_v8  ;;  %v2254_v20 = vld [vmem:[%s2512_s7 + $0x4] sm:$0xf]  ;;  %v2277_v8 = vld [vmem:[%s2512_s7 + $0xb8] sm:$0xf0]  ;;  %v2275_v9 = vld [vmem:[%s2512_s7 + $0xac] sm:$0xf] }
  0x2e   : > { %1372 = vmatpush.bf16.msrb.mxu3 %v2365_v17  ;;  %1113 = vmatmul.bf16.vlgmr.msra.gmra.mxu0 %v1775_v21  ;;  %v1995_v17 = vor.u32 %v2311_v11, %v1994_v10  ;;  %v1776_v21 = vld [vmem:[%s2512_s7 + $0x14] sm:$0xf0]  ;;  %v1864_v10 = vld [vmem:[%s2512_s7 + $0xbc] sm:$0xf0]  ;;  %v1870_v11 = vld [vmem:[%s2512_s7 + $0xb0] sm:$0xf] }
  0x2f   : > { %1194 = vmatpush.bf16.msrb.mxu1 %v2349_v22  ;;  %1465 = vmatpush.bf16.msrb.mxu0 %v2369_v23  ;;  %v1782_v22 = vld [vmem:[%s2512_s7 + $0x8] sm:$0xf]  ;;  %v2257_v23 = vld [vmem:[%s2512_s7 + $0x18] sm:$0xf0] }
  0x31   : > { %1284 = vmatpush.bf16.msrb.mxu2 %v2356_v24  ;;  %v2255_v24 = vld [vmem:[%s2512_s7 + $0xc] sm:$0xf] }
  0x32   : > { %1373 = vmatpush.bf16.msrb.mxu3 %v2364_v25  ;;  %v1784_v25 = vld [vmem:[%s2512_s7 + $0x1c] sm:$0xf0] }
  0x33   : > { %1195 = vmatpush.bf16.msrb.mxu1 %v2348_v26  ;;  %1466 = vmatpush.bf16.msrb.mxu0 %v2368_v27  ;;  %v1790_v26 = vld [vmem:[%s2512_s7 + $0x10] sm:$0xf]  ;;  %v2258_v27 = vld [vmem:[%s2512_s7 + $0x20] sm:$0xf0] }
  0x35   : > { %1285 = vmatpush.bf16.msrb.mxu2 %v2355_v28  ;;  %v1779_v28 = vor.u32 %v2254_v20, %v1776_v21 }
  0x36   : > { %1374 = vmatpush.bf16.msrb.mxu3 %v2363_v29  ;;  %v1783_v29 = vor.u32 %v2257_v23, %v1782_v22 }
  0x37   : > { %1196 = vmatpush.bf16.msrb.mxu1 %v2347_v30  ;;  %1467 = vmatpush.bf16.msrb.mxu0 %v2367_v31  ;;  %v1787_v30 = vor.u32 %v2255_v24, %v1784_v25  ;;  %v1791_v31 = vor.u32 %v2258_v27, %v1790_v26  ;;  %v2279_v27 = vld [vmem:[%s2512_s7 + $0xcc] sm:$0xf] }
  0x39   : > { %1286 = vmatpush.bf16.msrb.mxu2 %v2354_v32  ;;  %v2259_v32 = vld [vmem:[%s2512_s7 + $0x2c] sm:$0xf] }
  0x3a   : > { %1375 = vmatpush.bf16.msrb.mxu3 %v2362_v33  ;;  %v1796_v33 = vld [vmem:[%s2512_s7 + $0x3c] sm:$0xf0] }
  0x3b   : > { %1197 = vmatpush.bf16.msrb.mxu1 %v2346_v42  ;;  %1468 = vmatpush.bf16.msrb.mxu0 %v2366_v53  ;;  %v1799_v40 = vor.u32 %v2259_v32, %v1796_v33  ;;  %v1807_v42 = vor.u32 %v2260_v36, %v1804_v37  ;;  %v1884_v32 = vld [vmem:[%s2512_s7 + $0xe4] sm:$0xf0]  ;;  %v1890_v33 = vld [vmem:[%s2512_s7 + $0xd8] sm:$0xf] }
  0x3c   : > { %1138 = vmatmul.bf16.gmra.mxu1 %v1875_v45  ;;  %1158 = vmatmul.bf16.gmra.mxu2 %v1955_v46  ;;  %v1816_v45 = vld [vmem:[%s2512_s7 + $0x64] sm:$0xf0]  ;;  %v1822_v46 = vld [vmem:[%s2512_s7 + $0x58] sm:$0xf] }
  0x3d   : > { %1287 = vmatpush.bf16.msrb.mxu2 %v2353_v43  ;;  %1178 = vmatmul.bf16.gmra.mxu3 %v2035_v47  ;;  %v1811_v43 = vor.u32 %v2263_v39, %v1810_v38  ;;  %v2267_v47 = vld [vmem:[%s2512_s7 + $0x68] sm:$0xf0] }
  0x3e   : > { %1376 = vmatpush.bf16.msrb.mxu3 %v2361_v44  ;;  %1118 = vmatmul.bf16.gmra.mxu0 %v1795_v48  ;;  %v2264_v44 = vld [vmem:[%s2512_s7 + $0x54] sm:$0xf]  ;;  %v2265_v48 = vld [vmem:[%s2512_s7 + $0x5c] sm:$0xf]  ;;  %v1823_v53 = vor.u32 %v2267_v47, %v1822_v46 }
  0x3f   : > { %1198 = vmatpush.bf16.msrb.mxu1 %v2345_v49  ;;  %v1824_v49 = vld [vmem:[%s2512_s7 + $0x6c] sm:$0xf0] }
  0x41   : > { %1288 = vmatpush.bf16.msrb.mxu2 %v2352_v50  ;;  %v1830_v50 = vld [vmem:[%s2512_s7 + $0x60] sm:$0xf] }
  0x42   : > { %1377 = vmatpush.bf16.msrb.mxu3 %v2360_v51  ;;  %v2268_v51 = vld [vmem:[%s2512_s7 + $0x70] sm:$0xf0] }
  0x43   : > { %1199 = vmatpush.bf16.msrb.mxu1 %v2344_v52  ;;  %v1819_v52 = vor.u32 %v2264_v44, %v1816_v45 }
  0x45   : > { %1289 = vmatpush.bf16.msrb.mxu2 %v2351_v54  ;;  %v1827_v54 = vor.u32 %v2265_v48, %v1824_v49 }
  0x46   : > { %1378 = vmatpush.bf16.msrb.mxu3 %v2359_v55  ;;  %v1831_v55 = vor.u32 %v2268_v51, %v1830_v50 }
  0x47   : > { %1200 = vmatpush.bf16.msrb.mxu1 %v2343_v56  ;;  %v2269_v56 = vld [vmem:[%s2512_s7 + $0x7c] sm:$0xf] }
  0x49   : > { %1290 = vmatpush.bf16.msrb.mxu2 %v2350_v57  ;;  %v1836_v57 = vld [vmem:[%s2512_s7 + $0x8c] sm:$0xf0] }
  0x4a   : > { %1379 = vmatpush.bf16.msrb.mxu3 %v2358_v58  ;;  %v1842_v58 = vld [vmem:[%s2512_s7 + $0x80] sm:$0xf]  ;;  %v1839_v0 = vor.u32 %v2269_v56, %v1836_v57  ;;  %v2287_v56 = vld [vmem:[%s2512_s7 + $0x108] sm:$0xf0]  ;;  %v2285_v57 = vld [vmem:[%s2512_s7 + $0xfc] sm:$0xf] }
  0x4b   : > { %1201 = vmatpush.bf16.msrb.mxu1 %v2342_v3  ;;  %v1843_v1 = vor.u32 %v2272_v59, %v1842_v58  ;;  %v1851_v3 = vor.u32 %v2273_v63, %v1850_v62  ;;  %v1904_v58 = vld [vmem:[%s2512_s7 + $0x10c] sm:$0xf0]  ;;  %v1910_v59 = vld [vmem:[%s2512_s7 + $0x100] sm:$0xf] }
  0x4c   : > { %1143 = vmatmul.bf16.gmra.mxu1 %v1895_v4  ;;  %1163 = vmatmul.bf16.gmra.mxu2 %v1975_v5  ;;  %v2672_v4 = vld [vmem:[%s2991_s2] ss:$0 sm:$0xff]  ;;  %v2274_v5 = vld [vmem:[%s2512_s7 + $0xa4] sm:$0xf] }
  0x4d   : > { %1183 = vmatmul.bf16.gmra.mxu3 %v2055_v6  ;;  %v1856_v6 = vld [vmem:[%s2512_s7 + $0xb4] sm:$0xf0] }
  0x4e   : > { %1123 = vmatmul.bf16.gmra.mxu0 %v1815_v7  ;;  %v1862_v7 = vld [vmem:[%s2512_s7 + $0xa8] sm:$0xf]  ;;  %v1859_v13 = vor.u32 %v2274_v5, %v1856_v6  ;;  %v1907_v5 = vor.u32 %v2285_v57, %v1904_v58  ;;  %v1911_v6 = vor.u32 %v2288_v60, %v1910_v59  ;;  %v1936_v57 = vld [vmem:[%s2512_s7 + $0x154] sm:$0xf0]  ;;  %v2297_v59 = vld [vmem:[%s2512_s7 + $0x158] sm:$0xf0] }
  0x4f   : > { %v1863_v14 = vor.u32 %v2277_v8, %v1862_v7  ;;  %v1942_v58 = vld [vmem:[%s2512_s7 + $0x148] sm:$0xf]  ;;  %v2295_v60 = vld [vmem:[%s2512_s7 + $0x14c] sm:$0xf] }
  0x5c   : > { %1148 = vmatmul.bf16.gmra.mxu1 %v1915_v16  ;;  %1168 = vmatmul.bf16.gmra.mxu2 %v1995_v17  ;;  %v1867_v16 = vor.u32 %v2275_v9, %v1864_v10  ;;  %v1871_v17 = vor.u32 %v2278_v12, %v1870_v11 }
  0x5d   : > { %1188 = vmatmul.bf16.gmra.mxu3 %v2075_v18 }
  0x5e   : > { %1128 = vmatmul.bf16.gmra.mxu0 %v1835_v19 }
  0x6c   : > { %1202 = vmatmul.bf16.vlgmr.msrb.gmra.mxu1 %v1779_v28  ;;  %1291 = vmatmul.bf16.vlgmr.msrb.gmra.mxu2 %v1783_v29  ;;  %v1876_v28 = vld [vmem:[%s2512_s7 + $0xdc] sm:$0xf0]  ;;  %v1882_v29 = vld [vmem:[%s2512_s7 + $0xd0] sm:$0xf] }
  0x6d   : > { %1380 = vmatmul.bf16.vlgmr.msrb.gmra.mxu3 %v1787_v30  ;;  %v2282_v30 = vld [vmem:[%s2512_s7 + $0xe0] sm:$0xf0]  ;;  %v1879_v38 = vor.u32 %v2279_v27, %v1876_v28  ;;  %v1924_v27 = vld [vmem:[%s2512_s7 + $0x134] sm:$0xf0]  ;;  %v1930_v28 = vld [vmem:[%s2512_s7 + $0x128] sm:$0xf] }
  0x6e   : > { %2236 = vmatmul.msk.bf16.vlgmr.msrb.gmra.mxu0 %vm1056_vm0, %v1791_v31  ;;  %v2280_v31 = vld [vmem:[%s2512_s7 + $0xd4] sm:$0xf]  ;;  %v1883_v39 = vor.u32 %v2282_v30, %v1882_v29  ;;  %v2293_v29 = vld [vmem:[%s2512_s7 + $0x138] sm:$0xf0] }
  0x7c   : > { %1207 = vmatmul.bf16.gmra.mxu1 %v1799_v40  ;;  %1296 = vmatmul.bf16.gmra.mxu2 %v1803_v41 }
  0x7d   : > { %1385 = vmatmul.bf16.gmra.mxu3 %v1807_v42  ;;  %v1887_v42 = vor.u32 %v2280_v31, %v1884_v32 }
  0x7e   : > { %2237 = vmatmul.msk.bf16.gmra.mxu0 %vm1056_vm0, %v1811_v43  ;;  %v1891_v43 = vor.u32 %v2283_v34, %v1890_v33 }
  0x8c   : > { %1212 = vmatmul.bf16.gmra.mxu1 %v1819_v52  ;;  %1301 = vmatmul.bf16.gmra.mxu2 %v1823_v53  ;;  %v2284_v53 = vld [vmem:[%s2512_s7 + $0xf4] sm:$0xf] }
  0x8d   : > { %1390 = vmatmul.bf16.gmra.mxu3 %v1827_v54  ;;  %v1896_v54 = vld [vmem:[%s2512_s7 + $0x104] sm:$0xf0] }
  0x8e   : > { %2238 = vmatmul.msk.bf16.gmra.mxu0 %vm1056_vm0, %v1831_v55  ;;  %v1902_v55 = vld [vmem:[%s2512_s7 + $0xf8] sm:$0xf] }
  0x9c   : > { %1217 = vmatmul.bf16.gmra.mxu1 %v1839_v0  ;;  %1306 = vmatmul.bf16.gmra.mxu2 %v1843_v1  ;;  %v1899_v0 = vor.u32 %v2284_v53, %v1896_v54  ;;  %v1903_v1 = vor.u32 %v2287_v56, %v1902_v55  ;;  %v2294_v56 = vld [vmem:[%s2512_s7 + $0x144] sm:$0xf] }
  0x9d   : > { %1395 = vmatmul.bf16.gmra.mxu3 %v1847_v2 }
  0x9e   : > { %2239 = vmatmul.msk.bf16.gmra.mxu0 %vm1056_vm0, %v1851_v3 }
  0xa9   : > { %v1134_v15 = vpop.f32.mrf.mxu1 }
  0xaa   : > { %v2683_v18 = vadd.f32 %v2672_v4, %v1134_v15 }
  0xab   : > { %v2685_v19 = vpop.f32.mrf.mxu0 }
  0xac   : > { %1222 = vmatmul.bf16.gmra.mxu1 %v1859_v13  ;;  %1311 = vmatmul.bf16.gmra.mxu2 %v1863_v14 }
  0xad   : > { %1400 = vmatmul.bf16.gmra.mxu3 %v1867_v16  ;;  %v2289_v16 = vld [vmem:[%s2512_s7 + $0x11c] sm:$0xf] }
  0xae   : > { %2240 = vmatmul.msk.bf16.gmra.mxu0 %vm1056_vm0, %v1871_v17  ;;  %v1916_v17 = vld [vmem:[%s2512_s7 + $0x12c] sm:$0xf0] }
  0xaf   : > { %v1154_v20 = vpop.f32.mrf.mxu2  ;;  %v1919_v33 = vor.u32 %v2289_v16, %v1916_v17 }
  0xb0   : > { %v2689_v21 = vadd.f32 %v2672_v4, %v1154_v20  ;;  %v1174_v22 = vpop.f32.mrf.mxu3  ;;  %v1922_v20 = vld [vmem:[%s2512_s7 + $0x120] sm:$0xf] }
  0xb1   : > { %v2692_v23 = vadd.f32 %v2672_v4, %v1174_v22  ;;  %v1136_v24 = vpop.f32.mrf.mxu1  ;;  %v2292_v22 = vld [vmem:[%s2512_s7 + $0x130] sm:$0xf0] }
  0xb2   : > { %v2695_v25 = vadd.f32 %v2672_v4, %v1136_v24  ;;  %v2290_v24 = vld [vmem:[%s2512_s7 + $0x124] sm:$0xf]  ;;  %v1923_v34 = vor.u32 %v2292_v22, %v1922_v20  ;;  %v1115_v22 = vadd.f32 %v2672_v4, %v2685_v19 }
  0xb3   : > { %v2697_v26 = vpop.f32.mrf.mxu0 }
  0xb4   : > { %v1117_v19 = vadd.f32 %v2672_v4, %v2697_v26 }
  0xb7   : > { %v1156_v35 = vpop.f32.mrf.mxu2 }
  0xb8   : > { %v2708_v36 = vadd.f32 %v2672_v4, %v1156_v35  ;;  %v1176_v37 = vpop.f32.mrf.mxu3 }
  0xb9   : > { %v2711_v40 = vadd.f32 %v2672_v4, %v1176_v37  ;;  %v1139_v41 = vpop.f32.mrf.mxu1 }
  0xba   : > { %v2714_v44 = vadd.f32 %v2672_v4, %v1139_v41 }
  0xbb   : > { %v2716_v45 = vpop.f32.mrf.mxu0 }
  0xbc   : > { %1227 = vmatmul.bf16.gmra.mxu1 %v1879_v38  ;;  %1316 = vmatmul.bf16.gmra.mxu2 %v1883_v39  ;;  %v1927_v38 = vor.u32 %v2290_v24, %v1924_v27  ;;  %v1931_v39 = vor.u32 %v2293_v29, %v1930_v28 }
  0xbd   : > { %1405 = vmatmul.bf16.gmra.mxu3 %v1887_v42 }
  0xbe   : > { %2241 = vmatmul.msk.bf16.gmra.mxu0 %vm1056_vm0, %v1891_v43 }
  0xbf   : > { %v1159_v46 = vpop.f32.mrf.mxu2 }
  0xc0   : > { %v2720_v47 = vadd.f32 %v2672_v4, %v1159_v46  ;;  %v1179_v48 = vpop.f32.mrf.mxu3 }
  0xc1   : > { %v2723_v49 = vadd.f32 %v2672_v4, %v1179_v48  ;;  %v1141_v50 = vpop.f32.mrf.mxu1 }
  0xc2   : > { %v2726_v51 = vadd.f32 %v2672_v4, %v1141_v50 }
  0xc3   : > { %v2728_v52 = vpop.f32.mrf.mxu0 }
  0xc7   : > { %v1161_v61 = vpop.f32.mrf.mxu2 }
  0xc8   : > { %v2739_v62 = vadd.f32 %v2672_v4, %v1161_v61  ;;  %v1181_v63 = vpop.f32.mrf.mxu3  ;;  %v1944_v61 = vld [vmem:[%s2512_s7 + $0x15c] sm:$0xf0] }
  0xc9   : > { %v2742_v2 = vadd.f32 %v2672_v4, %v1181_v63  ;;  %v1144_v3 = vpop.f32.mrf.mxu1  ;;  %v1950_v63 = vld [vmem:[%s2512_s7 + $0x150] sm:$0xf]  ;;  %v1947_v16 = vor.u32 %v2295_v60, %v1944_v61 }
  0xca   : > { %v2745_v7 = vadd.f32 %v2672_v4, %v1144_v3 }
  0xcb   : > { %v2747_v8 = vpop.f32.mrf.mxu0 }
  0xcc   : > { %1232 = vmatmul.bf16.gmra.mxu1 %v1899_v0  ;;  %1321 = vmatmul.bf16.gmra.mxu2 %v1903_v1  ;;  %v2298_v0 = vld [vmem:[%s2512_s7 + $0x160] sm:$0xf0] }
  0xcd   : > { %1410 = vmatmul.bf16.gmra.mxu3 %v1907_v5  ;;  %v1951_v17 = vor.u32 %v2298_v0, %v1950_v63 }
  0xce   : > { %2242 = vmatmul.msk.bf16.gmra.mxu0 %vm1056_vm0, %v1911_v6  ;;  %v1939_v6 = vor.u32 %v2294_v56, %v1936_v57 }
  0xcf   : > { %v1164_v9 = vpop.f32.mrf.mxu2 }
  0xd0   : > { %v2751_v10 = vadd.f32 %v2672_v4, %v1164_v9  ;;  %v1184_v11 = vpop.f32.mrf.mxu3  ;;  %v1943_v9 = vor.u32 %v2297_v59, %v1942_v58  ;;  %v1970_v58 = vld [vmem:[%s2512_s7 + $0x178] sm:$0xf]  ;;  %v2303_v59 = vld [vmem:[%s2512_s7 + $0x188] sm:$0xf0] }
  0xd1   : > { %v2754_v12 = vadd.f32 %v2672_v4, %v1184_v11  ;;  %v1146_v13 = vpop.f32.mrf.mxu1 }
  0xd2   : > { %v2757_v14 = vadd.f32 %v2672_v4, %v1146_v13 }
  0xd3   : > { %v2759_v15 = vpop.f32.mrf.mxu0 }
  0xd7   : > { %v1166_v30 = vpop.f32.mrf.mxu2 }
  0xd8   : > { %v2770_v31 = vadd.f32 %v2672_v4, %v1166_v30  ;;  %v1186_v32 = vpop.f32.mrf.mxu3 }
  0xd9   : > { %v2773_v35 = vadd.f32 %v2672_v4, %v1186_v32  ;;  %v1149_v37 = vpop.f32.mrf.mxu1 }
  0xda   : > { %v2776_v41 = vadd.f32 %v2672_v4, %v1149_v37  ;;  %v2299_v37 = vld [vmem:[%s2512_s7 + $0x16c] sm:$0xf] }
  0xdb   : > { %v2778_v42 = vpop.f32.mrf.mxu0 }
  0xdc   : > { %1237 = vmatmul.bf16.gmra.mxu1 %v1919_v33  ;;  %1326 = vmatmul.bf16.gmra.mxu2 %v1923_v34 }
  0xdd   : > { %1415 = vmatmul.bf16.gmra.mxu3 %v1927_v38  ;;  %v1956_v38 = vld [vmem:[%s2512_s7 + $0x17c] sm:$0xf0] }
  0xde   : > { %2243 = vmatmul.msk.bf16.gmra.mxu0 %vm1056_vm0, %v1931_v39  ;;  %v1962_v39 = vld [vmem:[%s2512_s7 + $0x170] sm:$0xf]  ;;  %v1959_v0 = vor.u32 %v2299_v37, %v1956_v38  ;;  %v2304_v37 = vld [vmem:[%s2512_s7 + $0x194] sm:$0xf]  ;;  %v1976_v38 = vld [vmem:[%s2512_s7 + $0x1a4] sm:$0xf0] }
  0xdf   : > { %v1169_v43 = vpop.f32.mrf.mxu2 }
  0xe0   : > { %v2782_v46 = vadd.f32 %v2672_v4, %v1169_v43  ;;  %v1189_v48 = vpop.f32.mrf.mxu3  ;;  %v2302_v43 = vld [vmem:[%s2512_s7 + $0x180] sm:$0xf0] }
  0xe1   : > { %v2785_v50 = vadd.f32 %v2672_v4, %v1189_v48  ;;  %v1151_v53 = vpop.f32.mrf.mxu1  ;;  %v2300_v48 = vld [vmem:[%s2512_s7 + $0x174] sm:$0xf] }
  0xe2   : > { %v2788_v54 = vadd.f32 %v2672_v4, %v1151_v53  ;;  %v1964_v53 = vld [vmem:[%s2512_s7 + $0x184] sm:$0xf0] }
  0xe3   : > { %v2790_v55 = vpop.f32.mrf.mxu0 }
  0xe7   : > { %v1171_v1 = vpop.f32.mrf.mxu2 }
  0xe8   : > { %v2801_v3 = vadd.f32 %v2672_v4, %v1171_v1  ;;  %v1191_v5 = vpop.f32.mrf.mxu3  ;;  %v1963_v1 = vor.u32 %v2302_v43, %v1962_v39  ;;  %v1982_v39 = vld [vmem:[%s2512_s7 + $0x198] sm:$0xf]  ;;  %v2307_v43 = vld [vmem:[%s2512_s7 + $0x1a8] sm:$0xf0] }
  0xe9   : > { %v2804_v11 = vadd.f32 %v2672_v4, %v1191_v5  ;;  %v1203_v13 = vpop.f32.mrf.mxu1 }
  0xea   : > { %v1204_v24 = vadd.f32 %v1203_v13, %v1115_v22 }
  0xeb   : > { %v1470_v20 = vpop.f32.mrf.mxu0 }
  0xec   : > { %1242 = vmatmul.bf16.gmra.mxu1 %v1939_v6  ;;  %1331 = vmatmul.bf16.gmra.mxu2 %v1943_v9  ;;  %v1967_v6 = vor.u32 %v2300_v48, %v1964_v53  ;;  %v1971_v9 = vor.u32 %v2303_v59, %v1970_v58  ;;  %v2305_v48 = vld [vmem:[%s2512_s7 + $0x19c] sm:$0xf]  ;;  %v1984_v53 = vld [vmem:[%s2512_s7 + $0x1ac] sm:$0xf0]  ;;  %v1990_v58 = vld [vmem:[%s2512_s7 + $0x1a0] sm:$0xf] }
  0xed   : > { %1420 = vmatmul.bf16.gmra.mxu3 %v1947_v16  ;;  %v2308_v59 = vld [vmem:[%s2512_s7 + $0x1b0] sm:$0xf0] }
  0xee   : > { %2244 = vmatmul.msk.bf16.gmra.mxu0 %vm1056_vm0, %v1951_v17  ;;  %v1120_v17 = vadd.f32 %v2672_v4, %v2716_v45 }
  0xef   : > { %v1292_v27 = vpop.f32.mrf.mxu2 }
  0xf0   : > { %v1293_v28 = vadd.f32 %v1292_v27, %v1204_v24  ;;  %v1381_v29 = vpop.f32.mrf.mxu3 }
  0xf1   : > { %v1205_v30 = vpop.f32.mrf.mxu1 }
  0xf2   : > { %v1382_v32 = vadd.f32 %v1381_v29, %v1293_v28  ;;  %v1206_v57 = vadd.f32 %v1205_v30, %v1117_v19  ;;  %v1122_v19 = vadd.f32 %v2672_v4, %v2728_v52  ;;  %v1987_v52 = vor.u32 %v2305_v48, %v1984_v53 }
  0xf3   : > { %v1472_v33 = vpop.f32.mrf.mxu0 }
  0xf4   : > { %v1471_v34 = vadd.f32 %v1470_v20, %v1382_v32 }
  0xf6   : > { %v1550_v56 = vmax.f32 %v1471_v34, 0.0 }
  0xf7   : > { %v1294_v60 = vpop.f32.mrf.mxu2 }
  0xf8   : > { %v1582_v26 = vpack.c.bf16 %v1550_v56, %v1550_v56  ;;  %v1295_v61 = vadd.f32 %v1294_v60, %v1206_v57  ;;  %v1383_v63 = vpop.f32.mrf.mxu3 }
  0xf9   : > { %v1208_v5 = vpop.f32.mrf.mxu1 }
  0xfa   : > { %1615 = vst.msk [vmem:[%s2823_s4] sm:$0xf] %vm1614_vm1, %v1582_v26  ;;  %v1384_v13 = vadd.f32 %v1383_v63, %v1295_v61  ;;  %v1209_v24 = vadd.f32 %v1208_v5, %v1120_v17 }
  0xfb   : > { %v1475_v16 = vpop.f32.mrf.mxu0 }
  0xfc   : > { %v1473_v20 = vadd.f32 %v1472_v33, %v1384_v13  ;;  %1247 = vmatmul.bf16.gmra.mxu1 %v1959_v0  ;;  %1336 = vmatmul.bf16.gmra.mxu2 %v1963_v1  ;;  %v1979_v0 = vor.u32 %v2304_v37, %v1976_v38  ;;  %v1983_v1 = vor.u32 %v2307_v43, %v1982_v39  ;;  %v2002_v37 = vld [vmem:[%s2512_s7 + $0x1c0] sm:$0xf]  ;;  %v2312_v38 = vld [vmem:[%s2512_s7 + $0x1d0] sm:$0xf0]  ;;  %v2310_v39 = vld [vmem:[%s2512_s7 + $0x1c4] sm:$0xf] }
  0xfd   : > { %1425 = vmatmul.bf16.gmra.mxu3 %v1967_v6  ;;  %v1991_v6 = vor.u32 %v2308_v59, %v1990_v58  ;;  %v2004_v43 = vld [vmem:[%s2512_s7 + $0x1d4] sm:$0xf0] }
  0xfe   : > { %2245 = vmatmul.msk.bf16.gmra.mxu0 %vm1056_vm0, %v1971_v9  ;;  %v1551_v22 = vmax.f32 %v1473_v20, 0.0 }
  0xff   : > { %v1297_v27 = vpop.f32.mrf.mxu2 }
 0x100   : > { %v1583_v28 = vpack.c.bf16 %v1551_v22, %v1551_v22  ;;  %v1298_v29 = vadd.f32 %v1297_v27, %v1209_v24  ;;  %v1386_v30 = vpop.f32.mrf.mxu3 }
 0x101   : > { %v1210_v45 = vpop.f32.mrf.mxu1 }
 0x102   : > { %1616 = vst.msk [vmem:[%s2823_s4 + $0x4] sm:$0xf] %vm1614_vm1, %v1583_v28  ;;  %v1387_v32 = vadd.f32 %v1386_v30, %v1298_v29  ;;  %v1211_v57 = vadd.f32 %v1210_v45, %v1122_v19  ;;  %v2309_v19 = vld [vmem:[%s2512_s7 + $0x1bc] sm:$0xf] }
 0x103   : > { %v1477_v33 = vpop.f32.mrf.mxu0 }
 0x104   : > { %v1476_v34 = vadd.f32 %v1475_v16, %v1387_v32  ;;  %v1125_v16 = vadd.f32 %v2672_v4, %v2747_v8  ;;  %v1127_v32 = vadd.f32 %v2672_v4, %v2759_v15  ;;  %v2007_v15 = vor.u32 %v2310_v39, %v2004_v43  ;;  %v2030_v39 = vld [vmem:[%s2512_s7 + $0x1f0] sm:$0xf]  ;;  %v2318_v43 = vld [vmem:[%s2512_s7 + $0x200] sm:$0xf0] }
 0x106   : > { %v1552_v56 = vmax.f32 %v1476_v34, 0.0  ;;  %v1996_v34 = vld [vmem:[%s2512_s7 + $0x1cc] sm:$0xf0] }
 0x107   : > { %v1299_v60 = vpop.f32.mrf.mxu2 }
 0x108   : > { %v1584_v26 = vpack.c.bf16 %v1552_v56, %v1552_v56  ;;  %v1300_v61 = vadd.f32 %v1299_v60, %v1211_v57  ;;  %v1388_v63 = vpop.f32.mrf.mxu3  ;;  %v2010_v56 = vld [vmem:[%s2512_s7 + $0x1c8] sm:$0xf]  ;;  %v2313_v57 = vld [vmem:[%s2512_s7 + $0x1d8] sm:$0xf0] }
 0x109   : > { %v1213_v5 = vpop.f32.mrf.mxu1 }
 0x10a   : > { %1617 = vst.msk [vmem:[%s2823_s4 + $0x8] sm:$0xf] %vm1614_vm1, %v1584_v26  ;;  %v1389_v9 = vadd.f32 %v1388_v63, %v1300_v61  ;;  %v1214_v22 = vadd.f32 %v1213_v5, %v1125_v16  ;;  %v1999_v61 = vor.u32 %v2309_v19, %v1996_v34  ;;  %v2003_v63 = vor.u32 %v2312_v38, %v2002_v37  ;;  %v2315_v19 = vld [vmem:[%s2512_s7 + $0x1ec] sm:$0xf]  ;;  %v2024_v34 = vld [vmem:[%s2512_s7 + $0x1fc] sm:$0xf0] }
 0x10b   : > { %v1480_v13 = vpop.f32.mrf.mxu0 }
 0x10c   : > { %v1478_v17 = vadd.f32 %v1477_v33, %v1389_v9  ;;  %1252 = vmatmul.bf16.gmra.mxu1 %v1979_v0  ;;  %1341 = vmatmul.bf16.gmra.mxu2 %v1983_v1  ;;  %v2011_v1 = vor.u32 %v2313_v57, %v2010_v56 }
 0x10d   : > { %1430 = vmatmul.bf16.gmra.mxu3 %v1987_v52 }
 0x10e   : > { %2246 = vmatmul.msk.bf16.gmra.mxu0 %vm1056_vm0, %v1991_v6  ;;  %v1553_v20 = vmax.f32 %v1478_v17, 0.0  ;;  %v1130_v6 = vadd.f32 %v2672_v4, %v2778_v42 }
 0x10f   : > { %v1302_v24 = vpop.f32.mrf.mxu2 }
 0x110   : > { %v1585_v27 = vpack.c.bf16 %v1553_v20, %v1553_v20  ;;  %v1303_v28 = vadd.f32 %v1302_v24, %v1214_v22  ;;  %v1391_v29 = vpop.f32.mrf.mxu3 }
 0x111   : > { %v1215_v8 = vpop.f32.mrf.mxu1 }
 0x112   : > { %1618 = vst.msk [vmem:[%s2823_s4 + $0xc] sm:$0xf] %vm1614_vm1, %v1585_v27  ;;  %v1392_v30 = vadd.f32 %v1391_v29, %v1303_v28  ;;  %v1216_v53 = vadd.f32 %v1215_v8, %v1127_v32  ;;  %v1132_v29 = vadd.f32 %v2672_v4, %v2790_v55  ;;  %v2022_v32 = vld [vmem:[%s2512_s7 + $0x1e8] sm:$0xf]  ;;  %v2027_v4 = vor.u32 %v2315_v19, %v2024_v34 }
 0x113   : > { %v1482_v45 = vpop.f32.mrf.mxu0  ;;  %v2031_v55 = vor.u32 %v2318_v43, %v2030_v39 }
 0x114   : > { %v1481_v33 = vadd.f32 %v1480_v13, %v1392_v30  ;;  %v2314_v30 = vld [vmem:[%s2512_s7 + $0x1e4] sm:$0xf] }
 0x116   : > { %v1554_v48 = vmax.f32 %v1481_v33, 0.0  ;;  %v2317_v33 = vld [vmem:[%s2512_s7 + $0x1f8] sm:$0xf0] }
 0x117   : > { %v1304_v58 = vpop.f32.mrf.mxu2 }
 0x118   : > { %v1586_v59 = vpack.c.bf16 %v1554_v48, %v1554_v48  ;;  %v1305_v60 = vadd.f32 %v1304_v58, %v1216_v53  ;;  %v1393_v26 = vpop.f32.mrf.mxu3 }
 0x119   : > { %v1218_v0 = vpop.f32.mrf.mxu1 }
 0x11a   : > { %1619 = vst.msk [vmem:[%s2823_s4 + $0x10] sm:$0xf] %vm1614_vm1, %v1586_v59  ;;  %v1394_v5 = vadd.f32 %v1393_v26, %v1305_v60  ;;  %v1219_v16 = vadd.f32 %v1218_v0, %v1130_v6  ;;  %v2023_v59 = vor.u32 %v2317_v33, %v2022_v32 }
 0x11b   : > { %v1485_v52 = vpop.f32.mrf.mxu0 }
 0x11c   : > { %v1483_v9 = vadd.f32 %v1482_v45, %v1394_v5  ;;  %1257 = vmatmul.bf16.gmra.mxu1 %v1999_v61  ;;  %1346 = vmatmul.bf16.gmra.mxu2 %v2003_v63  ;;  %v2016_v45 = vld [vmem:[%s2512_s7 + $0x1f4] sm:$0xf0] }
 0x11d   : > { %1435 = vmatmul.bf16.gmra.mxu3 %v2007_v15  ;;  %v2019_v58 = vor.u32 %v2314_v30, %v2016_v45  ;;  %v2323_v30 = vld [vmem:[%s2512_s7 + $0x228] sm:$0xf0] }
 0x11e   : > { %2247 = vmatmul.msk.bf16.gmra.mxu0 %vm1056_vm0, %v2011_v1  ;;  %v1555_v13 = vmax.f32 %v1483_v9, 0.0 }
 0x11f   : > { %v1307_v17 = vpop.f32.mrf.mxu2 }
 0x120   : > { %v1587_v20 = vpack.c.bf16 %v1555_v13, %v1555_v13  ;;  %v1308_v22 = vadd.f32 %v1307_v17, %v1219_v16  ;;  %v1396_v24 = vpop.f32.mrf.mxu3 }
 0x121   : > { %v1220_v42 = vpop.f32.mrf.mxu1 }
 0x122   : > { %1620 = vst.msk [vmem:[%s2823_s4 + $0x14] sm:$0xf] %vm1614_vm1, %v1587_v20  ;;  %v1397_v27 = vadd.f32 %v1396_v24, %v1308_v22  ;;  %v1221_v38 = vadd.f32 %v1220_v42, %v1132_v29  ;;  %v2319_v20 = vld [vmem:[%s2512_s7 + $0x20c] sm:$0xf]  ;;  %v2036_v22 = vld [vmem:[%s2512_s7 + $0x21c] sm:$0xf0] }
 0x123   : > { %v1487_v28 = vpop.f32.mrf.mxu0  ;;  %v2042_v24 = vld [vmem:[%s2512_s7 + $0x210] sm:$0xf]  ;;  %v2322_v42 = vld [vmem:[%s2512_s7 + $0x220] sm:$0xf0]  ;;  %v2039_v34 = vor.u32 %v2319_v20, %v2036_v22 }
 0x124   : > { %v1486_v8 = vadd.f32 %v1485_v52, %v1397_v27  ;;  %v2320_v27 = vld [vmem:[%s2512_s7 + $0x214] sm:$0xf] }
 0x126   : > { %v1556_v37 = vmax.f32 %v1486_v8, 0.0  ;;  %v2050_v8 = vld [vmem:[%s2512_s7 + $0x218] sm:$0xf] }
 0x127   : > { %v1309_v48 = vpop.f32.mrf.mxu2  ;;  %v2051_v43 = vor.u32 %v2323_v30, %v2050_v8 }
 0x128   : > { %v1588_v53 = vpack.c.bf16 %v1556_v37, %v1556_v37  ;;  %v1310_v56 = vadd.f32 %v1309_v48, %v1221_v38  ;;  %v1398_v57 = vpop.f32.mrf.mxu3  ;;  %v2043_v37 = vor.u32 %v2322_v42, %v2042_v24 }
 0x129   : > { %v1223_v60 = vpop.f32.mrf.mxu1 }
 0x12a   : > { %1621 = vst.msk [vmem:[%s2823_s4 + $0x18] sm:$0xf] %vm1614_vm1, %v1588_v53  ;;  %v1399_v26 = vadd.f32 %v1398_v57, %v1310_v56  ;;  %v1224_v15 = vadd.f32 %v1223_v60, %v2683_v18 }
 0x12b   : > { %v1490_v61 = vpop.f32.mrf.mxu0 }
 0x12c   : > { %v1488_v63 = vadd.f32 %v1487_v28, %v1399_v26  ;;  %1262 = vmatmul.bf16.gmra.mxu1 %v2019_v58  ;;  %1351 = vmatmul.bf16.gmra.mxu2 %v2023_v59  ;;  %v2044_v28 = vld [vmem:[%s2512_s7 + $0x224] sm:$0xf0] }
 0x12d   : > { %1440 = vmatmul.bf16.gmra.mxu3 %v2027_v4  ;;  %v2047_v39 = vor.u32 %v2320_v27, %v2044_v28 }
 0x12e   : > { %2248 = vmatmul.msk.bf16.gmra.mxu0 %vm1056_vm0, %v2031_v55  ;;  %v1557_v0 = vmax.f32 %v1488_v63, 0.0 }
 0x12f   : > { %v1312_v1 = vpop.f32.mrf.mxu2 }
 0x130   : > { %v1589_v5 = vpack.c.bf16 %v1557_v0, %v1557_v0  ;;  %v1313_v52 = vadd.f32 %v1312_v1, %v1224_v15  ;;  %v1401_v6 = vpop.f32.mrf.mxu3  ;;  %v2324_v0 = vld [vmem:[%s2512_s7 + $0x234] sm:$0xf]  ;;  %v2056_v15 = vld [vmem:[%s2512_s7 + $0x244] sm:$0xf0]  ;;  %v2062_v1 = vld [vmem:[%s2512_s7 + $0x238] sm:$0xf] }
 0x131   : > { %v1225_v9 = vpop.f32.mrf.mxu1  ;;  %v2059_v42 = vor.u32 %v2324_v0, %v2056_v15 }
 0x132   : > { %1622 = vst.msk [vmem:[%s2823_s4 + $0x1c] sm:$0xf] %vm1614_vm1, %v1589_v5  ;;  %v1402_v13 = vadd.f32 %v1401_v6, %v1313_v52  ;;  %v1226_v29 = vadd.f32 %v1225_v9, %v2695_v25  ;;  %v2327_v5 = vld [vmem:[%s2512_s7 + $0x248] sm:$0xf0]  ;;  %v2325_v52 = vld [vmem:[%s2512_s7 + $0x23c] sm:$0xf] }
 0x133   : > { %v1492_v16 = vpop.f32.mrf.mxu0  ;;  %v2064_v6 = vld [vmem:[%s2512_s7 + $0x24c] sm:$0xf0]  ;;  %v2063_v27 = vor.u32 %v2327_v5, %v2062_v1 }
 0x134   : > { %v1491_v17 = vadd.f32 %v1490_v61, %v1402_v13  ;;  %v2070_v13 = vld [vmem:[%s2512_s7 + $0x240] sm:$0xf] }
 0x136   : > { %v1558_v18 = vmax.f32 %v1491_v17, 0.0 }
 0x137   : > { %v1314_v45 = vpop.f32.mrf.mxu2 }
 0x138   : > { %v1590_v32 = vpack.c.bf16 %v1558_v18, %v1558_v18  ;;  %v1315_v33 = vadd.f32 %v1314_v45, %v1226_v29  ;;  %v1403_v19 = vpop.f32.mrf.mxu3  ;;  %v2067_v18 = vor.u32 %v2325_v52, %v2064_v6 }
 0x139   : > { %v1228_v38 = vpop.f32.mrf.mxu1 }
 0x13a   : > { %1623 = vst.msk [vmem:[%s2823_s4 + $0x20] sm:$0xf] %vm1614_vm1, %v1590_v32  ;;  %v1404_v48 = vadd.f32 %v1403_v19, %v1315_v33  ;;  %v1229_v57 = vadd.f32 %v1228_v38, %v2714_v44 }
 0x13b   : > { %v1495_v53 = vpop.f32.mrf.mxu0 }
 0x13c   : > { %v1493_v56 = vadd.f32 %v1492_v16, %v1404_v48  ;;  %1267 = vmatmul.bf16.gmra.mxu1 %v2039_v34  ;;  %1356 = vmatmul.bf16.gmra.mxu2 %v2043_v37  ;;  %v2328_v16 = vld [vmem:[%s2512_s7 + $0x250] sm:$0xf0] }
 0x13d   : > { %1445 = vmatmul.bf16.gmra.mxu3 %v2047_v39  ;;  %v2071_v29 = vor.u32 %v2328_v16, %v2070_v13 }
 0x13e   : > { %2249 = vmatmul.msk.bf16.gmra.mxu0 %vm1056_vm0, %v2051_v43  ;;  %v1559_v25 = vmax.f32 %v1493_v56, 0.0  ;;  %v2076_v56 = vld [vmem:[%s2512_s7 + $0x26c] sm:$0xf0] }
 0x13f   : > { %v1317_v58 = vpop.f32.mrf.mxu2 }
 0x140   : > { %v1591_v59 = vpack.c.bf16 %v1559_v25, %v1559_v25  ;;  %v1318_v60 = vadd.f32 %v1317_v58, %v1229_v57  ;;  %v1406_v4 = vpop.f32.mrf.mxu3  ;;  %v2082_v25 = vld [vmem:[%s2512_s7 + $0x260] sm:$0xf]  ;;  %v2332_v57 = vld [vmem:[%s2512_s7 + $0x270] sm:$0xf0]  ;;  %v2330_v58 = vld [vmem:[%s2512_s7 + $0x264] sm:$0xf] }
 0x141   : > { %v1230_v55 = vpop.f32.mrf.mxu1  ;;  %v2083_v1 = vor.u32 %v2332_v57, %v2082_v25 }
 0x142   : > { %1624 = vst.msk [vmem:[%s2823_s4 + $0x24] sm:$0xf] %vm1614_vm1, %v1591_v59  ;;  %v1407_v26 = vadd.f32 %v1406_v4, %v1318_v60  ;;  %v1231_v9 = vadd.f32 %v1230_v55, %v2726_v51  ;;  %v2084_v59 = vld [vmem:[%s2512_s7 + $0x274] sm:$0xf0]  ;;  %v2090_v4 = vld [vmem:[%s2512_s7 + $0x268] sm:$0xf] }
 0x143   : > { %v1497_v61 = vpop.f32.mrf.mxu0  ;;  %v2333_v55 = vld [vmem:[%s2512_s7 + $0x278] sm:$0xf0]  ;;  %v2087_v52 = vor.u32 %v2330_v58, %v2084_v59 }
 0x144   : > { %v1496_v63 = vadd.f32 %v1495_v53, %v1407_v26  ;;  %v2329_v53 = vld [vmem:[%s2512_s7 + $0x25c] sm:$0xf]  ;;  %v2091_v6 = vor.u32 %v2333_v55, %v2090_v4 }
 0x145   : > { %v2079_v15 = vor.u32 %v2329_v53, %v2076_v56 }
 0x146   : > { %v1560_v44 = vmax.f32 %v1496_v63, 0.0 }
 0x147   : > { %v1319_v17 = vpop.f32.mrf.mxu2 }
 0x148   : > { %v1592_v20 = vpack.c.bf16 %v1560_v44, %v1560_v44  ;;  %v1320_v22 = vadd.f32 %v1319_v17, %v1231_v9  ;;  %v1408_v24 = vpop.f32.mrf.mxu3 }
 0x149   : > { %v1233_v28 = vpop.f32.mrf.mxu1 }
 0x14a   : > { %1625 = vst.msk [vmem:[%s2823_s4 + $0x28] sm:$0xf] %vm1614_vm1, %v1592_v20  ;;  %v1409_v8 = vadd.f32 %v1408_v24, %v1320_v22  ;;  %v1234_v32 = vadd.f32 %v1233_v28, %v2745_v7 }
 0x14b   : > { %v1500_v30 = vpop.f32.mrf.mxu0 }
 0x14c   : > { %v1498_v45 = vadd.f32 %v1497_v61, %v1409_v8  ;;  %1272 = vmatmul.bf16.gmra.mxu1 %v2059_v42  ;;  %1361 = vmatmul.bf16.gmra.mxu2 %v2063_v27 }
 0x14d   : > { %1450 = vmatmul.bf16.gmra.mxu3 %v2067_v18 }
 0x14e   : > { %2250 = vmatmul.msk.bf16.gmra.mxu0 %vm1056_vm0, %v2071_v29  ;;  %v1561_v51 = vmax.f32 %v1498_v45, 0.0 }
 0x14f   : > { %v1322_v33 = vpop.f32.mrf.mxu2 }
 0x150   : > { %v1593_v19 = vpack.c.bf16 %v1561_v51, %v1561_v51  ;;  %v1323_v34 = vadd.f32 %v1322_v33, %v1234_v32  ;;  %v1411_v37 = vpop.f32.mrf.mxu3 }
 0x151   : > { %v1235_v38 = vpop.f32.mrf.mxu1 }
 0x152   : > { %1626 = vst.msk [vmem:[%s2823_s4 + $0x2c] sm:$0xf] %vm1614_vm1, %v1593_v19  ;;  %v1412_v39 = vadd.f32 %v1411_v37, %v1323_v34  ;;  %v1236_v60 = vadd.f32 %v1235_v38, %v2757_v14 }
 0x153   : > { %v1502_v43 = vpop.f32.mrf.mxu0 }
 0x154   : > { %v1501_v48 = vadd.f32 %v1500_v30, %v1412_v39 }
 0x156   : > { %v1562_v7 = vmax.f32 %v1501_v48, 0.0 }
 0x157   : > { %v1324_v26 = vpop.f32.mrf.mxu2 }
 0x158   : > { %v1594_v61 = vpack.c.bf16 %v1562_v7, %v1562_v7  ;;  %v1325_v63 = vadd.f32 %v1324_v26, %v1236_v60  ;;  %v1413_v0 = vpop.f32.mrf.mxu3 }
 0x159   : > { %v1238_v5 = vpop.f32.mrf.mxu1 }
 0x15a   : > { %1627 = vst.msk [vmem:[%s2823_s4 + $0x30] sm:$0xf] %vm1614_vm1, %v1594_v61  ;;  %v1414_v44 = vadd.f32 %v1413_v0, %v1325_v63  ;;  %v1239_v16 = vadd.f32 %v1238_v5, %v2776_v41 }
 0x15b   : > { %v1505_v9 = vpop.f32.mrf.mxu0 }
 0x15c   : > { %v1503_v13 = vadd.f32 %v1502_v43, %v1414_v44  ;;  %1277 = vmatmul.bf16.gmra.mxu1 %v2079_v15  ;;  %1366 = vmatmul.bf16.gmra.mxu2 %v2083_v1 }
 0x15d   : > { %1455 = vmatmul.bf16.gmra.mxu3 %v2087_v52 }
 0x15e   : > { %2251 = vmatmul.msk.bf16.gmra.mxu0 %vm1056_vm0, %v2091_v6  ;;  %v1563_v14 = vmax.f32 %v1503_v13, 0.0 }
 0x15f   : > { %v1327_v17 = vpop.f32.mrf.mxu2 }
 0x160   : > { %v1595_v20 = vpack.c.bf16 %v1563_v14, %v1563_v14  ;;  %v1328_v22 = vadd.f32 %v1327_v17, %v1239_v16  ;;  %v1416_v24 = vpop.f32.mrf.mxu3 }
 0x161   : > { %v1240_v42 = vpop.f32.mrf.mxu1 }
 0x162   : > { %1628 = vst.msk [vmem:[%s2823_s4 + $0x34] sm:$0xf] %vm1614_vm1, %v1595_v20  ;;  %v1417_v27 = vadd.f32 %v1416_v24, %v1328_v22  ;;  %v1241_v8 = vadd.f32 %v1240_v42, %v2788_v54 }
 0x163   : > { %v1507_v28 = vpop.f32.mrf.mxu0 }
 0x164   : > { %v1506_v18 = vadd.f32 %v1505_v9, %v1417_v27 }
 0x166   : > { %v1564_v29 = vmax.f32 %v1506_v18, 0.0 }
 0x167   : > { %v1329_v30 = vpop.f32.mrf.mxu2 }
 0x168   : > { %v1596_v45 = vpack.c.bf16 %v1564_v29, %v1564_v29  ;;  %v1330_v51 = vadd.f32 %v1329_v30, %v1241_v8  ;;  %v1418_v32 = vpop.f32.mrf.mxu3 }
 0x169   : > { %v1243_v41 = vpop.f32.mrf.mxu1 }
 0x16a   : > { %1629 = vst.msk [vmem:[%s2823_s4 + $0x38] sm:$0xf] %vm1614_vm1, %v1596_v45  ;;  %v1419_v33 = vadd.f32 %v1418_v32, %v1330_v51  ;;  %v1244_v38 = vadd.f32 %v1243_v41, %v2689_v21 }
 0x16b   : > { %v1510_v19 = vpop.f32.mrf.mxu0 }
 0x16c   : > { %v1508_v34 = vadd.f32 %v1507_v28, %v1419_v33 }
 0x16e   : > { %v1565_v37 = vmax.f32 %v1508_v34, 0.0 }
 0x16f   : > { %v1332_v39 = vpop.f32.mrf.mxu2 }
 0x170   : > { %v1597_v43 = vpack.c.bf16 %v1565_v37, %v1565_v37  ;;  %v1333_v48 = vadd.f32 %v1332_v39, %v1244_v38  ;;  %v1421_v53 = vpop.f32.mrf.mxu3 }
 0x171   : > { %v1245_v54 = vpop.f32.mrf.mxu1 }
 0x172   : > { %1630 = vst.msk [vmem:[%s2823_s4 + $0x3c] sm:$0xf] %vm1614_vm1, %v1597_v43  ;;  %v1422_v56 = vadd.f32 %v1421_v53, %v1333_v48  ;;  %v1246_v59 = vadd.f32 %v1245_v54, %v2708_v36 }
 0x173   : > { %v1512_v25 = vpop.f32.mrf.mxu0 }
 0x174   : > { %v1511_v57 = vadd.f32 %v1510_v19, %v1422_v56 }
 0x176   : > { %v1566_v58 = vmax.f32 %v1511_v57, 0.0 }
 0x177   : > { %v1334_v7 = vpop.f32.mrf.mxu2 }
 0x178   : > { %v1598_v60 = vpack.c.bf16 %v1566_v58, %v1566_v58  ;;  %v1335_v4 = vadd.f32 %v1334_v7, %v1246_v59  ;;  %v1423_v55 = vpop.f32.mrf.mxu3 }
 0x179   : > { %v1248_v21 = vpop.f32.mrf.mxu1 }
 0x17a   : > { %1631 = vst.msk [vmem:[%s2823_s4 + $0x40] sm:$0xf] %vm1614_vm1, %v1598_v60  ;;  %v1424_v26 = vadd.f32 %v1423_v55, %v1335_v4  ;;  %v1249_v15 = vadd.f32 %v1248_v21, %v2720_v47 }
 0x17b   : > { %v1515_v61 = vpop.f32.mrf.mxu0 }
 0x17c   : > { %v1513_v63 = vadd.f32 %v1512_v25, %v1424_v26 }
 0x17e   : > { %v1567_v0 = vmax.f32 %v1513_v63, 0.0 }
 0x17f   : > { %v1337_v1 = vpop.f32.mrf.mxu2 }
 0x180   : > { %v1599_v5 = vpack.c.bf16 %v1567_v0, %v1567_v0  ;;  %v1338_v52 = vadd.f32 %v1337_v1, %v1249_v15  ;;  %v1426_v6 = vpop.f32.mrf.mxu3 }
 0x181   : > { %v1250_v36 = vpop.f32.mrf.mxu1 }
 0x182   : > { %1632 = vst.msk [vmem:[%s2823_s4 + $0x44] sm:$0xf] %vm1614_vm1, %v1599_v5  ;;  %v1427_v44 = vadd.f32 %v1426_v6, %v1338_v52  ;;  %v1251_v16 = vadd.f32 %v1250_v36, %v2739_v62 }
 0x183   : > { %v1517_v9 = vpop.f32.mrf.mxu0 }
 0x184   : > { %v1516_v13 = vadd.f32 %v1515_v61, %v1427_v44 }
 0x186   : > { %v1568_v14 = vmax.f32 %v1516_v13, 0.0 }
 0x187   : > { %v1339_v17 = vpop.f32.mrf.mxu2 }
 0x188   : > { %v1600_v20 = vpack.c.bf16 %v1568_v14, %v1568_v14  ;;  %v1340_v22 = vadd.f32 %v1339_v17, %v1251_v16  ;;  %v1428_v24 = vpop.f32.mrf.mxu3 }
 0x189   : > { %v1253_v47 = vpop.f32.mrf.mxu1 }
 0x18a   : > { %1633 = vst.msk [vmem:[%s2823_s4 + $0x48] sm:$0xf] %vm1614_vm1, %v1600_v20  ;;  %v1429_v42 = vadd.f32 %v1428_v24, %v1340_v22  ;;  %v1254_v29 = vadd.f32 %v1253_v47, %v2751_v10 }
 0x18b   : > { %v1520_v27 = vpop.f32.mrf.mxu0 }
 0x18c   : > { %v1518_v28 = vadd.f32 %v1517_v9, %v1429_v42 }
 0x18e   : > { %v1569_v18 = vmax.f32 %v1518_v28, 0.0 }
 0x18f   : > { %v1342_v8 = vpop.f32.mrf.mxu2 }
 0x190   : > { %v1601_v30 = vpack.c.bf16 %v1569_v18, %v1569_v18  ;;  %v1343_v45 = vadd.f32 %v1342_v8, %v1254_v29  ;;  %v1431_v51 = vpop.f32.mrf.mxu3 }
 0x191   : > { %v1255_v62 = vpop.f32.mrf.mxu1 }
 0x192   : > { %1634 = vst.msk [vmem:[%s2823_s4 + $0x4c] sm:$0xf] %vm1614_vm1, %v1601_v30  ;;  %v1432_v32 = vadd.f32 %v1431_v51, %v1343_v45  ;;  %v1256_v34 = vadd.f32 %v1255_v62, %v2770_v31 }
 0x193   : > { %v1522_v41 = vpop.f32.mrf.mxu0 }
 0x194   : > { %v1521_v33 = vadd.f32 %v1520_v27, %v1432_v32 }
 0x196   : > { %v1570_v19 = vmax.f32 %v1521_v33, 0.0 }
 0x197   : > { %v1344_v37 = vpop.f32.mrf.mxu2 }
 0x198   : > { %v1602_v38 = vpack.c.bf16 %v1570_v19, %v1570_v19  ;;  %v1345_v39 = vadd.f32 %v1344_v37, %v1256_v34  ;;  %v1433_v43 = vpop.f32.mrf.mxu3 }
 0x199   : > { %v1258_v10 = vpop.f32.mrf.mxu1 }
 0x19a   : > { %1635 = vst.msk [vmem:[%s2823_s4 + $0x50] sm:$0xf] %vm1614_vm1, %v1602_v38  ;;  %v1434_v48 = vadd.f32 %v1433_v43, %v1345_v39  ;;  %v1259_v25 = vadd.f32 %v1258_v10, %v2782_v46 }
 0x19b   : > { %v1525_v53 = vpop.f32.mrf.mxu0 }
 0x19c   : > { %v1523_v54 = vadd.f32 %v1522_v41, %v1434_v48 }
 0x19e   : > { %v1571_v56 = vmax.f32 %v1523_v54, 0.0 }
 0x19f   : > { %v1347_v57 = vpop.f32.mrf.mxu2 }
 0x1a0   : > { %v1603_v58 = vpack.c.bf16 %v1571_v56, %v1571_v56  ;;  %v1348_v59 = vadd.f32 %v1347_v57, %v1259_v25  ;;  %v1436_v7 = vpop.f32.mrf.mxu3 }
 0x1a1   : > { %v1260_v31 = vpop.f32.mrf.mxu1 }
 0x1a2   : > { %1636 = vst.msk [vmem:[%s2823_s4 + $0x54] sm:$0xf] %vm1614_vm1, %v1603_v58  ;;  %v1437_v60 = vadd.f32 %v1436_v7, %v1348_v59  ;;  %v1261_v26 = vadd.f32 %v1260_v31, %v2801_v3 }
 0x1a3   : > { %v1527_v4 = vpop.f32.mrf.mxu0 }
 0x1a4   : > { %v1526_v55 = vadd.f32 %v1525_v53, %v1437_v60 }
 0x1a6   : > { %v1572_v21 = vmax.f32 %v1526_v55, 0.0 }
 0x1a7   : > { %v1349_v61 = vpop.f32.mrf.mxu2 }
 0x1a8   : > { %v1604_v63 = vpack.c.bf16 %v1572_v21, %v1572_v21  ;;  %v1350_v0 = vadd.f32 %v1349_v61, %v1261_v26  ;;  %v1438_v15 = vpop.f32.mrf.mxu3 }
 0x1a9   : > { %v1263_v46 = vpop.f32.mrf.mxu1 }
 0x1aa   : > { %1637 = vst.msk [vmem:[%s2823_s4 + $0x58] sm:$0xf] %vm1614_vm1, %v1604_v63  ;;  %v1439_v1 = vadd.f32 %v1438_v15, %v1350_v0  ;;  %v1264_v36 = vadd.f32 %v1263_v46, %v2692_v23 }
 0x1ab   : > { %v1530_v5 = vpop.f32.mrf.mxu0 }
 0x1ac   : > { %v1528_v52 = vadd.f32 %v1527_v4, %v1439_v1 }
 0x1ae   : > { %v1573_v6 = vmax.f32 %v1528_v52, 0.0 }
 0x1af   : > { %v1352_v44 = vpop.f32.mrf.mxu2 }
 0x1b0   : > { %v1605_v9 = vpack.c.bf16 %v1573_v6, %v1573_v6  ;;  %v1353_v13 = vadd.f32 %v1352_v44, %v1264_v36  ;;  %v1441_v14 = vpop.f32.mrf.mxu3 }
 0x1b1   : > { %v1265_v3 = vpop.f32.mrf.mxu1 }
 0x1b2   : > { %1638 = vst.msk [vmem:[%s2823_s4 + $0x5c] sm:$0xf] %vm1614_vm1, %v1605_v9  ;;  %v1442_v16 = vadd.f32 %v1441_v14, %v1353_v13  ;;  %v1266_v24 = vadd.f32 %v1265_v3, %v2711_v40 }
 0x1b3   : > { %v1532_v17 = vpop.f32.mrf.mxu0 }
 0x1b4   : > { %v1531_v20 = vadd.f32 %v1530_v5, %v1442_v16 }
 0x1b6   : > { %v1574_v22 = vmax.f32 %v1531_v20, 0.0 }
 0x1b7   : > { %v1354_v47 = vpop.f32.mrf.mxu2 }
 0x1b8   : > { %v1606_v42 = vpack.c.bf16 %v1574_v22, %v1574_v22  ;;  %v1355_v27 = vadd.f32 %v1354_v47, %v1266_v24  ;;  %v1443_v28 = vpop.f32.mrf.mxu3 }
 0x1b9   : > { %v1268_v23 = vpop.f32.mrf.mxu1 }
 0x1ba   : > { %1639 = vst.msk [vmem:[%s2823_s4 + $0x60] sm:$0xf] %vm1614_vm1, %v1606_v42  ;;  %v1444_v18 = vadd.f32 %v1443_v28, %v1355_v27  ;;  %v1269_v45 = vadd.f32 %v1268_v23, %v2723_v49 }
 0x1bb   : > { %v1535_v29 = vpop.f32.mrf.mxu0 }
 0x1bc   : > { %v1533_v8 = vadd.f32 %v1532_v17, %v1444_v18 }
 0x1be   : > { %v1575_v30 = vmax.f32 %v1533_v8, 0.0 }
 0x1bf   : > { %v1357_v51 = vpop.f32.mrf.mxu2 }
 0x1c0   : > { %v1607_v62 = vpack.c.bf16 %v1575_v30, %v1575_v30  ;;  %v1358_v32 = vadd.f32 %v1357_v51, %v1269_v45  ;;  %v1446_v41 = vpop.f32.mrf.mxu3 }
 0x1c1   : > { %v1270_v40 = vpop.f32.mrf.mxu1 }
 0x1c2   : > { %1640 = vst.msk [vmem:[%s2823_s4 + $0x64] sm:$0xf] %vm1614_vm1, %v1607_v62  ;;  %v1447_v33 = vadd.f32 %v1446_v41, %v1358_v32  ;;  %v1271_v38 = vadd.f32 %v1270_v40, %v2742_v2 }
 0x1c3   : > { %v1537_v19 = vpop.f32.mrf.mxu0 }
 0x1c4   : > { %v1536_v34 = vadd.f32 %v1535_v29, %v1447_v33 }
 0x1c6   : > { %v1576_v37 = vmax.f32 %v1536_v34, 0.0 }
 0x1c7   : > { %v1359_v39 = vpop.f32.mrf.mxu2 }
 0x1c8   : > { %v1608_v43 = vpack.c.bf16 %v1576_v37, %v1576_v37  ;;  %v1360_v10 = vadd.f32 %v1359_v39, %v1271_v38  ;;  %v1448_v48 = vpop.f32.mrf.mxu3 }
 0x1c9   : > { %v1273_v49 = vpop.f32.mrf.mxu1 }
 0x1ca   : > { %1641 = vst.msk [vmem:[%s2823_s4 + $0x68] sm:$0xf] %vm1614_vm1, %v1608_v43  ;;  %v1449_v53 = vadd.f32 %v1448_v48, %v1360_v10  ;;  %v1274_v57 = vadd.f32 %v1273_v49, %v2754_v12 }
 0x1cb   : > { %v1540_v56 = vpop.f32.mrf.mxu0 }
 0x1cc   : > { %v1538_v54 = vadd.f32 %v1537_v19, %v1449_v53 }
 0x1ce   : > { %v1577_v25 = vmax.f32 %v1538_v54, 0.0 }
 0x1cf   : > { %v1362_v58 = vpop.f32.mrf.mxu2 }
 0x1d0   : > { %v1609_v59 = vpack.c.bf16 %v1577_v25, %v1577_v25  ;;  %v1363_v7 = vadd.f32 %v1362_v58, %v1274_v57  ;;  %v1451_v31 = vpop.f32.mrf.mxu3 }
 0x1d1   : > { %v1275_v2 = vpop.f32.mrf.mxu1 }
 0x1d2   : > { %1642 = vst.msk [vmem:[%s2823_s4 + $0x6c] sm:$0xf] %vm1614_vm1, %v1609_v59  ;;  %v1452_v60 = vadd.f32 %v1451_v31, %v1363_v7  ;;  %v1276_v21 = vadd.f32 %v1275_v2, %v2773_v35 }
 0x1d3   : > { %v1542_v26 = vpop.f32.mrf.mxu0 }
 0x1d4   : > { %v1541_v4 = vadd.f32 %v1540_v56, %v1452_v60 }
 0x1d6   : > { %v1578_v55 = vmax.f32 %v1541_v4, 0.0 }
 0x1d7   : > { %v1364_v61 = vpop.f32.mrf.mxu2 }
 0x1d8   : > { %v1610_v63 = vpack.c.bf16 %v1578_v55, %v1578_v55  ;;  %v1365_v0 = vadd.f32 %v1364_v61, %v1276_v21  ;;  %v1453_v15 = vpop.f32.mrf.mxu3 }
 0x1d9   : > { %v1278_v12 = vpop.f32.mrf.mxu1 }
 0x1da   : > { %1643 = vst.msk [vmem:[%s2823_s4 + $0x70] sm:$0xf] %vm1614_vm1, %v1610_v63  ;;  %v1454_v46 = vadd.f32 %v1453_v15, %v1365_v0  ;;  %v1279_v52 = vadd.f32 %v1278_v12, %v2785_v50 }
 0x1db   : > { %v1545_v35 = vpop.f32.mrf.mxu0 }
 0x1dc   : > { %v1543_v1 = vadd.f32 %v1542_v26, %v1454_v46 }
 0x1de   : > { %v1579_v5 = vmax.f32 %v1543_v1, 0.0 }
 0x1df   : > { %v1367_v6 = vpop.f32.mrf.mxu2 }
 0x1e0   : > { %v1611_v36 = vpack.c.bf16 %v1579_v5, %v1579_v5  ;;  %v1368_v44 = vadd.f32 %v1367_v6, %v1279_v52  ;;  %v1456_v9 = vpop.f32.mrf.mxu3 }
 0x1e1   : > { %v1280_v14 = vpop.f32.mrf.mxu1 }
 0x1e2   : > { %1644 = vst.msk [vmem:[%s2823_s4 + $0x74] sm:$0xf] %vm1614_vm1, %v1611_v36  ;;  %v1457_v13 = vadd.f32 %v1456_v9, %v1368_v44  ;;  %v1281_v17 = vadd.f32 %v1280_v14, %v2804_v11 }
 0x1e3   : > { %v1547_v42 = vpop.f32.mrf.mxu0 }
 0x1e4   : > { %v1546_v3 = vadd.f32 %v1545_v35, %v1457_v13 }
 0x1e6   : > { %v1580_v16 = vmax.f32 %v1546_v3, 0.0 }
 0x1e7   : > { %v1369_v20 = vpop.f32.mrf.mxu2 }
 0x1e8   : > { %v1612_v22 = vpack.c.bf16 %v1580_v16, %v1580_v16  ;;  %v1370_v24 = vadd.f32 %v1369_v20, %v1281_v17  ;;  %v1458_v47 = vpop.f32.mrf.mxu3 }
 0x1ea   : > { %1645 = vst.msk [vmem:[%s2823_s4 + $0x78] sm:$0xf] %vm1614_vm1, %v1612_v22  ;;  %v1459_v50 = vadd.f32 %v1458_v47, %v1370_v24 }
 0x1ec   : > { %v1548_v27 = vadd.f32 %v1547_v42, %v1459_v50 }
 0x1ee   : > { %v1581_v28 = vmax.f32 %v1548_v27, 0.0 }
 0x1f0   : > { %v1613_v23 = vpack.c.bf16 %v1581_v28, %v1581_v28 }
 0x1f2   : > { %1646 = vst.msk [vmem:[%s2823_s4 + $0x7c] sm:$0xf] %vm1614_vm1, %v1613_v23 }
 0x1f3 PF: > { %s13_s14 = sadd.s32 1, %s2442_s14   ;;  %s2993_s12 = smov %s2438_s13 }
 0x1f4   : > { %p10_p5 = scmp.ge.s32.totalorder %s13_s14, 4   ;;  %s2994_s13 = smov %s2996_s15 }
 0x1f6   :  { %12 = sbr.rel (!%p10_p5) target bundleno = 2 (0x2), region = 68 }

// kernel: model_forward.15
= control target key start
LH: loop header
LB: loop body
LE: loop exit
PB: predicated region body
PF: predicated region fallthrough
CT: control target
= control target key end

     0   :  { %s2721_s15 = smov 0   ;;  %s2723_s16 = smov 0   ;;  %s3271_s0 = inlined_call_operand.vmem [shape: bf16[512,576], index: 0, kind: input, shape index: {}]   ;;  %s3272_s1 = inlined_call_operand.vmem [shape: bf16[576,64], index: 1, kind: input, shape index: {}]   ;;  %s3273_s2 = inlined_call_operand.vmem [shape: f32[1,64], index: 2, kind: input, shape index: {}]   ;;  %s3274_s3 = inlined_call_operand.vmem [shape: bf16[512,64], index: 3, kind: input, shape index: {}]   ;;  %s3275_s4 = inlined_call_operand.vmem [shape: bf16[512,64], index: 4, kind: output, shape index: {}]  }
   0x1   :  { %s2725_s17 = smov 0  }
   0x2 LB: > { %s33_s18 = sadd.s32 1, %s2690_s16  ;;  %p1938_p0 = scmp.ge.s32.totalorder %s2694_s17, 1  ;;  %s2694_s17 = sphi %s2725_s17, %s14_s17   ;;  %s2690_s16 = sphi %s2723_s16, %s3277_s16   ;;  %s2686_s15 = sphi %s2721_s15, %s3276_s15  }
   0x3   : > { %p35_p1 = scmp.ge.s32.totalorder %s33_s18, 2  ;;  %p232_p2 = scmp.lt.s32.totalorder %s2694_s17, 3 }
   0x5   : > { %s3279_s18 = smov (%p35_p1, %s33_s18), 0  ;;  %p233_p3 = pnand %p1938_p0, %p232_p2 }
   0x6   : > { %s1939_s25 = sshll.u32 (!%p233_p3), %s2686_s15, 5 }
   0x7   : > { %236 = sbr.rel (%p233_p3) target bundleno = 501 (0x1f5), region = 36  ;;  %p287_p4 = scmp.lt.s32.totalorder (!%p233_p3), %s1939_s25, 63 }
   0xc   : > { %v2514_v0 = vld [vmem:[%s3272_s1 + $0x38] sm:$0xff]  ;;  %v2513_v1 = vld [vmem:[%s3272_s1 + $0x30] sm:$0xff]  ;;  %v2512_v2 = vld [vmem:[%s3272_s1 + $0x28] sm:$0xff]  ;;  %s3281_s25 = smov (!%p287_p4, %s1939_s25), 63  ;;  %vm1116_vm0 = vcmask 523264   ;;  %vm1770_vm1 = vcmask 519168  }
   0xd   : > { %2622 = vmatpush.bf16.msra.mxu1 %v2514_v0  ;;  %2623 = vmatpush.bf16.msra.mxu2 %v2514_v0  ;;  %v2511_v3 = vld [vmem:[%s3272_s1 + $0x20] sm:$0xff]  ;;  %v2510_v4 = vld [vmem:[%s3272_s1 + $0x18] sm:$0xff]  ;;  %v2509_v5 = vld [vmem:[%s3272_s1 + $0x10] sm:$0xff]  ;;  %s2646_s6 = smul.u32 20, %s3281_s25  ;;  %s1942_s8 = sshll.u32 %s3281_s25, 2 }
   0xe   : > { %2624 = vmatpush.bf16.msra.mxu3 %v2514_v0  ;;  %1165 = vmatpush.bf16.msra.mxu0 %v2514_v0  ;;  %v2508_v6 = vld [vmem:[%s3272_s1 + $0x8] sm:$0xff]  ;;  %v2507_v7 = vld [vmem:[%s3272_s1] sm:$0xff]  ;;  %v2530_v16 = vld [vmem:[%s3272_s1 + $0xb8] sm:$0xff]  ;;  %s3072_s12 = scalar_lea.vmem %s3274_s3, %s1942_s8  ;;  %s3090_s15 = scalar_lea.vmem %s3275_s4, %s1942_s8 }
   0xf   : > { %s2769_s11 = scalar_lea.vmem %s3271_s0, %s2646_s6  ;;  %v2538_v17 = vld [vmem:[%s3272_s1 + $0xf8] sm:$0xff]  ;;  %v2529_v24 = vld [vmem:[%s3272_s1 + $0xb0] sm:$0xff]  ;;  %v2528_v28 = vld [vmem:[%s3272_s1 + $0xa8] sm:$0xff] }
  0x10   : > { %v2027_v8 = vld [vmem:[%s2769_s11 + $0xa0] sm:$0xf]  ;;  %v2449_v9 = vld [vmem:[%s2769_s11 + $0xb0] sm:$0xf0]  ;;  %v2522_v22 = vld [vmem:[%s3272_s1 + $0x78] sm:$0xff] }
  0x11   : > { %2625 = vmatpush.bf16.msra.mxu1 %v2513_v1  ;;  %2626 = vmatpush.bf16.msra.mxu2 %v2513_v1  ;;  %v2107_v10 = vld [vmem:[%s2769_s11 + $0x140] sm:$0xf]  ;;  %v2469_v11 = vld [vmem:[%s2769_s11 + $0x150] sm:$0xf0]  ;;  %v2028_v18 = vor.u32 %v2449_v9, %v2027_v8  ;;  %v2542_v23 = vld [vmem:[%s3272_s1 + $0x118] sm:$0xff] }
  0x12   : > { %2627 = vmatpush.bf16.msra.mxu3 %v2513_v1  ;;  %1166 = vmatpush.bf16.msra.mxu0 %v2513_v1  ;;  %v2187_v12 = vld [vmem:[%s2769_s11 + $0x1e0] sm:$0xf]  ;;  %v2489_v13 = vld [vmem:[%s2769_s11 + $0x1f0] sm:$0xf0]  ;;  %v2108_v19 = vor.u32 %v2469_v11, %v2107_v10  ;;  %v2536_v29 = vld [vmem:[%s3272_s1 + $0xe8] sm:$0xff] }
  0x13   : > { %v1947_v14 = vld [vmem:[%s2769_s11] sm:$0xf]  ;;  %v2429_v15 = vld [vmem:[%s2769_s11 + $0x10] sm:$0xf0]  ;;  %v2188_v20 = vor.u32 %v2489_v13, %v2187_v12  ;;  %v2520_v30 = vld [vmem:[%s3272_s1 + $0x68] sm:$0xff] }
  0x14   : > { %v1948_v21 = vor.u32 %v2429_v15, %v1947_v14  ;;  %v2537_v25 = vld [vmem:[%s3272_s1 + $0xf0] sm:$0xff]  ;;  %v2540_v31 = vld [vmem:[%s3272_s1 + $0x108] sm:$0xff]  ;;  %v2527_v32 = vld [vmem:[%s3272_s1 + $0xa0] sm:$0xff] }
  0x15   : > { %2628 = vmatpush.bf16.msra.mxu1 %v2512_v2  ;;  %2629 = vmatpush.bf16.msra.mxu2 %v2512_v2  ;;  %v2521_v26 = vld [vmem:[%s3272_s1 + $0x70] sm:$0xff]  ;;  %v2535_v33 = vld [vmem:[%s3272_s1 + $0xe0] sm:$0xff]  ;;  %v2047_v34 = vld [vmem:[%s2769_s11 + $0xc8] sm:$0xf] }
  0x16   : > { %2630 = vmatpush.bf16.msra.mxu3 %v2512_v2  ;;  %1167 = vmatpush.bf16.msra.mxu0 %v2512_v2  ;;  %v2541_v27 = vld [vmem:[%s3272_s1 + $0x110] sm:$0xff]  ;;  %v2454_v35 = vld [vmem:[%s2769_s11 + $0xd8] sm:$0xf0]  ;;  %v2127_v36 = vld [vmem:[%s2769_s11 + $0x168] sm:$0xf] }
  0x17   : > { %v2474_v37 = vld [vmem:[%s2769_s11 + $0x178] sm:$0xf0]  ;;  %v2207_v38 = vld [vmem:[%s2769_s11 + $0x208] sm:$0xf]  ;;  %v2519_v42 = vld [vmem:[%s3272_s1 + $0x60] sm:$0xff]  ;;  %v2048_v45 = vor.u32 %v2454_v35, %v2047_v34 }
  0x18   : > { %v2494_v39 = vld [vmem:[%s2769_s11 + $0x218] sm:$0xf0]  ;;  %v1967_v40 = vld [vmem:[%s2769_s11 + $0x28] sm:$0xf]  ;;  %v2128_v46 = vor.u32 %v2474_v37, %v2127_v36  ;;  %v2525_v50 = vld [vmem:[%s3272_s1 + $0x90] sm:$0xff] }
  0x19   : > { %2631 = vmatpush.bf16.msra.mxu1 %v2511_v3  ;;  %2632 = vmatpush.bf16.msra.mxu2 %v2511_v3  ;;  %v2434_v41 = vld [vmem:[%s2769_s11 + $0x38] sm:$0xf0]  ;;  %v2208_v47 = vor.u32 %v2494_v39, %v2207_v38  ;;  %v2533_v51 = vld [vmem:[%s3272_s1 + $0xd0] sm:$0xff]  ;;  %v2539_v53 = vld [vmem:[%s3272_s1 + $0x100] sm:$0xff] }
  0x1a   : > { %2633 = vmatpush.bf16.msra.mxu3 %v2511_v3  ;;  %1168 = vmatpush.bf16.msra.mxu0 %v2511_v3  ;;  %v2526_v43 = vld [vmem:[%s3272_s1 + $0x98] sm:$0xff]  ;;  %v1968_v48 = vor.u32 %v2434_v41, %v1967_v40  ;;  %v2517_v52 = vld [vmem:[%s3272_s1 + $0x50] sm:$0xff]  ;;  %v2524_v54 = vld [vmem:[%s3272_s1 + $0x88] sm:$0xff] }
  0x1b   : > { %v2534_v44 = vld [vmem:[%s3272_s1 + $0xd8] sm:$0xff]  ;;  %v2532_v55 = vld [vmem:[%s3272_s1 + $0xc8] sm:$0xff]  ;;  %v2523_v57 = vld [vmem:[%s3272_s1 + $0x80] sm:$0xff] }
  0x1c   : > { %v2518_v49 = vld [vmem:[%s3272_s1 + $0x58] sm:$0xff]  ;;  %v2516_v56 = vld [vmem:[%s3272_s1 + $0x48] sm:$0xff]  ;;  %v2531_v58 = vld [vmem:[%s3272_s1 + $0xc0] sm:$0xff] }
  0x1d   : > { %2634 = vmatpush.bf16.msra.mxu1 %v2510_v4  ;;  %2635 = vmatpush.bf16.msra.mxu2 %v2510_v4  ;;  %v2067_v59 = vld [vmem:[%s2769_s11 + $0xf0] sm:$0xf]  ;;  %v2459_v60 = vld [vmem:[%s2769_s11 + $0x100] sm:$0xf0]  ;;  %v2087_v8 = vld [vmem:[%s2769_s11 + $0x118] sm:$0xf] }
  0x1e   : > { %2636 = vmatpush.bf16.msra.mxu3 %v2510_v4  ;;  %1169 = vmatpush.bf16.msra.mxu0 %v2510_v4  ;;  %v2147_v61 = vld [vmem:[%s2769_s11 + $0x190] sm:$0xf]  ;;  %v2479_v62 = vld [vmem:[%s2769_s11 + $0x1a0] sm:$0xf0]  ;;  %v2068_v4 = vor.u32 %v2459_v60, %v2067_v59  ;;  %v2464_v9 = vld [vmem:[%s2769_s11 + $0x128] sm:$0xf0] }
  0x1f   : > { %v2227_v63 = vld [vmem:[%s2769_s11 + $0x230] sm:$0xf]  ;;  %v2499_v0 = vld [vmem:[%s2769_s11 + $0x240] sm:$0xf0]  ;;  %v2167_v10 = vld [vmem:[%s2769_s11 + $0x1b8] sm:$0xf] }
  0x20   : > { %v1987_v1 = vld [vmem:[%s2769_s11 + $0x50] sm:$0xf]  ;;  %v2439_v2 = vld [vmem:[%s2769_s11 + $0x60] sm:$0xf0]  ;;  %v2484_v11 = vld [vmem:[%s2769_s11 + $0x1c8] sm:$0xf0] }
  0x21   : > { %2637 = vmatpush.bf16.msra.mxu1 %v2509_v5  ;;  %2638 = vmatpush.bf16.msra.mxu2 %v2509_v5  ;;  %v2515_v3 = vld [vmem:[%s3272_s1 + $0x40] sm:$0xff]  ;;  %v2247_v12 = vld [vmem:[%s2769_s11 + $0x258] sm:$0xf]  ;;  %v2504_v13 = vld [vmem:[%s2769_s11 + $0x268] sm:$0xf0] }
  0x22   : > { %2639 = vmatpush.bf16.msra.mxu3 %v2509_v5  ;;  %1170 = vmatpush.bf16.msra.mxu0 %v2509_v5  ;;  %v2148_v5 = vor.u32 %v2479_v62, %v2147_v61  ;;  %v2007_v14 = vld [vmem:[%s2769_s11 + $0x78] sm:$0xf]  ;;  %v2444_v15 = vld [vmem:[%s2769_s11 + $0x88] sm:$0xf0]  ;;  %v1975_v34 = vld [vmem:[%s2769_s11 + $0x30] sm:$0xf] }
  0x23   : > { %v2435_v35 = vld [vmem:[%s2769_s11 + $0x40] sm:$0xf0]  ;;  %v2433_v36 = vld [vmem:[%s2769_s11 + $0x34] sm:$0xf]  ;;  %v1977_v37 = vld [vmem:[%s2769_s11 + $0x44] sm:$0xf0] }
  0x24   : > { %v1983_v38 = vld [vmem:[%s2769_s11 + $0x38] sm:$0xf]  ;;  %v2436_v39 = vld [vmem:[%s2769_s11 + $0x48] sm:$0xf0]  ;;  %v1976_v41 = vor.u32 %v2435_v35, %v1975_v34  ;;  %v2445_v59 = vld [vmem:[%s2769_s11 + $0x90] sm:$0xf0] }
  0x25   : > { %2640 = vmatpush.bf16.msra.mxu1 %v2508_v6  ;;  %2641 = vmatpush.bf16.msra.mxu2 %v2508_v6  ;;  %v2443_v60 = vld [vmem:[%s2769_s11 + $0x84] sm:$0xf]  ;;  %v2017_v61 = vld [vmem:[%s2769_s11 + $0x94] sm:$0xf0]  ;;  %v2023_v62 = vld [vmem:[%s2769_s11 + $0x88] sm:$0xf] }
  0x26   : > { %2642 = vmatpush.bf16.msra.mxu3 %v2508_v6  ;;  %1171 = vmatpush.bf16.msra.mxu0 %v2508_v6  ;;  %v2228_v6 = vor.u32 %v2499_v0, %v2227_v63  ;;  %v2446_v63 = vld [vmem:[%s2769_s11 + $0x98] sm:$0xf0]  ;;  %v2456_v34 = vld [vmem:[%s2769_s11 + $0xe8] sm:$0xf0] }
  0x29   : > { %2643 = vmatpush.bf16.msra.mxu1 %v2507_v7  ;;  %2644 = vmatpush.bf16.msra.mxu2 %v2507_v7 }
  0x2a   : > { %2645 = vmatpush.bf16.msra.mxu3 %v2507_v7  ;;  %1172 = vmatpush.bf16.msra.mxu0 %v2507_v7  ;;  %v1988_v7 = vor.u32 %v2439_v2, %v1987_v1  ;;  %v2020_v2 = vor.u32 %v2443_v60, %v2017_v61  ;;  %v2461_v60 = vld [vmem:[%s2769_s11 + $0x110] sm:$0xf0] }
  0x2c   : > { %1193 = vmatmul.bf16.vlgmr.msra.gmra.mxu1 %v2028_v18  ;;  %1213 = vmatmul.bf16.vlgmr.msra.gmra.mxu2 %v2108_v19  ;;  %v2248_v18 = vor.u32 %v2504_v13, %v2247_v12  ;;  %v2008_v19 = vor.u32 %v2444_v15, %v2007_v14  ;;  %v2451_v12 = vld [vmem:[%s2769_s11 + $0xc0] sm:$0xf0] }
  0x2d   : > { %1343 = vmatpush.bf16.msrb.mxu2 %v2530_v16  ;;  %1233 = vmatmul.bf16.vlgmr.msra.gmra.mxu3 %v2188_v20  ;;  %v2088_v16 = vor.u32 %v2464_v9, %v2087_v8  ;;  %v2427_v20 = vld [vmem:[%s2769_s11 + $0x4] sm:$0xf]  ;;  %v2450_v8 = vld [vmem:[%s2769_s11 + $0xb8] sm:$0xf0]  ;;  %v2448_v9 = vld [vmem:[%s2769_s11 + $0xac] sm:$0xf] }
  0x2e   : > { %1432 = vmatpush.bf16.msrb.mxu3 %v2538_v17  ;;  %1173 = vmatmul.bf16.vlgmr.msra.gmra.mxu0 %v1948_v21  ;;  %v2168_v17 = vor.u32 %v2484_v11, %v2167_v10  ;;  %v1949_v21 = vld [vmem:[%s2769_s11 + $0x14] sm:$0xf0]  ;;  %v2037_v10 = vld [vmem:[%s2769_s11 + $0xbc] sm:$0xf0]  ;;  %v2043_v11 = vld [vmem:[%s2769_s11 + $0xb0] sm:$0xf] }
  0x2f   : > { %1254 = vmatpush.bf16.msrb.mxu1 %v2522_v22  ;;  %1525 = vmatpush.bf16.msrb.mxu0 %v2542_v23  ;;  %v1955_v22 = vld [vmem:[%s2769_s11 + $0x8] sm:$0xf]  ;;  %v2430_v23 = vld [vmem:[%s2769_s11 + $0x18] sm:$0xf0] }
  0x31   : > { %1344 = vmatpush.bf16.msrb.mxu2 %v2529_v24  ;;  %v2428_v24 = vld [vmem:[%s2769_s11 + $0xc] sm:$0xf] }
  0x32   : > { %1433 = vmatpush.bf16.msrb.mxu3 %v2537_v25  ;;  %v1957_v25 = vld [vmem:[%s2769_s11 + $0x1c] sm:$0xf0] }
  0x33   : > { %1255 = vmatpush.bf16.msrb.mxu1 %v2521_v26  ;;  %1526 = vmatpush.bf16.msrb.mxu0 %v2541_v27  ;;  %v1963_v26 = vld [vmem:[%s2769_s11 + $0x10] sm:$0xf]  ;;  %v2431_v27 = vld [vmem:[%s2769_s11 + $0x20] sm:$0xf0] }
  0x35   : > { %1345 = vmatpush.bf16.msrb.mxu2 %v2528_v28  ;;  %v1952_v28 = vor.u32 %v2427_v20, %v1949_v21 }
  0x36   : > { %1434 = vmatpush.bf16.msrb.mxu3 %v2536_v29  ;;  %v1956_v29 = vor.u32 %v2430_v23, %v1955_v22 }
  0x37   : > { %1256 = vmatpush.bf16.msrb.mxu1 %v2520_v30  ;;  %1527 = vmatpush.bf16.msrb.mxu0 %v2540_v31  ;;  %v1960_v30 = vor.u32 %v2428_v24, %v1957_v25  ;;  %v1964_v31 = vor.u32 %v2431_v27, %v1963_v26  ;;  %v2452_v27 = vld [vmem:[%s2769_s11 + $0xcc] sm:$0xf] }
  0x39   : > { %1346 = vmatpush.bf16.msrb.mxu2 %v2527_v32  ;;  %v2432_v32 = vld [vmem:[%s2769_s11 + $0x2c] sm:$0xf] }
  0x3a   : > { %1435 = vmatpush.bf16.msrb.mxu3 %v2535_v33  ;;  %v1969_v33 = vld [vmem:[%s2769_s11 + $0x3c] sm:$0xf0] }
  0x3b   : > { %1257 = vmatpush.bf16.msrb.mxu1 %v2519_v42  ;;  %1528 = vmatpush.bf16.msrb.mxu0 %v2539_v53  ;;  %v1972_v40 = vor.u32 %v2432_v32, %v1969_v33  ;;  %v1980_v42 = vor.u32 %v2433_v36, %v1977_v37  ;;  %v2057_v32 = vld [vmem:[%s2769_s11 + $0xe4] sm:$0xf0]  ;;  %v2063_v33 = vld [vmem:[%s2769_s11 + $0xd8] sm:$0xf] }
  0x3c   : > { %1198 = vmatmul.bf16.gmra.mxu1 %v2048_v45  ;;  %1218 = vmatmul.bf16.gmra.mxu2 %v2128_v46  ;;  %v1989_v45 = vld [vmem:[%s2769_s11 + $0x64] sm:$0xf0]  ;;  %v1995_v46 = vld [vmem:[%s2769_s11 + $0x58] sm:$0xf] }
  0x3d   : > { %1347 = vmatpush.bf16.msrb.mxu2 %v2526_v43  ;;  %1238 = vmatmul.bf16.gmra.mxu3 %v2208_v47  ;;  %v1984_v43 = vor.u32 %v2436_v39, %v1983_v38  ;;  %v2440_v47 = vld [vmem:[%s2769_s11 + $0x68] sm:$0xf0] }
  0x3e   : > { %1436 = vmatpush.bf16.msrb.mxu3 %v2534_v44  ;;  %1178 = vmatmul.bf16.gmra.mxu0 %v1968_v48  ;;  %v2437_v44 = vld [vmem:[%s2769_s11 + $0x54] sm:$0xf]  ;;  %v2438_v48 = vld [vmem:[%s2769_s11 + $0x5c] sm:$0xf]  ;;  %v1996_v53 = vor.u32 %v2440_v47, %v1995_v46 }
  0x3f   : > { %1258 = vmatpush.bf16.msrb.mxu1 %v2518_v49  ;;  %v1997_v49 = vld [vmem:[%s2769_s11 + $0x6c] sm:$0xf0] }
  0x41   : > { %1348 = vmatpush.bf16.msrb.mxu2 %v2525_v50  ;;  %v2003_v50 = vld [vmem:[%s2769_s11 + $0x60] sm:$0xf] }
  0x42   : > { %1437 = vmatpush.bf16.msrb.mxu3 %v2533_v51  ;;  %v2441_v51 = vld [vmem:[%s2769_s11 + $0x70] sm:$0xf0] }
  0x43   : > { %1259 = vmatpush.bf16.msrb.mxu1 %v2517_v52  ;;  %v1992_v52 = vor.u32 %v2437_v44, %v1989_v45 }
  0x45   : > { %1349 = vmatpush.bf16.msrb.mxu2 %v2524_v54  ;;  %v2000_v54 = vor.u32 %v2438_v48, %v1997_v49 }
  0x46   : > { %1438 = vmatpush.bf16.msrb.mxu3 %v2532_v55  ;;  %v2004_v55 = vor.u32 %v2441_v51, %v2003_v50 }
  0x47   : > { %1260 = vmatpush.bf16.msrb.mxu1 %v2516_v56  ;;  %v2442_v56 = vld [vmem:[%s2769_s11 + $0x7c] sm:$0xf] }
  0x49   : > { %1350 = vmatpush.bf16.msrb.mxu2 %v2523_v57  ;;  %v2009_v57 = vld [vmem:[%s2769_s11 + $0x8c] sm:$0xf0] }
  0x4a   : > { %1439 = vmatpush.bf16.msrb.mxu3 %v2531_v58  ;;  %v2015_v58 = vld [vmem:[%s2769_s11 + $0x80] sm:$0xf]  ;;  %v2012_v0 = vor.u32 %v2442_v56, %v2009_v57  ;;  %v2460_v56 = vld [vmem:[%s2769_s11 + $0x108] sm:$0xf0]  ;;  %v2458_v57 = vld [vmem:[%s2769_s11 + $0xfc] sm:$0xf] }
  0x4b   : > { %1261 = vmatpush.bf16.msrb.mxu1 %v2515_v3  ;;  %v2016_v1 = vor.u32 %v2445_v59, %v2015_v58  ;;  %v2024_v3 = vor.u32 %v2446_v63, %v2023_v62  ;;  %v2077_v58 = vld [vmem:[%s2769_s11 + $0x10c] sm:$0xf0]  ;;  %v2083_v59 = vld [vmem:[%s2769_s11 + $0x100] sm:$0xf] }
  0x4c   : > { %1203 = vmatmul.bf16.gmra.mxu1 %v2068_v4  ;;  %1223 = vmatmul.bf16.gmra.mxu2 %v2148_v5  ;;  %v2929_v4 = vld [vmem:[%s3273_s2] ss:$0 sm:$0xff]  ;;  %v2447_v5 = vld [vmem:[%s2769_s11 + $0xa4] sm:$0xf] }
  0x4d   : > { %1243 = vmatmul.bf16.gmra.mxu3 %v2228_v6  ;;  %v2029_v6 = vld [vmem:[%s2769_s11 + $0xb4] sm:$0xf0] }
  0x4e   : > { %1183 = vmatmul.bf16.gmra.mxu0 %v1988_v7  ;;  %v2035_v7 = vld [vmem:[%s2769_s11 + $0xa8] sm:$0xf]  ;;  %v2032_v13 = vor.u32 %v2447_v5, %v2029_v6  ;;  %v2080_v5 = vor.u32 %v2458_v57, %v2077_v58  ;;  %v2084_v6 = vor.u32 %v2461_v60, %v2083_v59  ;;  %v2109_v57 = vld [vmem:[%s2769_s11 + $0x154] sm:$0xf0]  ;;  %v2470_v59 = vld [vmem:[%s2769_s11 + $0x158] sm:$0xf0] }
  0x4f   : > { %v2036_v14 = vor.u32 %v2450_v8, %v2035_v7  ;;  %v2115_v58 = vld [vmem:[%s2769_s11 + $0x148] sm:$0xf]  ;;  %v2468_v60 = vld [vmem:[%s2769_s11 + $0x14c] sm:$0xf] }
  0x5c   : > { %1208 = vmatmul.bf16.gmra.mxu1 %v2088_v16  ;;  %1228 = vmatmul.bf16.gmra.mxu2 %v2168_v17  ;;  %v2040_v16 = vor.u32 %v2448_v9, %v2037_v10  ;;  %v2044_v17 = vor.u32 %v2451_v12, %v2043_v11 }
  0x5d   : > { %1248 = vmatmul.bf16.gmra.mxu3 %v2248_v18 }
  0x5e   : > { %1188 = vmatmul.bf16.gmra.mxu0 %v2008_v19 }
  0x6c   : > { %1262 = vmatmul.bf16.vlgmr.msrb.gmra.mxu1 %v1952_v28  ;;  %1351 = vmatmul.bf16.vlgmr.msrb.gmra.mxu2 %v1956_v29  ;;  %v2049_v28 = vld [vmem:[%s2769_s11 + $0xdc] sm:$0xf0]  ;;  %v2055_v29 = vld [vmem:[%s2769_s11 + $0xd0] sm:$0xf] }
  0x6d   : > { %1440 = vmatmul.bf16.vlgmr.msrb.gmra.mxu3 %v1960_v30  ;;  %v2455_v30 = vld [vmem:[%s2769_s11 + $0xe0] sm:$0xf0]  ;;  %v2052_v38 = vor.u32 %v2452_v27, %v2049_v28  ;;  %v2097_v27 = vld [vmem:[%s2769_s11 + $0x134] sm:$0xf0]  ;;  %v2103_v28 = vld [vmem:[%s2769_s11 + $0x128] sm:$0xf] }
  0x6e   : > { %2409 = vmatmul.msk.bf16.vlgmr.msrb.gmra.mxu0 %vm1116_vm0, %v1964_v31  ;;  %v2453_v31 = vld [vmem:[%s2769_s11 + $0xd4] sm:$0xf]  ;;  %v2056_v39 = vor.u32 %v2455_v30, %v2055_v29  ;;  %v2466_v29 = vld [vmem:[%s2769_s11 + $0x138] sm:$0xf0] }
  0x7c   : > { %1267 = vmatmul.bf16.gmra.mxu1 %v1972_v40  ;;  %1356 = vmatmul.bf16.gmra.mxu2 %v1976_v41 }
  0x7d   : > { %1445 = vmatmul.bf16.gmra.mxu3 %v1980_v42  ;;  %v2060_v42 = vor.u32 %v2453_v31, %v2057_v32 }
  0x7e   : > { %2410 = vmatmul.msk.bf16.gmra.mxu0 %vm1116_vm0, %v1984_v43  ;;  %v2064_v43 = vor.u32 %v2456_v34, %v2063_v33 }
  0x8c   : > { %1272 = vmatmul.bf16.gmra.mxu1 %v1992_v52  ;;  %1361 = vmatmul.bf16.gmra.mxu2 %v1996_v53  ;;  %v2457_v53 = vld [vmem:[%s2769_s11 + $0xf4] sm:$0xf] }
  0x8d   : > { %1450 = vmatmul.bf16.gmra.mxu3 %v2000_v54  ;;  %v2069_v54 = vld [vmem:[%s2769_s11 + $0x104] sm:$0xf0] }
  0x8e   : > { %2411 = vmatmul.msk.bf16.gmra.mxu0 %vm1116_vm0, %v2004_v55  ;;  %v2075_v55 = vld [vmem:[%s2769_s11 + $0xf8] sm:$0xf] }
  0x9c   : > { %1277 = vmatmul.bf16.gmra.mxu1 %v2012_v0  ;;  %1366 = vmatmul.bf16.gmra.mxu2 %v2016_v1  ;;  %v2072_v0 = vor.u32 %v2457_v53, %v2069_v54  ;;  %v2076_v1 = vor.u32 %v2460_v56, %v2075_v55  ;;  %v2467_v56 = vld [vmem:[%s2769_s11 + $0x144] sm:$0xf] }
  0x9d   : > { %1455 = vmatmul.bf16.gmra.mxu3 %v2020_v2 }
  0x9e   : > { %2412 = vmatmul.msk.bf16.gmra.mxu0 %vm1116_vm0, %v2024_v3 }
  0xa9   : > { %v1194_v15 = vpop.f32.mrf.mxu1 }
  0xaa   : > { %v2940_v18 = vadd.f32 %v2929_v4, %v1194_v15 }
  0xab   : > { %v2942_v19 = vpop.f32.mrf.mxu0 }
  0xac   : > { %1282 = vmatmul.bf16.gmra.mxu1 %v2032_v13  ;;  %1371 = vmatmul.bf16.gmra.mxu2 %v2036_v14 }
  0xad   : > { %1460 = vmatmul.bf16.gmra.mxu3 %v2040_v16  ;;  %v2462_v16 = vld [vmem:[%s2769_s11 + $0x11c] sm:$0xf] }
  0xae   : > { %2413 = vmatmul.msk.bf16.gmra.mxu0 %vm1116_vm0, %v2044_v17  ;;  %v2089_v17 = vld [vmem:[%s2769_s11 + $0x12c] sm:$0xf0] }
  0xaf   : > { %v1214_v20 = vpop.f32.mrf.mxu2  ;;  %v2092_v33 = vor.u32 %v2462_v16, %v2089_v17 }
  0xb0   : > { %v2946_v21 = vadd.f32 %v2929_v4, %v1214_v20  ;;  %v1234_v22 = vpop.f32.mrf.mxu3  ;;  %v2095_v20 = vld [vmem:[%s2769_s11 + $0x120] sm:$0xf] }
  0xb1   : > { %v2949_v23 = vadd.f32 %v2929_v4, %v1234_v22  ;;  %v1196_v24 = vpop.f32.mrf.mxu1  ;;  %v2465_v22 = vld [vmem:[%s2769_s11 + $0x130] sm:$0xf0] }
  0xb2   : > { %v2952_v25 = vadd.f32 %v2929_v4, %v1196_v24  ;;  %v2463_v24 = vld [vmem:[%s2769_s11 + $0x124] sm:$0xf]  ;;  %v2096_v34 = vor.u32 %v2465_v22, %v2095_v20  ;;  %v1175_v22 = vadd.f32 %v2929_v4, %v2942_v19 }
  0xb3   : > { %v2954_v26 = vpop.f32.mrf.mxu0 }
  0xb7   : > { %v1216_v35 = vpop.f32.mrf.mxu2 }
  0xb8   : > { %v2965_v36 = vadd.f32 %v2929_v4, %v1216_v35  ;;  %v1236_v37 = vpop.f32.mrf.mxu3 }
  0xb9   : > { %v2968_v40 = vadd.f32 %v2929_v4, %v1236_v37  ;;  %v1199_v41 = vpop.f32.mrf.mxu1 }
  0xba   : > { %v2971_v44 = vadd.f32 %v2929_v4, %v1199_v41 }
  0xbb   : > { %v2973_v45 = vpop.f32.mrf.mxu0 }
  0xbc   : > { %1287 = vmatmul.bf16.gmra.mxu1 %v2052_v38  ;;  %1376 = vmatmul.bf16.gmra.mxu2 %v2056_v39  ;;  %v2100_v38 = vor.u32 %v2463_v24, %v2097_v27  ;;  %v2104_v39 = vor.u32 %v2466_v29, %v2103_v28  ;;  %v2544_v29 = vld [vmem:[%s3072_s12] sm:$0xff]  }
  0xbd   : > { %1465 = vmatmul.bf16.gmra.mxu3 %v2060_v42 }
  0xbe   : > { %2414 = vmatmul.msk.bf16.gmra.mxu0 %vm1116_vm0, %v2064_v43 }
  0xbf   : > { %v1219_v46 = vpop.f32.mrf.mxu2 }
  0xc0   : > { %v2977_v47 = vadd.f32 %v2929_v4, %v1219_v46  ;;  %v1239_v48 = vpop.f32.mrf.mxu3 }
  0xc1   : > { %v2980_v49 = vadd.f32 %v2929_v4, %v1239_v48  ;;  %v1201_v50 = vpop.f32.mrf.mxu1 }
  0xc2   : > { %v2983_v51 = vadd.f32 %v2929_v4, %v1201_v50 }
  0xc3   : > { %v2985_v52 = vpop.f32.mrf.mxu0 }
  0xc7   : > { %v1221_v61 = vpop.f32.mrf.mxu2 }
  0xc8   : > { %v2996_v62 = vadd.f32 %v2929_v4, %v1221_v61  ;;  %v1241_v63 = vpop.f32.mrf.mxu3  ;;  %v2117_v61 = vld [vmem:[%s2769_s11 + $0x15c] sm:$0xf0] }
  0xc9   : > { %v2999_v2 = vadd.f32 %v2929_v4, %v1241_v63  ;;  %v1204_v3 = vpop.f32.mrf.mxu1  ;;  %v2123_v63 = vld [vmem:[%s2769_s11 + $0x150] sm:$0xf]  ;;  %v2120_v16 = vor.u32 %v2468_v60, %v2117_v61  ;;  %v2143_v60 = vld [vmem:[%s2769_s11 + $0x178] sm:$0xf]  ;;  %v2476_v61 = vld [vmem:[%s2769_s11 + $0x188] sm:$0xf0] }
  0xca   : > { %v3002_v7 = vadd.f32 %v2929_v4, %v1204_v3 }
  0xcb   : > { %v3004_v8 = vpop.f32.mrf.mxu0 }
  0xcc   : > { %1292 = vmatmul.bf16.gmra.mxu1 %v2072_v0  ;;  %1381 = vmatmul.bf16.gmra.mxu2 %v2076_v1  ;;  %v2471_v0 = vld [vmem:[%s2769_s11 + $0x160] sm:$0xf0] }
  0xcd   : > { %1470 = vmatmul.bf16.gmra.mxu3 %v2080_v5  ;;  %v2124_v17 = vor.u32 %v2471_v0, %v2123_v63 }
  0xce   : > { %2415 = vmatmul.msk.bf16.gmra.mxu0 %vm1116_vm0, %v2084_v6  ;;  %v2112_v6 = vor.u32 %v2467_v56, %v2109_v57  ;;  %v2473_v56 = vld [vmem:[%s2769_s11 + $0x174] sm:$0xf]  ;;  %v2137_v57 = vld [vmem:[%s2769_s11 + $0x184] sm:$0xf0] }
  0xcf   : > { %v1224_v9 = vpop.f32.mrf.mxu2 }
  0xd0   : > { %v3008_v10 = vadd.f32 %v2929_v4, %v1224_v9  ;;  %v1244_v11 = vpop.f32.mrf.mxu3  ;;  %v2116_v9 = vor.u32 %v2470_v59, %v2115_v58 }
  0xd1   : > { %v3011_v12 = vadd.f32 %v2929_v4, %v1244_v11  ;;  %v1206_v13 = vpop.f32.mrf.mxu1 }
  0xd2   : > { %v3014_v14 = vadd.f32 %v2929_v4, %v1206_v13 }
  0xd3   : > { %v3016_v15 = vpop.f32.mrf.mxu0 }
  0xd7   : > { %v1226_v30 = vpop.f32.mrf.mxu2 }
  0xd8   : > { %v3027_v31 = vadd.f32 %v2929_v4, %v1226_v30  ;;  %v1246_v32 = vpop.f32.mrf.mxu3 }
  0xd9   : > { %v3030_v35 = vadd.f32 %v2929_v4, %v1246_v32  ;;  %v1209_v37 = vpop.f32.mrf.mxu1 }
  0xda   : > { %v3033_v41 = vadd.f32 %v2929_v4, %v1209_v37 }
  0xdb   : > { %v3035_v42 = vpop.f32.mrf.mxu0 }
  0xdc   : > { %1297 = vmatmul.bf16.gmra.mxu1 %v2092_v33  ;;  %1386 = vmatmul.bf16.gmra.mxu2 %v2096_v34  ;;  %v1177_v34 = vadd.f32 %v2929_v4, %v2954_v26 }
  0xdd   : > { %1475 = vmatmul.bf16.gmra.mxu3 %v2100_v38  ;;  %v2545_v38 = vunpack.c.l.bf16 %v2544_v29 }
  0xde   : > { %2416 = vmatmul.msk.bf16.gmra.mxu0 %vm1116_vm0, %v2104_v39  ;;  %v2472_v39 = vld [vmem:[%s2769_s11 + $0x16c] sm:$0xf] }
  0xdf   : > { %v1229_v43 = vpop.f32.mrf.mxu2 }
  0xe0   : > { %v3039_v46 = vadd.f32 %v2929_v4, %v1229_v43  ;;  %v1249_v48 = vpop.f32.mrf.mxu3  ;;  %v2129_v43 = vld [vmem:[%s2769_s11 + $0x17c] sm:$0xf0] }
  0xe1   : > { %v3042_v50 = vadd.f32 %v2929_v4, %v1249_v48  ;;  %v1211_v53 = vpop.f32.mrf.mxu1  ;;  %v2135_v48 = vld [vmem:[%s2769_s11 + $0x170] sm:$0xf] }
  0xe2   : > { %v3045_v54 = vadd.f32 %v2929_v4, %v1211_v53  ;;  %v2475_v53 = vld [vmem:[%s2769_s11 + $0x180] sm:$0xf0] }
  0xe3   : > { %v3047_v55 = vpop.f32.mrf.mxu0 }
  0xe7   : > { %v1231_v1 = vpop.f32.mrf.mxu2 }
  0xe8   : > { %v3058_v3 = vadd.f32 %v2929_v4, %v1231_v1  ;;  %v1251_v5 = vpop.f32.mrf.mxu3 }
  0xe9   : > { %v3061_v11 = vadd.f32 %v2929_v4, %v1251_v5  ;;  %v1263_v13 = vpop.f32.mrf.mxu1 }
  0xea   : > { %v1264_v24 = vadd.f32 %v1263_v13, %v1175_v22  ;;  %v2140_v13 = vor.u32 %v2473_v56, %v2137_v57 }
  0xeb   : > { %v1530_v20 = vpop.f32.mrf.mxu0 }
  0xec   : > { %1302 = vmatmul.bf16.gmra.mxu1 %v2112_v6  ;;  %1391 = vmatmul.bf16.gmra.mxu2 %v2116_v9  ;;  %v2132_v6 = vor.u32 %v2472_v39, %v2129_v43  ;;  %v2136_v9 = vor.u32 %v2475_v53, %v2135_v48  ;;  %v2477_v48 = vld [vmem:[%s2769_s11 + $0x194] sm:$0xf]  ;;  %v1182_v53 = vadd.f32 %v2929_v4, %v2985_v52 }
  0xed   : > { %1480 = vmatmul.bf16.gmra.mxu3 %v2120_v16  ;;  %v2144_v16 = vor.u32 %v2476_v61, %v2143_v60  ;;  %v2480_v60 = vld [vmem:[%s2769_s11 + $0x1a8] sm:$0xf0]  ;;  %v2478_v61 = vld [vmem:[%s2769_s11 + $0x19c] sm:$0xf] }
  0xee   : > { %2417 = vmatmul.msk.bf16.gmra.mxu0 %vm1116_vm0, %v2124_v17 }
  0xef   : > { %v1352_v19 = vpop.f32.mrf.mxu2 }
  0xf0   : > { %v1353_v27 = vadd.f32 %v1352_v19, %v1264_v24  ;;  %v1441_v28 = vpop.f32.mrf.mxu3  ;;  %v1180_v24 = vadd.f32 %v2929_v4, %v2973_v45 }
  0xf1   : > { %v1265_v30 = vpop.f32.mrf.mxu1 }
  0xf2   : > { %v1442_v32 = vadd.f32 %v1441_v28, %v1353_v27  ;;  %v1266_v59 = vadd.f32 %v1265_v30, %v1177_v34  ;;  %v2546_v27 = vunpack.c.h.bf16 %v2544_v29 }
  0xf3   : > { %v1532_v33 = vpop.f32.mrf.mxu0 }
  0xf4   : > { %v1531_v37 = vadd.f32 %v1530_v20, %v1442_v32 }
  0xf6   : > { %v1610_v58 = vmax.f32 %v1531_v37, 0.0 }
  0xf7   : > { %v1354_v63 = vpop.f32.mrf.mxu2 }
  0xf8   : > { %v1706_v0 = vadd.f32 %v2545_v38, %v1610_v58  ;;  %v1355_v1 = vadd.f32 %v1354_v63, %v1266_v59  ;;  %v1443_v5 = vpop.f32.mrf.mxu3  ;;  %v2149_v58 = vld [vmem:[%s2769_s11 + $0x1a4] sm:$0xf0]  ;;  %v2155_v59 = vld [vmem:[%s2769_s11 + $0x198] sm:$0xf]  ;;  %v2157_v63 = vld [vmem:[%s2769_s11 + $0x1ac] sm:$0xf0] }
  0xf9   : > { %v1268_v26 = vpop.f32.mrf.mxu1  ;;  %v2156_v52 = vor.u32 %v2480_v60, %v2155_v59 }
  0xfa   : > { %v1738_v17 = vpack.c.bf16 %v1706_v0, %v1706_v0  ;;  %v1444_v20 = vadd.f32 %v1443_v5, %v1355_v1  ;;  %v1269_v30 = vadd.f32 %v1268_v26, %v1180_v24  ;;  %v2163_v5 = vld [vmem:[%s2769_s11 + $0x1a0] sm:$0xf]  ;;  %v2160_v24 = vor.u32 %v2478_v61, %v2157_v63  ;;  %v2169_v61 = vld [vmem:[%s2769_s11 + $0x1cc] sm:$0xf0] }
  0xfb   : > { %v1535_v22 = vpop.f32.mrf.mxu0  ;;  %v2175_v63 = vld [vmem:[%s2769_s11 + $0x1c0] sm:$0xf] }
  0xfc   : > { %1771 = vst.msk [vmem:[%s3090_s15] sm:$0xf] %vm1770_vm1, %v1738_v17  ;;  %v1533_v19 = vadd.f32 %v1532_v33, %v1444_v20  ;;  %1307 = vmatmul.bf16.gmra.mxu1 %v2132_v6  ;;  %1396 = vmatmul.bf16.gmra.mxu2 %v2136_v9  ;;  %v2607_v33 = vld [vmem:[%s3072_s12 + $0x8] sm:$0xff]   ;;  %v2481_v6 = vld [vmem:[%s2769_s11 + $0x1b0] sm:$0xf0]  ;;  %v2152_v17 = vor.u32 %v2477_v48, %v2149_v58 }
  0xfd   : > { %1485 = vmatmul.bf16.gmra.mxu3 %v2140_v13  ;;  %v2549_v57 = vunpack.c.l.bf16 %v2607_v33  ;;  %v1187_v58 = vadd.f32 %v2929_v4, %v3016_v15 }
  0xfe   : > { %2418 = vmatmul.msk.bf16.gmra.mxu0 %vm1116_vm0, %v2144_v16  ;;  %v1611_v28 = vmax.f32 %v1533_v19, 0.0 }
  0xff   : > { %v1357_v32 = vpop.f32.mrf.mxu2 }
 0x100   : > { %v1707_v34 = vadd.f32 %v2546_v27, %v1611_v28  ;;  %v1358_v45 = vadd.f32 %v1357_v32, %v1269_v30  ;;  %v1446_v37 = vpop.f32.mrf.mxu3  ;;  %v1185_v30 = vadd.f32 %v2929_v4, %v3004_v8 }
 0x101   : > { %v1270_v29 = vpop.f32.mrf.mxu1 }
 0x102   : > { %v1739_v38 = vpack.c.bf16 %v1707_v34, %v1707_v34  ;;  %v1447_v39 = vadd.f32 %v1446_v37, %v1358_v45  ;;  %v1271_v1 = vadd.f32 %v1270_v29, %v1182_v53  ;;  %v2550_v34 = vunpack.c.h.bf16 %v2607_v33 }
 0x103   : > { %v1537_v43 = vpop.f32.mrf.mxu0 }
 0x104   : > { %1772 = vst.msk [vmem:[%s3090_s15 + $0x4] sm:$0xf] %vm1770_vm1, %v1739_v38  ;;  %v1536_v56 = vadd.f32 %v1535_v22, %v1447_v39  ;;  %v2164_v22 = vor.u32 %v2481_v6, %v2163_v5  ;;  %v2177_v5 = vld [vmem:[%s2769_s11 + $0x1d4] sm:$0xf0] }
 0x106   : > { %v1612_v0 = vmax.f32 %v1536_v56, 0.0 }
 0x107   : > { %v1359_v9 = vpop.f32.mrf.mxu2 }
 0x108   : > { %v1708_v26 = vadd.f32 %v2549_v57, %v1612_v0  ;;  %v1360_v13 = vadd.f32 %v1359_v9, %v1271_v1  ;;  %v1448_v16 = vpop.f32.mrf.mxu3  ;;  %v2482_v57 = vld [vmem:[%s2769_s11 + $0x1bc] sm:$0xf]  ;;  %v2485_v0 = vld [vmem:[%s2769_s11 + $0x1d0] sm:$0xf0]  ;;  %v2483_v1 = vld [vmem:[%s2769_s11 + $0x1c4] sm:$0xf] }
 0x109   : > { %v1273_v20 = vpop.f32.mrf.mxu1  ;;  %v2176_v15 = vor.u32 %v2485_v0, %v2175_v63  ;;  %v2189_v63 = vld [vmem:[%s2769_s11 + $0x1f4] sm:$0xf0]  ;;  %v2195_v0 = vld [vmem:[%s2769_s11 + $0x1e8] sm:$0xf] }
 0x10a   : > { %v1740_v19 = vpack.c.bf16 %v1708_v26, %v1708_v26  ;;  %v1449_v27 = vadd.f32 %v1448_v16, %v1360_v13  ;;  %v1274_v37 = vadd.f32 %v1273_v20, %v1185_v30  ;;  %v2183_v26 = vld [vmem:[%s2769_s11 + $0x1c8] sm:$0xf]  ;;  %v2486_v13 = vld [vmem:[%s2769_s11 + $0x1d8] sm:$0xf0] }
 0x10b   : > { %v1540_v28 = vpop.f32.mrf.mxu0 }
 0x10c   : > { %1773 = vst.msk [vmem:[%s3090_s15 + $0x8] sm:$0xf] %vm1770_vm1, %v1740_v19  ;;  %v1538_v32 = vadd.f32 %v1537_v43, %v1449_v27  ;;  %1312 = vmatmul.bf16.gmra.mxu1 %v2152_v17  ;;  %1401 = vmatmul.bf16.gmra.mxu2 %v2156_v52  ;;  %v2608_v43 = vld [vmem:[%s3072_s12 + $0x10] sm:$0xff]   ;;  %v2180_v19 = vor.u32 %v2483_v1, %v2177_v5  ;;  %v2490_v1 = vld [vmem:[%s2769_s11 + $0x1f8] sm:$0xf0] }
 0x10d   : > { %1490 = vmatmul.bf16.gmra.mxu3 %v2160_v24  ;;  %v2553_v60 = vunpack.c.l.bf16 %v2608_v43  ;;  %v2172_v24 = vor.u32 %v2482_v57, %v2169_v61  ;;  %v2184_v27 = vor.u32 %v2486_v13, %v2183_v26  ;;  %v2488_v5 = vld [vmem:[%s2769_s11 + $0x1ec] sm:$0xf]  ;;  %v2203_v13 = vld [vmem:[%s2769_s11 + $0x1f0] sm:$0xf] }
 0x10e   : > { %2419 = vmatmul.msk.bf16.gmra.mxu0 %vm1116_vm0, %v2164_v22  ;;  %v1613_v45 = vmax.f32 %v1538_v32, 0.0 }
 0x10f   : > { %v1362_v29 = vpop.f32.mrf.mxu2 }
 0x110   : > { %v1709_v38 = vadd.f32 %v2550_v34, %v1613_v45  ;;  %v1363_v8 = vadd.f32 %v1362_v29, %v1274_v37  ;;  %v1451_v39 = vpop.f32.mrf.mxu3  ;;  %v1190_v34 = vadd.f32 %v2929_v4, %v3035_v42  ;;  %v2554_v37 = vunpack.c.h.bf16 %v2608_v43 }
 0x111   : > { %v1275_v33 = vpop.f32.mrf.mxu1 }
 0x112   : > { %v1741_v48 = vpack.c.bf16 %v1709_v38, %v1709_v38  ;;  %v1452_v53 = vadd.f32 %v1451_v39, %v1363_v8  ;;  %v1276_v9 = vadd.f32 %v1275_v33, %v1187_v58  ;;  %v2487_v58 = vld [vmem:[%s2769_s11 + $0x1e4] sm:$0xf] }
 0x113   : > { %v1542_v56 = vpop.f32.mrf.mxu0 }
 0x114   : > { %1774 = vst.msk [vmem:[%s3090_s15 + $0xc] sm:$0xf] %vm1770_vm1, %v1741_v48  ;;  %v1541_v59 = vadd.f32 %v1540_v28, %v1452_v53  ;;  %v2609_v48 = vld [vmem:[%s3072_s12 + $0x18] sm:$0xff]  }
 0x115   : > { %v2557_v61 = vunpack.c.l.bf16 %v2609_v48 }
 0x116   : > { %v1614_v6 = vmax.f32 %v1541_v59, 0.0  ;;  %v1192_v59 = vadd.f32 %v2929_v4, %v3047_v55  ;;  %v2196_v4 = vor.u32 %v2490_v1, %v2195_v0 }
 0x117   : > { %v1364_v16 = vpop.f32.mrf.mxu2 }
 0x118   : > { %v1710_v17 = vadd.f32 %v2553_v60, %v1614_v6  ;;  %v1365_v52 = vadd.f32 %v1364_v16, %v1276_v9  ;;  %v1453_v20 = vpop.f32.mrf.mxu3  ;;  %v2197_v6 = vld [vmem:[%s2769_s11 + $0x1fc] sm:$0xf0]  ;;  %v2491_v16 = vld [vmem:[%s2769_s11 + $0x200] sm:$0xf0] }
 0x119   : > { %v1278_v22 = vpop.f32.mrf.mxu1 }
 0x11a   : > { %v1742_v28 = vpack.c.bf16 %v1710_v17, %v1710_v17  ;;  %v1454_v30 = vadd.f32 %v1453_v20, %v1365_v52  ;;  %v1279_v38 = vadd.f32 %v1278_v22, %v1190_v34  ;;  %v2200_v22 = vor.u32 %v2488_v5, %v2197_v6  ;;  %v2223_v5 = vld [vmem:[%s2769_s11 + $0x218] sm:$0xf]  ;;  %v2496_v6 = vld [vmem:[%s2769_s11 + $0x228] sm:$0xf0] }
 0x11b   : > { %v1545_v32 = vpop.f32.mrf.mxu0  ;;  %v2558_v34 = vunpack.c.h.bf16 %v2609_v48 }
 0x11c   : > { %1775 = vst.msk [vmem:[%s3090_s15 + $0x10] sm:$0xf] %vm1770_vm1, %v1742_v28  ;;  %v1543_v45 = vadd.f32 %v1542_v56, %v1454_v30  ;;  %1317 = vmatmul.bf16.gmra.mxu1 %v2172_v24  ;;  %1406 = vmatmul.bf16.gmra.mxu2 %v2176_v15  ;;  %v2192_v15 = vor.u32 %v2487_v58, %v2189_v63  ;;  %v2217_v63 = vld [vmem:[%s2769_s11 + $0x224] sm:$0xf0] }
 0x11d   : > { %1495 = vmatmul.bf16.gmra.mxu3 %v2180_v19  ;;  %v2204_v19 = vor.u32 %v2491_v16, %v2203_v13 }
 0x11e   : > { %2420 = vmatmul.msk.bf16.gmra.mxu0 %vm1116_vm0, %v2184_v27  ;;  %v1615_v29 = vmax.f32 %v1543_v45, 0.0 }
 0x11f   : > { %v1367_v8 = vpop.f32.mrf.mxu2 }
 0x120   : > { %v1711_v39 = vadd.f32 %v2554_v37, %v1615_v29  ;;  %v1368_v42 = vadd.f32 %v1367_v8, %v1279_v38  ;;  %v1456_v33 = vpop.f32.mrf.mxu3 }
 0x121   : > { %v1280_v43 = vpop.f32.mrf.mxu1 }
 0x122   : > { %v1743_v53 = vpack.c.bf16 %v1711_v39, %v1711_v39  ;;  %v1457_v56 = vadd.f32 %v1456_v33, %v1368_v42  ;;  %v1281_v26 = vadd.f32 %v1280_v43, %v1192_v59  ;;  %v2610_v42 = vld [vmem:[%s3072_s12 + $0x20] sm:$0xff]   ;;  %v2215_v59 = vld [vmem:[%s2769_s11 + $0x210] sm:$0xf] }
 0x123   : > { %v1547_v57 = vpop.f32.mrf.mxu0  ;;  %v2561_v58 = vunpack.c.l.bf16 %v2610_v42 }
 0x124   : > { %1776 = vst.msk [vmem:[%s3090_s15 + $0x14] sm:$0xf] %vm1770_vm1, %v1743_v53  ;;  %v1546_v60 = vadd.f32 %v1545_v32, %v1457_v56  ;;  %v2492_v56 = vld [vmem:[%s2769_s11 + $0x20c] sm:$0xf] }
 0x126   : > { %v1616_v9 = vmax.f32 %v1546_v60, 0.0  ;;  %v2495_v60 = vld [vmem:[%s2769_s11 + $0x220] sm:$0xf0] }
 0x127   : > { %v1369_v17 = vpop.f32.mrf.mxu2 }
 0x128   : > { %v1712_v52 = vadd.f32 %v2557_v61, %v1616_v9  ;;  %v1370_v20 = vadd.f32 %v1369_v17, %v1281_v26  ;;  %v1458_v24 = vpop.f32.mrf.mxu3  ;;  %v2493_v61 = vld [vmem:[%s2769_s11 + $0x214] sm:$0xf] }
 0x129   : > { %v1283_v55 = vpop.f32.mrf.mxu1 }
 0x12a   : > { %v1744_v27 = vpack.c.bf16 %v1712_v52, %v1712_v52  ;;  %v1459_v28 = vadd.f32 %v1458_v24, %v1370_v20  ;;  %v1284_v37 = vadd.f32 %v1283_v55, %v2940_v18  ;;  %v2209_v18 = vld [vmem:[%s2769_s11 + $0x21c] sm:$0xf0]  ;;  %v2216_v52 = vor.u32 %v2495_v60, %v2215_v59  ;;  %v2501_v60 = vld [vmem:[%s2769_s11 + $0x250] sm:$0xf0] }
 0x12b   : > { %v1550_v30 = vpop.f32.mrf.mxu0  ;;  %v2212_v17 = vor.u32 %v2492_v56, %v2209_v18  ;;  %v2220_v24 = vor.u32 %v2493_v61, %v2217_v63  ;;  %v2498_v56 = vld [vmem:[%s2769_s11 + $0x23c] sm:$0xf]  ;;  %v2243_v59 = vld [vmem:[%s2769_s11 + $0x240] sm:$0xf] }
 0x12c   : > { %1777 = vst.msk [vmem:[%s3090_s15 + $0x18] sm:$0xf] %vm1770_vm1, %v1744_v27  ;;  %v1548_v32 = vadd.f32 %v1547_v57, %v1459_v28  ;;  %1322 = vmatmul.bf16.gmra.mxu1 %v2192_v15  ;;  %1411 = vmatmul.bf16.gmra.mxu2 %v2196_v4  ;;  %v2224_v15 = vor.u32 %v2496_v6, %v2223_v5  ;;  %v2562_v27 = vunpack.c.h.bf16 %v2610_v42  ;;  %v2497_v42 = vld [vmem:[%s2769_s11 + $0x234] sm:$0xf] }
 0x12d   : > { %1500 = vmatmul.bf16.gmra.mxu3 %v2200_v22 }
 0x12e   : > { %2421 = vmatmul.msk.bf16.gmra.mxu0 %vm1116_vm0, %v2204_v19  ;;  %v1617_v45 = vmax.f32 %v1548_v32, 0.0 }
 0x12f   : > { %v1372_v29 = vpop.f32.mrf.mxu2 }
 0x130   : > { %v1713_v38 = vadd.f32 %v2558_v34, %v1617_v45  ;;  %v1373_v8 = vadd.f32 %v1372_v29, %v1284_v37  ;;  %v1461_v39 = vpop.f32.mrf.mxu3  ;;  %v2611_v37 = vld [vmem:[%s3072_s12 + $0x28] sm:$0xff]  }
 0x131   : > { %v1285_v33 = vpop.f32.mrf.mxu1 }
 0x132   : > { %v1745_v48 = vpack.c.bf16 %v1713_v38, %v1713_v38  ;;  %v1462_v43 = vadd.f32 %v1461_v39, %v1373_v8  ;;  %v1286_v1 = vadd.f32 %v1285_v33, %v2952_v25 }
 0x133   : > { %v1552_v53 = vpop.f32.mrf.mxu0 }
 0x134   : > { %1778 = vst.msk [vmem:[%s3090_s15 + $0x1c] sm:$0xf] %vm1770_vm1, %v1745_v48  ;;  %v1551_v57 = vadd.f32 %v1550_v30, %v1462_v43  ;;  %v2565_v48 = vunpack.c.l.bf16 %v2611_v37  ;;  %v2235_v43 = vld [vmem:[%s2769_s11 + $0x238] sm:$0xf] }
 0x136   : > { %v1618_v0 = vmax.f32 %v1551_v57, 0.0  ;;  %v2237_v57 = vld [vmem:[%s2769_s11 + $0x24c] sm:$0xf0] }
 0x137   : > { %v1374_v9 = vpop.f32.mrf.mxu2 }
 0x138   : > { %v1714_v26 = vadd.f32 %v2561_v58, %v1618_v0  ;;  %v1375_v13 = vadd.f32 %v1374_v9, %v1286_v1  ;;  %v1463_v16 = vpop.f32.mrf.mxu3 }
 0x139   : > { %v1288_v20 = vpop.f32.mrf.mxu1 }
 0x13a   : > { %v1746_v4 = vpack.c.bf16 %v1714_v26, %v1714_v26  ;;  %v1464_v55 = vadd.f32 %v1463_v16, %v1375_v13  ;;  %v1289_v28 = vadd.f32 %v1288_v20, %v2971_v44  ;;  %v2229_v44 = vld [vmem:[%s2769_s11 + $0x244] sm:$0xf0]  ;;  %v2240_v26 = vor.u32 %v2498_v56, %v2237_v57 }
 0x13b   : > { %v1555_v22 = vpop.f32.mrf.mxu0  ;;  %v2232_v5 = vor.u32 %v2497_v42, %v2229_v44  ;;  %v2244_v13 = vor.u32 %v2501_v60, %v2243_v59  ;;  %v2506_v44 = vld [vmem:[%s2769_s11 + $0x278] sm:$0xf0] }
 0x13c   : > { %1779 = vst.msk [vmem:[%s3090_s15 + $0x20] sm:$0xf] %vm1770_vm1, %v1746_v4  ;;  %v1553_v19 = vadd.f32 %v1552_v53, %v1464_v55  ;;  %1327 = vmatmul.bf16.gmra.mxu1 %v2212_v17  ;;  %1416 = vmatmul.bf16.gmra.mxu2 %v2216_v52  ;;  %v2500_v53 = vld [vmem:[%s2769_s11 + $0x248] sm:$0xf0] }
 0x13d   : > { %1505 = vmatmul.bf16.gmra.mxu3 %v2220_v24  ;;  %v2236_v6 = vor.u32 %v2500_v53, %v2235_v43  ;;  %v2566_v24 = vunpack.c.h.bf16 %v2611_v37 }
 0x13e   : > { %2422 = vmatmul.msk.bf16.gmra.mxu0 %vm1116_vm0, %v2224_v15  ;;  %v1619_v25 = vmax.f32 %v1553_v19, 0.0 }
 0x13f   : > { %v1377_v30 = vpop.f32.mrf.mxu2 }
 0x140   : > { %v1715_v32 = vadd.f32 %v2562_v27, %v1619_v25  ;;  %v1378_v34 = vadd.f32 %v1377_v30, %v1289_v28  ;;  %v1466_v45 = vpop.f32.mrf.mxu3  ;;  %v2612_v27 = vld [vmem:[%s3072_s12 + $0x30] sm:$0xff]  }
 0x141   : > { %v1290_v29 = vpop.f32.mrf.mxu1  ;;  %v2569_v37 = vunpack.c.l.bf16 %v2612_v27 }
 0x142   : > { %v1747_v38 = vpack.c.bf16 %v1715_v32, %v1715_v32  ;;  %v1467_v8 = vadd.f32 %v1466_v45, %v1378_v34  ;;  %v1291_v18 = vadd.f32 %v1290_v29, %v2983_v51  ;;  %v2502_v34 = vld [vmem:[%s2769_s11 + $0x25c] sm:$0xf]  ;;  %v2255_v29 = vld [vmem:[%s2769_s11 + $0x260] sm:$0xf] }
 0x143   : > { %v1557_v39 = vpop.f32.mrf.mxu0 }
 0x144   : > { %1780 = vst.msk [vmem:[%s3090_s15 + $0x24] sm:$0xf] %vm1770_vm1, %v1747_v38  ;;  %v1556_v33 = vadd.f32 %v1555_v22, %v1467_v8  ;;  %v2505_v38 = vld [vmem:[%s2769_s11 + $0x270] sm:$0xf0]  ;;  %v2503_v8 = vld [vmem:[%s2769_s11 + $0x264] sm:$0xf] }
 0x146   : > { %v1620_v58 = vmax.f32 %v1556_v33, 0.0 }
 0x147   : > { %v1379_v61 = vpop.f32.mrf.mxu2 }
 0x148   : > { %v1716_v63 = vadd.f32 %v2565_v48, %v1620_v58  ;;  %v1380_v0 = vadd.f32 %v1379_v61, %v1291_v18  ;;  %v1468_v1 = vpop.f32.mrf.mxu3  ;;  %v2263_v48 = vld [vmem:[%s2769_s11 + $0x268] sm:$0xf]  ;;  %v2256_v18 = vor.u32 %v2505_v38, %v2255_v29 }
 0x149   : > { %v1293_v9 = vpop.f32.mrf.mxu1  ;;  %v2264_v61 = vor.u32 %v2506_v44, %v2263_v48 }
 0x14a   : > { %v1748_v16 = vpack.c.bf16 %v1716_v63, %v1716_v63  ;;  %v1469_v17 = vadd.f32 %v1468_v1, %v1380_v0  ;;  %v1294_v15 = vadd.f32 %v1293_v9, %v3002_v7  ;;  %v2249_v7 = vld [vmem:[%s2769_s11 + $0x26c] sm:$0xf0] }
 0x14b   : > { %v1560_v52 = vpop.f32.mrf.mxu0  ;;  %v2252_v58 = vor.u32 %v2502_v34, %v2249_v7 }
 0x14c   : > { %1781 = vst.msk [vmem:[%s3090_s15 + $0x28] sm:$0xf] %vm1770_vm1, %v1748_v16  ;;  %v1558_v20 = vadd.f32 %v1557_v39, %v1469_v17  ;;  %1332 = vmatmul.bf16.gmra.mxu1 %v2232_v5  ;;  %1421 = vmatmul.bf16.gmra.mxu2 %v2236_v6  ;;  %v2257_v39 = vld [vmem:[%s2769_s11 + $0x274] sm:$0xf0]  ;;  %v2570_v6 = vunpack.c.h.bf16 %v2612_v27 }
 0x14d   : > { %1510 = vmatmul.bf16.gmra.mxu3 %v2240_v26  ;;  %v2260_v60 = vor.u32 %v2503_v8, %v2257_v39 }
 0x14e   : > { %2423 = vmatmul.msk.bf16.gmra.mxu0 %vm1116_vm0, %v2244_v13  ;;  %v1621_v51 = vmax.f32 %v1558_v20, 0.0 }
 0x14f   : > { %v1382_v4 = vpop.f32.mrf.mxu2 }
 0x150   : > { %v1717_v55 = vadd.f32 %v2566_v24, %v1621_v51  ;;  %v1383_v22 = vadd.f32 %v1382_v4, %v1294_v15  ;;  %v1471_v19 = vpop.f32.mrf.mxu3 }
 0x151   : > { %v1295_v25 = vpop.f32.mrf.mxu1 }
 0x152   : > { %v1749_v28 = vpack.c.bf16 %v1717_v55, %v1717_v55  ;;  %v1472_v30 = vadd.f32 %v1471_v19, %v1383_v22  ;;  %v1296_v33 = vadd.f32 %v1295_v25, %v3014_v14 }
 0x153   : > { %v1562_v32 = vpop.f32.mrf.mxu0 }
 0x154   : > { %1782 = vst.msk [vmem:[%s3090_s15 + $0x2c] sm:$0xf] %vm1770_vm1, %v1749_v28  ;;  %v1561_v45 = vadd.f32 %v1560_v52, %v1472_v30  ;;  %v2613_v52 = vld [vmem:[%s3072_s12 + $0x38] sm:$0xff]  }
 0x155   : > { %v2573_v55 = vunpack.c.l.bf16 %v2613_v52  ;;  %v2574_v7 = vunpack.c.h.bf16 %v2613_v52  ;;  %v2615_v52 = vld [vmem:[%s3072_s12 + $0x48] sm:$0xff]  }
 0x156   : > { %v1622_v42 = vmax.f32 %v1561_v45, 0.0 }
 0x157   : > { %v1384_v43 = vpop.f32.mrf.mxu2 }
 0x158   : > { %v1718_v53 = vadd.f32 %v2569_v37, %v1622_v42  ;;  %v1385_v56 = vadd.f32 %v1384_v43, %v1296_v33  ;;  %v1473_v57 = vpop.f32.mrf.mxu3  ;;  %v2614_v33 = vld [vmem:[%s3072_s12 + $0x40] sm:$0xff]  }
 0x159   : > { %v1298_v59 = vpop.f32.mrf.mxu1 }
 0x15a   : > { %v1750_v63 = vpack.c.bf16 %v1718_v53, %v1718_v53  ;;  %v1474_v0 = vadd.f32 %v1473_v57, %v1385_v56  ;;  %v1299_v9 = vadd.f32 %v1298_v59, %v3033_v41  ;;  %v2577_v57 = vunpack.c.l.bf16 %v2614_v33 }
 0x15b   : > { %v1565_v1 = vpop.f32.mrf.mxu0 }
 0x15c   : > { %1783 = vst.msk [vmem:[%s3090_s15 + $0x30] sm:$0xf] %vm1770_vm1, %v1750_v63  ;;  %v1563_v5 = vadd.f32 %v1562_v32, %v1474_v0  ;;  %1337 = vmatmul.bf16.gmra.mxu1 %v2252_v58  ;;  %1426 = vmatmul.bf16.gmra.mxu2 %v2256_v18 }
 0x15d   : > { %1515 = vmatmul.bf16.gmra.mxu3 %v2260_v60 }
 0x15e   : > { %2424 = vmatmul.msk.bf16.gmra.mxu0 %vm1116_vm0, %v2264_v61  ;;  %v1623_v14 = vmax.f32 %v1563_v5, 0.0 }
 0x15f   : > { %v1387_v26 = vpop.f32.mrf.mxu2 }
 0x160   : > { %v1719_v13 = vadd.f32 %v2570_v6, %v1623_v14  ;;  %v1388_v16 = vadd.f32 %v1387_v26, %v1299_v9  ;;  %v1476_v17 = vpop.f32.mrf.mxu3  ;;  %v2578_v14 = vunpack.c.h.bf16 %v2614_v33 }
 0x161   : > { %v1300_v20 = vpop.f32.mrf.mxu1 }
 0x162   : > { %v1751_v24 = vpack.c.bf16 %v1719_v13, %v1719_v13  ;;  %v1477_v51 = vadd.f32 %v1476_v17, %v1388_v16  ;;  %v1301_v19 = vadd.f32 %v1300_v20, %v3045_v54 }
 0x163   : > { %v1567_v15 = vpop.f32.mrf.mxu0 }
 0x164   : > { %1784 = vst.msk [vmem:[%s3090_s15 + $0x34] sm:$0xf] %vm1770_vm1, %v1751_v24  ;;  %v1566_v4 = vadd.f32 %v1565_v1, %v1477_v51 }
 0x166   : > { %v1624_v22 = vmax.f32 %v1566_v4, 0.0 }
 0x167   : > { %v1389_v27 = vpop.f32.mrf.mxu2 }
 0x168   : > { %v1720_v25 = vadd.f32 %v2573_v55, %v1624_v22  ;;  %v1390_v41 = vadd.f32 %v1389_v27, %v1301_v19  ;;  %v1478_v28 = vpop.f32.mrf.mxu3  ;;  %v2581_v55 = vunpack.c.l.bf16 %v2615_v52 }
 0x169   : > { %v1303_v30 = vpop.f32.mrf.mxu1 }
 0x16a   : > { %v1752_v32 = vpack.c.bf16 %v1720_v25, %v1720_v25  ;;  %v1479_v34 = vadd.f32 %v1478_v28, %v1390_v41  ;;  %v1304_v38 = vadd.f32 %v1303_v30, %v2946_v21 }
 0x16b   : > { %v1570_v45 = vpop.f32.mrf.mxu0 }
 0x16c   : > { %1785 = vst.msk [vmem:[%s3090_s15 + $0x38] sm:$0xf] %vm1770_vm1, %v1752_v32  ;;  %v1568_v37 = vadd.f32 %v1567_v15, %v1479_v34 }
 0x16e   : > { %v1625_v29 = vmax.f32 %v1568_v37, 0.0  ;;  %v2582_v37 = vunpack.c.h.bf16 %v2615_v52 }
 0x16f   : > { %v1392_v8 = vpop.f32.mrf.mxu2 }
 0x170   : > { %v1721_v39 = vadd.f32 %v2574_v7, %v1625_v29  ;;  %v1393_v54 = vadd.f32 %v1392_v8, %v1304_v38  ;;  %v1481_v42 = vpop.f32.mrf.mxu3 }
 0x171   : > { %v1305_v48 = vpop.f32.mrf.mxu1 }
 0x172   : > { %v1753_v44 = vpack.c.bf16 %v1721_v39, %v1721_v39  ;;  %v1482_v43 = vadd.f32 %v1481_v42, %v1393_v54  ;;  %v1306_v18 = vadd.f32 %v1305_v48, %v2965_v36  ;;  %v2616_v54 = vld [vmem:[%s3072_s12 + $0x50] sm:$0xff]  }
 0x173   : > { %v1572_v53 = vpop.f32.mrf.mxu0 }
 0x174   : > { %1786 = vst.msk [vmem:[%s3090_s15 + $0x3c] sm:$0xf] %vm1770_vm1, %v1753_v44  ;;  %v1571_v56 = vadd.f32 %v1570_v45, %v1482_v43 }
 0x176   : > { %v1626_v58 = vmax.f32 %v1571_v56, 0.0 }
 0x177   : > { %v1394_v59 = vpop.f32.mrf.mxu2 }
 0x178   : > { %v1722_v60 = vadd.f32 %v2577_v57, %v1626_v58  ;;  %v1395_v21 = vadd.f32 %v1394_v59, %v1306_v18  ;;  %v1483_v61 = vpop.f32.mrf.mxu3 }
 0x179   : > { %v1308_v63 = vpop.f32.mrf.mxu1 }
 0x17a   : > { %v1754_v0 = vpack.c.bf16 %v1722_v60, %v1722_v60  ;;  %v1484_v1 = vadd.f32 %v1483_v61, %v1395_v21  ;;  %v1309_v26 = vadd.f32 %v1308_v63, %v2977_v47 }
 0x17b   : > { %v1575_v5 = vpop.f32.mrf.mxu0 }
 0x17c   : > { %1787 = vst.msk [vmem:[%s3090_s15 + $0x40] sm:$0xf] %vm1770_vm1, %v1754_v0  ;;  %v1573_v6 = vadd.f32 %v1572_v53, %v1484_v1  ;;  %v2585_v53 = vunpack.c.l.bf16 %v2616_v54  ;;  %v2586_v1 = vunpack.c.h.bf16 %v2616_v54 }
 0x17e   : > { %v1627_v9 = vmax.f32 %v1573_v6, 0.0 }
 0x17f   : > { %v1397_v13 = vpop.f32.mrf.mxu2 }
 0x180   : > { %v1723_v16 = vadd.f32 %v2578_v14, %v1627_v9  ;;  %v1398_v36 = vadd.f32 %v1397_v13, %v1309_v26  ;;  %v1486_v17 = vpop.f32.mrf.mxu3  ;;  %v2617_v13 = vld [vmem:[%s3072_s12 + $0x58] sm:$0xff]  }
 0x181   : > { %v1310_v20 = vpop.f32.mrf.mxu1 }
 0x182   : > { %v1755_v24 = vpack.c.bf16 %v1723_v16, %v1723_v16  ;;  %v1487_v51 = vadd.f32 %v1486_v17, %v1398_v36  ;;  %v1311_v19 = vadd.f32 %v1310_v20, %v2996_v62 }
 0x183   : > { %v1577_v15 = vpop.f32.mrf.mxu0 }
 0x184   : > { %1788 = vst.msk [vmem:[%s3090_s15 + $0x44] sm:$0xf] %vm1770_vm1, %v1755_v24  ;;  %v1576_v4 = vadd.f32 %v1575_v5, %v1487_v51  ;;  %v2589_v24 = vunpack.c.l.bf16 %v2617_v13 }
 0x186   : > { %v1628_v22 = vmax.f32 %v1576_v4, 0.0 }
 0x187   : > { %v1399_v27 = vpop.f32.mrf.mxu2 }
 0x188   : > { %v1724_v25 = vadd.f32 %v2581_v55, %v1628_v22  ;;  %v1400_v47 = vadd.f32 %v1399_v27, %v1311_v19  ;;  %v1488_v41 = vpop.f32.mrf.mxu3 }
 0x189   : > { %v1313_v28 = vpop.f32.mrf.mxu1 }
 0x18a   : > { %v1756_v30 = vpack.c.bf16 %v1724_v25, %v1724_v25  ;;  %v1489_v32 = vadd.f32 %v1488_v41, %v1400_v47  ;;  %v1314_v29 = vadd.f32 %v1313_v28, %v3008_v10  ;;  %v2590_v28 = vunpack.c.h.bf16 %v2617_v13 }
 0x18b   : > { %v1580_v34 = vpop.f32.mrf.mxu0 }
 0x18c   : > { %1789 = vst.msk [vmem:[%s3090_s15 + $0x48] sm:$0xf] %vm1770_vm1, %v1756_v30  ;;  %v1578_v45 = vadd.f32 %v1577_v15, %v1489_v32 }
 0x18e   : > { %v1629_v7 = vmax.f32 %v1578_v45, 0.0 }
 0x18f   : > { %v1402_v38 = vpop.f32.mrf.mxu2 }
 0x190   : > { %v1725_v8 = vadd.f32 %v2582_v37, %v1629_v7  ;;  %v1403_v62 = vadd.f32 %v1402_v38, %v1314_v29  ;;  %v1491_v39 = vpop.f32.mrf.mxu3  ;;  %v2618_v7 = vld [vmem:[%s3072_s12 + $0x60] sm:$0xff]  }
 0x191   : > { %v1315_v42 = vpop.f32.mrf.mxu1  ;;  %v2593_v54 = vunpack.c.l.bf16 %v2618_v7 }
 0x192   : > { %v1757_v33 = vpack.c.bf16 %v1725_v8, %v1725_v8  ;;  %v1492_v48 = vadd.f32 %v1491_v39, %v1403_v62  ;;  %v1316_v57 = vadd.f32 %v1315_v42, %v3027_v31 }
 0x193   : > { %v1582_v44 = vpop.f32.mrf.mxu0 }
 0x194   : > { %1790 = vst.msk [vmem:[%s3090_s15 + $0x4c] sm:$0xf] %vm1770_vm1, %v1757_v33  ;;  %v1581_v43 = vadd.f32 %v1580_v34, %v1492_v48 }
 0x196   : > { %v1630_v56 = vmax.f32 %v1581_v43, 0.0 }
 0x197   : > { %v1404_v58 = vpop.f32.mrf.mxu2 }
 0x198   : > { %v1726_v18 = vadd.f32 %v2585_v53, %v1630_v56  ;;  %v1405_v10 = vadd.f32 %v1404_v58, %v1316_v57  ;;  %v1493_v59 = vpop.f32.mrf.mxu3 }
 0x199   : > { %v1318_v60 = vpop.f32.mrf.mxu1 }
 0x19a   : > { %v1758_v21 = vpack.c.bf16 %v1726_v18, %v1726_v18  ;;  %v1494_v61 = vadd.f32 %v1493_v59, %v1405_v10  ;;  %v1319_v6 = vadd.f32 %v1318_v60, %v3039_v46  ;;  %v2594_v10 = vunpack.c.h.bf16 %v2618_v7 }
 0x19b   : > { %v1585_v63 = vpop.f32.mrf.mxu0 }
 0x19c   : > { %1791 = vst.msk [vmem:[%s3090_s15 + $0x50] sm:$0xf] %vm1770_vm1, %v1758_v21  ;;  %v1583_v0 = vadd.f32 %v1582_v44, %v1494_v61 }
 0x19e   : > { %v1631_v5 = vmax.f32 %v1583_v0, 0.0  ;;  %v2619_v0 = vld [vmem:[%s3072_s12 + $0x68] sm:$0xff]  }
 0x19f   : > { %v1407_v14 = vpop.f32.mrf.mxu2 }
 0x1a0   : > { %v1727_v9 = vadd.f32 %v2586_v1, %v1631_v5  ;;  %v1408_v31 = vadd.f32 %v1407_v14, %v1319_v6  ;;  %v1496_v26 = vpop.f32.mrf.mxu3 }
 0x1a1   : > { %v1320_v16 = vpop.f32.mrf.mxu1 }
 0x1a2   : > { %v1759_v36 = vpack.c.bf16 %v1727_v9, %v1727_v9  ;;  %v1497_v17 = vadd.f32 %v1496_v26, %v1408_v31  ;;  %v1321_v15 = vadd.f32 %v1320_v16, %v3058_v3  ;;  %v2597_v31 = vunpack.c.l.bf16 %v2619_v0 }
 0x1a3   : > { %v1587_v52 = vpop.f32.mrf.mxu0 }
 0x1a4   : > { %1792 = vst.msk [vmem:[%s3090_s15 + $0x54] sm:$0xf] %vm1770_vm1, %v1759_v36  ;;  %v1586_v20 = vadd.f32 %v1585_v63, %v1497_v17 }
 0x1a6   : > { %v1632_v51 = vmax.f32 %v1586_v20, 0.0 }
 0x1a7   : > { %v1409_v4 = vpop.f32.mrf.mxu2 }
 0x1a8   : > { %v1728_v55 = vadd.f32 %v2589_v24, %v1632_v51  ;;  %v1410_v46 = vadd.f32 %v1409_v4, %v1321_v15  ;;  %v1498_v22 = vpop.f32.mrf.mxu3  ;;  %v2598_v15 = vunpack.c.h.bf16 %v2619_v0 }
 0x1a9   : > { %v1323_v19 = vpop.f32.mrf.mxu1 }
 0x1aa   : > { %v1760_v27 = vpack.c.bf16 %v1728_v55, %v1728_v55  ;;  %v1499_v25 = vadd.f32 %v1498_v22, %v1410_v46  ;;  %v1324_v32 = vadd.f32 %v1323_v19, %v2949_v23 }
 0x1ab   : > { %v1590_v47 = vpop.f32.mrf.mxu0 }
 0x1ac   : > { %1793 = vst.msk [vmem:[%s3090_s15 + $0x58] sm:$0xf] %vm1770_vm1, %v1760_v27  ;;  %v1588_v41 = vadd.f32 %v1587_v52, %v1499_v25  ;;  %v2620_v25 = vld [vmem:[%s3072_s12 + $0x70] sm:$0xff]  }
 0x1ae   : > { %v1633_v30 = vmax.f32 %v1588_v41, 0.0 }
 0x1af   : > { %v1412_v34 = vpop.f32.mrf.mxu2 }
 0x1b0   : > { %v1729_v45 = vadd.f32 %v2590_v28, %v1633_v30  ;;  %v1413_v3 = vadd.f32 %v1412_v34, %v1324_v32  ;;  %v1501_v37 = vpop.f32.mrf.mxu3  ;;  %v2601_v32 = vunpack.c.l.bf16 %v2620_v25 }
 0x1b1   : > { %v1325_v29 = vpop.f32.mrf.mxu1 }
 0x1b2   : > { %v1761_v38 = vpack.c.bf16 %v1729_v45, %v1729_v45  ;;  %v1502_v8 = vadd.f32 %v1501_v37, %v1413_v3  ;;  %v1326_v33 = vadd.f32 %v1325_v29, %v2968_v40 }
 0x1b3   : > { %v1592_v62 = vpop.f32.mrf.mxu0 }
 0x1b4   : > { %1794 = vst.msk [vmem:[%s3090_s15 + $0x5c] sm:$0xf] %vm1770_vm1, %v1761_v38  ;;  %v1591_v39 = vadd.f32 %v1590_v47, %v1502_v8 }
 0x1b6   : > { %v1634_v42 = vmax.f32 %v1591_v39, 0.0 }
 0x1b7   : > { %v1414_v48 = vpop.f32.mrf.mxu2 }
 0x1b8   : > { %v1730_v44 = vadd.f32 %v2593_v54, %v1634_v42  ;;  %v1415_v23 = vadd.f32 %v1414_v48, %v1326_v33  ;;  %v1503_v43 = vpop.f32.mrf.mxu3  ;;  %v2602_v54 = vunpack.c.h.bf16 %v2620_v25 }
 0x1b9   : > { %v1328_v53 = vpop.f32.mrf.mxu1 }
 0x1ba   : > { %v1762_v56 = vpack.c.bf16 %v1730_v44, %v1730_v44  ;;  %v1504_v57 = vadd.f32 %v1503_v43, %v1415_v23  ;;  %v1329_v60 = vadd.f32 %v1328_v53, %v2980_v49  ;;  %v2621_v53 = vld [vmem:[%s3072_s12 + $0x78] sm:$0xff]  }
 0x1bb   : > { %v1595_v58 = vpop.f32.mrf.mxu0 }
 0x1bc   : > { %1795 = vst.msk [vmem:[%s3090_s15 + $0x60] sm:$0xf] %vm1770_vm1, %v1762_v56  ;;  %v1593_v18 = vadd.f32 %v1592_v62, %v1504_v57 }
 0x1be   : > { %v1635_v59 = vmax.f32 %v1593_v18, 0.0 }
 0x1bf   : > { %v1417_v21 = vpop.f32.mrf.mxu2 }
 0x1c0   : > { %v1731_v61 = vadd.f32 %v2594_v10, %v1635_v59  ;;  %v1418_v40 = vadd.f32 %v1417_v21, %v1329_v60  ;;  %v1506_v63 = vpop.f32.mrf.mxu3  ;;  %v2605_v10 = vunpack.c.l.bf16 %v2621_v53 }
 0x1c1   : > { %v1330_v1 = vpop.f32.mrf.mxu1 }
 0x1c2   : > { %v1763_v5 = vpack.c.bf16 %v1731_v61, %v1731_v61  ;;  %v1507_v6 = vadd.f32 %v1506_v63, %v1418_v40  ;;  %v1331_v13 = vadd.f32 %v1330_v1, %v2999_v2 }
 0x1c3   : > { %v1597_v14 = vpop.f32.mrf.mxu0 }
 0x1c4   : > { %1796 = vst.msk [vmem:[%s3090_s15 + $0x64] sm:$0xf] %vm1770_vm1, %v1763_v5  ;;  %v1596_v9 = vadd.f32 %v1595_v58, %v1507_v6  ;;  %v2606_v6 = vunpack.c.h.bf16 %v2621_v53 }
 0x1c6   : > { %v1636_v26 = vmax.f32 %v1596_v9, 0.0 }
 0x1c7   : > { %v1419_v16 = vpop.f32.mrf.mxu2 }
 0x1c8   : > { %v1732_v36 = vadd.f32 %v2597_v31, %v1636_v26  ;;  %v1420_v49 = vadd.f32 %v1419_v16, %v1331_v13  ;;  %v1508_v17 = vpop.f32.mrf.mxu3 }
 0x1c9   : > { %v1333_v52 = vpop.f32.mrf.mxu1 }
 0x1ca   : > { %v1764_v20 = vpack.c.bf16 %v1732_v36, %v1732_v36  ;;  %v1509_v24 = vadd.f32 %v1508_v17, %v1420_v49  ;;  %v1334_v46 = vadd.f32 %v1333_v52, %v3011_v12 }
 0x1cb   : > { %v1600_v4 = vpop.f32.mrf.mxu0 }
 0x1cc   : > { %1797 = vst.msk [vmem:[%s3090_s15 + $0x68] sm:$0xf] %vm1770_vm1, %v1764_v20  ;;  %v1598_v51 = vadd.f32 %v1597_v14, %v1509_v24 }
 0x1ce   : > { %v1637_v55 = vmax.f32 %v1598_v51, 0.0 }
 0x1cf   : > { %v1422_v22 = vpop.f32.mrf.mxu2 }
 0x1d0   : > { %v1733_v19 = vadd.f32 %v2598_v15, %v1637_v55  ;;  %v1423_v2 = vadd.f32 %v1422_v22, %v1334_v46  ;;  %v1511_v27 = vpop.f32.mrf.mxu3 }
 0x1d1   : > { %v1335_v47 = vpop.f32.mrf.mxu1 }
 0x1d2   : > { %v1765_v41 = vpack.c.bf16 %v1733_v19, %v1733_v19  ;;  %v1512_v28 = vadd.f32 %v1511_v27, %v1423_v2  ;;  %v1336_v45 = vadd.f32 %v1335_v47, %v3030_v35 }
 0x1d3   : > { %v1602_v3 = vpop.f32.mrf.mxu0 }
 0x1d4   : > { %1798 = vst.msk [vmem:[%s3090_s15 + $0x6c] sm:$0xf] %vm1770_vm1, %v1765_v41  ;;  %v1601_v30 = vadd.f32 %v1600_v4, %v1512_v28 }
 0x1d6   : > { %v1638_v34 = vmax.f32 %v1601_v30, 0.0 }
 0x1d7   : > { %v1424_v37 = vpop.f32.mrf.mxu2 }
 0x1d8   : > { %v1734_v7 = vadd.f32 %v2601_v32, %v1638_v34  ;;  %v1425_v12 = vadd.f32 %v1424_v37, %v1336_v45  ;;  %v1513_v29 = vpop.f32.mrf.mxu3 }
 0x1d9   : > { %v1338_v38 = vpop.f32.mrf.mxu1 }
 0x1da   : > { %v1766_v8 = vpack.c.bf16 %v1734_v7, %v1734_v7  ;;  %v1514_v62 = vadd.f32 %v1513_v29, %v1425_v12  ;;  %v1339_v33 = vadd.f32 %v1338_v38, %v3042_v50 }
 0x1db   : > { %v1605_v43 = vpop.f32.mrf.mxu0 }
 0x1dc   : > { %1799 = vst.msk [vmem:[%s3090_s15 + $0x70] sm:$0xf] %vm1770_vm1, %v1766_v8  ;;  %v1603_v39 = vadd.f32 %v1602_v3, %v1514_v62 }
 0x1de   : > { %v1639_v42 = vmax.f32 %v1603_v39, 0.0 }
 0x1df   : > { %v1427_v48 = vpop.f32.mrf.mxu2 }
 0x1e0   : > { %v1735_v44 = vadd.f32 %v2602_v54, %v1639_v42  ;;  %v1428_v35 = vadd.f32 %v1427_v48, %v1339_v33  ;;  %v1516_v23 = vpop.f32.mrf.mxu3 }
 0x1e1   : > { %v1340_v58 = vpop.f32.mrf.mxu1 }
 0x1e2   : > { %v1767_v56 = vpack.c.bf16 %v1735_v44, %v1735_v44  ;;  %v1517_v57 = vadd.f32 %v1516_v23, %v1428_v35  ;;  %v1341_v60 = vadd.f32 %v1340_v58, %v3061_v11 }
 0x1e3   : > { %v1607_v1 = vpop.f32.mrf.mxu0 }
 0x1e4   : > { %1800 = vst.msk [vmem:[%s3090_s15 + $0x74] sm:$0xf] %vm1770_vm1, %v1767_v56  ;;  %v1606_v18 = vadd.f32 %v1605_v43, %v1517_v57 }
 0x1e6   : > { %v1640_v59 = vmax.f32 %v1606_v18, 0.0 }
 0x1e7   : > { %v1429_v21 = vpop.f32.mrf.mxu2 }
 0x1e8   : > { %v1736_v50 = vadd.f32 %v2605_v10, %v1640_v59  ;;  %v1430_v61 = vadd.f32 %v1429_v21, %v1341_v60  ;;  %v1518_v40 = vpop.f32.mrf.mxu3 }
 0x1ea   : > { %v1768_v63 = vpack.c.bf16 %v1736_v50, %v1736_v50  ;;  %v1519_v0 = vadd.f32 %v1518_v40, %v1430_v61 }
 0x1ec   : > { %1801 = vst.msk [vmem:[%s3090_s15 + $0x78] sm:$0xf] %vm1770_vm1, %v1768_v63  ;;  %v1608_v5 = vadd.f32 %v1607_v1, %v1519_v0 }
 0x1ee   : > { %v1641_v14 = vmax.f32 %v1608_v5, 0.0 }
 0x1f0   : > { %v1737_v9 = vadd.f32 %v2606_v6, %v1641_v14 }
 0x1f2   : > { %v1769_v31 = vpack.c.bf16 %v1737_v9, %v1737_v9 }
 0x1f4   : > { %1802 = vst.msk [vmem:[%s3090_s15 + $0x7c] sm:$0xf] %vm1770_vm1, %v1769_v31 }
 0x1f5 PF: > { %s14_s17 = sadd.s32 1, %s2694_s17   ;;  %s3276_s15 = smov %s2690_s16 }
 0x1f6   : > { %p11_p5 = scmp.ge.s32.totalorder %s14_s17, 4   ;;  %s3277_s16 = smov %s3279_s18 }
 0x1f8   :  { %13 = sbr.rel (!%p11_p5) target bundleno = 2 (0x2), region = 75 }

// kernel: model_forward.22
= control target key start
LH: loop header
LB: loop body
LE: loop exit
PB: predicated region body
PF: predicated region fallthrough
CT: control target
= control target key end

     0   :  { %s2735_s1 = inlined_call_operand.vmem [shape: bf16[1024,128], index: 1, kind: input, shape index: {}]   ;;  %s2736_s2 = inlined_call_operand.vmem [shape: f32[1,128], index: 2, kind: input, shape index: {}]   ;;  %s2737_s0 = inlined_call_operand.vmem [shape: bf16[128,1024], index: 0, kind: input, shape index: {}]   ;;  %s2738_s3 = inlined_call_operand.vmem [shape: bf16[128,128], index: 3, kind: output, shape index: {}]  }
   0x1   :  { %v1941_v0 = vld [vmem:[%s2735_s1 + $0x38] sm:$0xff]  ;;  %v1940_v4 = vld [vmem:[%s2735_s1 + $0x30] sm:$0xff]  ;;  %v1939_v8 = vld [vmem:[%s2735_s1 + $0x28] sm:$0xff] }
   0x2   :  { %v1949_v1 = vld [vmem:[%s2735_s1 + $0x78] sm:$0xff]  ;;  %914 = vmatpush.bf16.msra.mxu0 %v1941_v0  ;;  %v1948_v5 = vld [vmem:[%s2735_s1 + $0x70] sm:$0xff]  ;;  %v1947_v9 = vld [vmem:[%s2735_s1 + $0x68] sm:$0xff] }
   0x3   :  { %v1957_v2 = vld [vmem:[%s2735_s1 + $0xb8] sm:$0xff]  ;;  %963 = vmatpush.bf16.msra.mxu1 %v1949_v1  ;;  %v1956_v6 = vld [vmem:[%s2735_s1 + $0xb0] sm:$0xff]  ;;  %v1955_v10 = vld [vmem:[%s2735_s1 + $0xa8] sm:$0xff] }
   0x4   :  { %v1965_v3 = vld [vmem:[%s2735_s1 + $0xf8] sm:$0xff]  ;;  %1012 = vmatpush.bf16.msra.mxu2 %v1957_v2  ;;  %v1964_v7 = vld [vmem:[%s2735_s1 + $0xf0] sm:$0xff]  ;;  %v1963_v11 = vld [vmem:[%s2735_s1 + $0xe8] sm:$0xff] }
   0x5   :  { %1061 = vmatpush.bf16.msra.mxu3 %v1965_v3  ;;  %v1938_v12 = vld [vmem:[%s2735_s1 + $0x20] sm:$0xff]  ;;  %v1937_v16 = vld [vmem:[%s2735_s1 + $0x18] sm:$0xff]  ;;  %v1936_v20 = vld [vmem:[%s2735_s1 + $0x10] sm:$0xff] }
   0x6   :  { %915 = vmatpush.bf16.msra.mxu0 %v1940_v4  ;;  %v1946_v13 = vld [vmem:[%s2735_s1 + $0x60] sm:$0xff]  ;;  %v1945_v17 = vld [vmem:[%s2735_s1 + $0x58] sm:$0xff]  ;;  %v1944_v21 = vld [vmem:[%s2735_s1 + $0x50] sm:$0xff] }
   0x7   :  { %964 = vmatpush.bf16.msra.mxu1 %v1948_v5  ;;  %v1954_v14 = vld [vmem:[%s2735_s1 + $0xa0] sm:$0xff]  ;;  %v1953_v18 = vld [vmem:[%s2735_s1 + $0x98] sm:$0xff]  ;;  %v1952_v22 = vld [vmem:[%s2735_s1 + $0x90] sm:$0xff] }
   0x8   :  { %1013 = vmatpush.bf16.msra.mxu2 %v1956_v6  ;;  %v1962_v15 = vld [vmem:[%s2735_s1 + $0xe0] sm:$0xff]  ;;  %v1961_v19 = vld [vmem:[%s2735_s1 + $0xd8] sm:$0xff]  ;;  %v1960_v23 = vld [vmem:[%s2735_s1 + $0xd0] sm:$0xff] }
   0x9   :  { %1062 = vmatpush.bf16.msra.mxu3 %v1964_v7  ;;  %v1935_v24 = vld [vmem:[%s2735_s1 + $0x8] sm:$0xff]  ;;  %v1934_v28 = vld [vmem:[%s2735_s1] sm:$0xff]  ;;  %v1989_v40 = vld [vmem:[%s2735_s1 + $0x1b8] sm:$0xff] }
   0xa   :  { %916 = vmatpush.bf16.msra.mxu0 %v1939_v8  ;;  %v1943_v25 = vld [vmem:[%s2735_s1 + $0x48] sm:$0xff]  ;;  %v1942_v29 = vld [vmem:[%s2735_s1 + $0x40] sm:$0xff]  ;;  %v1973_v41 = vld [vmem:[%s2735_s1 + $0x138] sm:$0xff] }
   0xb   :  { %965 = vmatpush.bf16.msra.mxu1 %v1947_v9  ;;  %v1951_v26 = vld [vmem:[%s2735_s1 + $0x88] sm:$0xff]  ;;  %v1950_v30 = vld [vmem:[%s2735_s1 + $0x80] sm:$0xff]  ;;  %v1997_v46 = vld [vmem:[%s2735_s1 + $0x1f8] sm:$0xff] }
   0xc   :  { %1014 = vmatpush.bf16.msra.mxu2 %v1955_v10  ;;  %v1959_v27 = vld [vmem:[%s2735_s1 + $0xc8] sm:$0xff]  ;;  %v1958_v31 = vld [vmem:[%s2735_s1 + $0xc0] sm:$0xff]  ;;  %v1981_v47 = vld [vmem:[%s2735_s1 + $0x178] sm:$0xff] }
   0xd   :  { %1063 = vmatpush.bf16.msra.mxu3 %v1963_v11  ;;  %v1360_v32 = vld [vmem:[%s2737_s0] sm:$0xf]  ;;  %v1870_v34 = vld [vmem:[%s2737_s0 + $0x4] sm:$0xf]  ;;  %v1368_v36 = vld [vmem:[%s2737_s0 + $0x8] sm:$0xf] }
   0xe   :  { %917 = vmatpush.bf16.msra.mxu0 %v1938_v12  ;;  %v1874_v33 = vld [vmem:[%s2737_s0 + $0x1c] sm:$0xf0]  ;;  %v1362_v35 = vld [vmem:[%s2737_s0 + $0x20] sm:$0xf0]  ;;  %v1875_v37 = vld [vmem:[%s2737_s0 + $0x24] sm:$0xf0] }
   0xf   :  { %966 = vmatpush.bf16.msra.mxu1 %v1946_v13  ;;  %v1871_v38 = vld [vmem:[%s2737_s0 + $0xc] sm:$0xf]  ;;  %v1361_v42 = vor.u32 %v1874_v33, %v1360_v32  ;;  %v1365_v43 = vor.u32 %v1870_v34, %v1362_v35  ;;  %v1369_v44 = vor.u32 %v1875_v37, %v1368_v36  ;;  %v1988_v48 = vld [vmem:[%s2735_s1 + $0x1b0] sm:$0xff]  ;;  %v1392_v56 = vld [vmem:[%s2737_s0 + $0x40] sm:$0xf] }
  0x10   :  { %1015 = vmatpush.bf16.msra.mxu2 %v1954_v14  ;;  %v1370_v39 = vld [vmem:[%s2737_s0 + $0x28] sm:$0xf0]  ;;  %v1972_v49 = vld [vmem:[%s2735_s1 + $0x130] sm:$0xff]  ;;  %v1882_v57 = vld [vmem:[%s2737_s0 + $0x5c] sm:$0xf0] }
  0x11   :  { %1064 = vmatpush.bf16.msra.mxu3 %v1962_v15  ;;  %v1373_v45 = vor.u32 %v1871_v38, %v1370_v39  ;;  %v1996_v50 = vld [vmem:[%s2735_s1 + $0x1f0] sm:$0xff]  ;;  %v1987_v52 = vld [vmem:[%s2735_s1 + $0x1a8] sm:$0xff]  ;;  %v1878_v58 = vld [vmem:[%s2737_s0 + $0x44] sm:$0xf]  ;;  %v1393_v0 = vor.u32 %v1882_v57, %v1392_v56 }
  0x12   :  { %918 = vmatpush.bf16.msra.mxu0 %v1937_v16  ;;  %v1980_v51 = vld [vmem:[%s2735_s1 + $0x170] sm:$0xff]  ;;  %v1971_v53 = vld [vmem:[%s2735_s1 + $0x128] sm:$0xff]  ;;  %v1394_v59 = vld [vmem:[%s2737_s0 + $0x60] sm:$0xf0] }
  0x13   :  { %967 = vmatpush.bf16.msra.mxu1 %v1945_v17  ;;  %v1995_v54 = vld [vmem:[%s2735_s1 + $0x1e8] sm:$0xff]  ;;  %v1397_v1 = vor.u32 %v1878_v58, %v1394_v59  ;;  %v1986_v4 = vld [vmem:[%s2735_s1 + $0x1a0] sm:$0xff]  ;;  %v1984_v36 = vld [vmem:[%s2735_s1 + $0x190] sm:$0xff] }
  0x14   :  { %1016 = vmatpush.bf16.msra.mxu2 %v1953_v18  ;;  %v1979_v55 = vld [vmem:[%s2735_s1 + $0x168] sm:$0xff]  ;;  %v1970_v5 = vld [vmem:[%s2735_s1 + $0x120] sm:$0xff]  ;;  %v1968_v37 = vld [vmem:[%s2735_s1 + $0x110] sm:$0xff] }
  0x15   :  { %1065 = vmatpush.bf16.msra.mxu3 %v1961_v19  ;;  %v1400_v60 = vld [vmem:[%s2737_s0 + $0x48] sm:$0xf]  ;;  %v1879_v62 = vld [vmem:[%s2737_s0 + $0x4c] sm:$0xf]  ;;  %v1994_v6 = vld [vmem:[%s2735_s1 + $0x1e0] sm:$0xff] }
  0x16   :  { %919 = vmatpush.bf16.msra.mxu0 %v1936_v20  ;;  %v1883_v61 = vld [vmem:[%s2737_s0 + $0x64] sm:$0xf0]  ;;  %v1402_v63 = vld [vmem:[%s2737_s0 + $0x68] sm:$0xf0]  ;;  %v1978_v7 = vld [vmem:[%s2735_s1 + $0x160] sm:$0xff] }
  0x17   :  { %968 = vmatpush.bf16.msra.mxu1 %v1944_v21  ;;  %v1401_v2 = vor.u32 %v1883_v61, %v1400_v60  ;;  %v1405_v3 = vor.u32 %v1879_v62, %v1402_v63  ;;  %v1424_v8 = vld [vmem:[%s2737_s0 + $0x80] sm:$0xf]  ;;  %v1886_v10 = vld [vmem:[%s2737_s0 + $0x84] sm:$0xf]  ;;  %v1432_v12 = vld [vmem:[%s2737_s0 + $0x88] sm:$0xf] }
  0x18   :  { %1017 = vmatpush.bf16.msra.mxu2 %v1952_v22  ;;  %v1890_v9 = vld [vmem:[%s2737_s0 + $0x9c] sm:$0xf0]  ;;  %v1426_v11 = vld [vmem:[%s2737_s0 + $0xa0] sm:$0xf0]  ;;  %v1891_v13 = vld [vmem:[%s2737_s0 + $0xa4] sm:$0xf0] }
  0x19   :  { %1066 = vmatpush.bf16.msra.mxu3 %v1960_v23  ;;  %v1887_v14 = vld [vmem:[%s2737_s0 + $0x8c] sm:$0xf]  ;;  %v1425_v16 = vor.u32 %v1890_v9, %v1424_v8  ;;  %v1429_v17 = vor.u32 %v1886_v10, %v1426_v11  ;;  %v1433_v18 = vor.u32 %v1891_v13, %v1432_v12  ;;  %v1985_v20 = vld [vmem:[%s2735_s1 + $0x198] sm:$0xff]  ;;  %v1992_v38 = vld [vmem:[%s2735_s1 + $0x1d0] sm:$0xff] }
  0x1a   :  { %920 = vmatpush.bf16.msra.mxu0 %v1935_v24  ;;  %v1434_v15 = vld [vmem:[%s2737_s0 + $0xa8] sm:$0xf0]  ;;  %v1969_v21 = vld [vmem:[%s2735_s1 + $0x118] sm:$0xff]  ;;  %v1456_v24 = vld [vmem:[%s2737_s0 + $0xc0] sm:$0xf] }
  0x1b   :  { %969 = vmatpush.bf16.msra.mxu1 %v1943_v25  ;;  %v1437_v19 = vor.u32 %v1887_v14, %v1434_v15  ;;  %v1993_v22 = vld [vmem:[%s2735_s1 + $0x1d8] sm:$0xff]  ;;  %v1898_v25 = vld [vmem:[%s2737_s0 + $0xdc] sm:$0xf0]  ;;  %v1976_v39 = vld [vmem:[%s2735_s1 + $0x150] sm:$0xff] }
  0x1c   :  { %1018 = vmatpush.bf16.msra.mxu2 %v1951_v26  ;;  %v1977_v23 = vld [vmem:[%s2735_s1 + $0x158] sm:$0xff]  ;;  %v1894_v26 = vld [vmem:[%s2737_s0 + $0xc4] sm:$0xf]  ;;  %v1457_v32 = vor.u32 %v1898_v25, %v1456_v24  ;;  %v1520_v56 = vld [vmem:[%s2737_s0 + $0x140] sm:$0xf] }
  0x1d   :  { %1067 = vmatpush.bf16.msra.mxu3 %v1959_v27  ;;  %v1458_v27 = vld [vmem:[%s2737_s0 + $0xe0] sm:$0xf0]  ;;  %v1914_v57 = vld [vmem:[%s2737_s0 + $0x15c] sm:$0xf0]  ;;  %v1528_v60 = vld [vmem:[%s2737_s0 + $0x148] sm:$0xf] }
  0x1e   :  { %921 = vmatpush.bf16.msra.mxu0 %v1934_v28  ;;  %v1464_v28 = vld [vmem:[%s2737_s0 + $0xc8] sm:$0xf]  ;;  %v1461_v33 = vor.u32 %v1894_v26, %v1458_v27  ;;  %v1910_v58 = vld [vmem:[%s2737_s0 + $0x144] sm:$0xf]  ;;  %v1911_v62 = vld [vmem:[%s2737_s0 + $0x14c] sm:$0xf] }
  0x1f   :  { %970 = vmatpush.bf16.msra.mxu1 %v1942_v29  ;;  %v1899_v29 = vld [vmem:[%s2737_s0 + $0xe4] sm:$0xf0]  ;;  %v1522_v59 = vld [vmem:[%s2737_s0 + $0x160] sm:$0xf0]  ;;  %v1530_v63 = vld [vmem:[%s2737_s0 + $0x168] sm:$0xf0] }
  0x20   :  { %1019 = vmatpush.bf16.msra.mxu2 %v1950_v30  ;;  %v1895_v30 = vld [vmem:[%s2737_s0 + $0xcc] sm:$0xf]  ;;  %v1465_v34 = vor.u32 %v1899_v29, %v1464_v28  ;;  %v1915_v61 = vld [vmem:[%s2737_s0 + $0x164] sm:$0xf0]  ;;  %v1552_v8 = vld [vmem:[%s2737_s0 + $0x180] sm:$0xf] }
  0x21   :  { %1068 = vmatpush.bf16.msra.mxu3 %v1958_v31  ;;  %922 = vmatmul.bf16.vlgmr.msra.gmra.mxu0 %v1361_v42  ;;  %v1466_v31 = vld [vmem:[%s2737_s0 + $0xe8] sm:$0xf0]  ;;  %v1902_v42 = vld [vmem:[%s2737_s0 + $0x104] sm:$0xf]  ;;  %v1922_v9 = vld [vmem:[%s2737_s0 + $0x19c] sm:$0xf0] }
  0x22   :  { %1110 = vmatpush.bf16.msrb.mxu0 %v1973_v41  ;;  %971 = vmatmul.bf16.vlgmr.msra.gmra.mxu1 %v1365_v43  ;;  %v1469_v35 = vor.u32 %v1895_v30, %v1466_v31  ;;  %v1906_v41 = vld [vmem:[%s2737_s0 + $0x11c] sm:$0xf0]  ;;  %v1490_v43 = vld [vmem:[%s2737_s0 + $0x120] sm:$0xf0]  ;;  %v1560_v12 = vld [vmem:[%s2737_s0 + $0x188] sm:$0xf] }
  0x23   :  { %1020 = vmatmul.bf16.vlgmr.msra.gmra.mxu2 %v1369_v44  ;;  %1159 = vmatpush.bf16.msrb.mxu1 %v1981_v47  ;;  %v1496_v44 = vld [vmem:[%s2737_s0 + $0x108] sm:$0xf]  ;;  %v1498_v47 = vld [vmem:[%s2737_s0 + $0x128] sm:$0xf0]  ;;  %v1918_v10 = vld [vmem:[%s2737_s0 + $0x184] sm:$0xf] }
  0x24   :  { %1208 = vmatpush.bf16.msrb.mxu2 %v1989_v40  ;;  %1069 = vmatmul.bf16.vlgmr.msra.gmra.mxu3 %v1373_v45  ;;  %v1488_v40 = vld [vmem:[%s2737_s0 + $0x100] sm:$0xf]  ;;  %v1907_v45 = vld [vmem:[%s2737_s0 + $0x124] sm:$0xf0]  ;;  %v1554_v11 = vld [vmem:[%s2737_s0 + $0x1a0] sm:$0xf0] }
  0x25   :  { %1257 = vmatpush.bf16.msrb.mxu3 %v1997_v46  ;;  %v1903_v46 = vld [vmem:[%s2737_s0 + $0x10c] sm:$0xf]  ;;  %v1923_v13 = vld [vmem:[%s2737_s0 + $0x1a4] sm:$0xf0] }
  0x26   :  { %1111 = vmatpush.bf16.msrb.mxu0 %v1972_v49  ;;  %v1493_v49 = vor.u32 %v1902_v42, %v1490_v43  ;;  %v1919_v14 = vld [vmem:[%s2737_s0 + $0x18c] sm:$0xf]  ;;  %v1592_v24 = vld [vmem:[%s2737_s0 + $0x1c8] sm:$0xf] }
  0x27   :  { %1160 = vmatpush.bf16.msrb.mxu1 %v1980_v51  ;;  %v1501_v51 = vor.u32 %v1903_v46, %v1498_v47  ;;  %v1562_v15 = vld [vmem:[%s2737_s0 + $0x1a8] sm:$0xf0]  ;;  %v1931_v25 = vld [vmem:[%s2737_s0 + $0x1e4] sm:$0xf0] }
  0x28   :  { %1209 = vmatpush.bf16.msrb.mxu2 %v1988_v48  ;;  %v1489_v48 = vor.u32 %v1906_v41, %v1488_v40  ;;  %v1927_v26 = vld [vmem:[%s2737_s0 + $0x1cc] sm:$0xf]  ;;  %v1593_v30 = vor.u32 %v1931_v25, %v1592_v24  ;;  %v1386_v40 = vld [vmem:[%s2737_s0 + $0x38] sm:$0xf0]  ;;  %v1442_v24 = vld [vmem:[%s2737_s0 + $0xb0] sm:$0xf0] }
  0x29   :  { %1258 = vmatpush.bf16.msrb.mxu3 %v1996_v50  ;;  %v1497_v50 = vor.u32 %v1907_v45, %v1496_v44  ;;  %v1594_v27 = vld [vmem:[%s2737_s0 + $0x1e8] sm:$0xf0]  ;;  %v1448_v25 = vld [vmem:[%s2737_s0 + $0x98] sm:$0xf] }
  0x2a   :  { %1112 = vmatpush.bf16.msrb.mxu0 %v1971_v53  ;;  %v1967_v53 = vld [vmem:[%s2735_s1 + $0x108] sm:$0xff]  ;;  %v1597_v31 = vor.u32 %v1927_v26, %v1594_v27  ;;  %v1893_v26 = vld [vmem:[%s2737_s0 + $0xb4] sm:$0xf0]  ;;  %v1889_v27 = vld [vmem:[%s2737_s0 + $0x9c] sm:$0xf] }
  0x2b   :  { %1161 = vmatpush.bf16.msrb.mxu1 %v1979_v55  ;;  %v1975_v55 = vld [vmem:[%s2735_s1 + $0x148] sm:$0xff] }
  0x2c   :  { %1210 = vmatpush.bf16.msrb.mxu2 %v1987_v52  ;;  %v1983_v52 = vld [vmem:[%s2735_s1 + $0x188] sm:$0xff] }
  0x2d   :  { %1259 = vmatpush.bf16.msrb.mxu3 %v1995_v54  ;;  %v1991_v54 = vld [vmem:[%s2735_s1 + $0x1c8] sm:$0xff] }
  0x2e   :  { %1113 = vmatpush.bf16.msrb.mxu0 %v1970_v5  ;;  %v1966_v5 = vld [vmem:[%s2735_s1 + $0x100] sm:$0xff] }
  0x2f   :  { %1162 = vmatpush.bf16.msrb.mxu1 %v1978_v7  ;;  %v1974_v7 = vld [vmem:[%s2735_s1 + $0x140] sm:$0xff] }
  0x30   :  { %1211 = vmatpush.bf16.msrb.mxu2 %v1986_v4  ;;  %v1982_v4 = vld [vmem:[%s2735_s1 + $0x180] sm:$0xff] }
  0x31   :  { %927 = vmatmul.bf16.gmra.mxu0 %v1393_v0  ;;  %1260 = vmatpush.bf16.msrb.mxu3 %v1994_v6  ;;  %v1521_v0 = vor.u32 %v1914_v57, %v1520_v56  ;;  %v1990_v6 = vld [vmem:[%s2735_s1 + $0x1c0] sm:$0xff]  ;;  %v1408_v57 = vld [vmem:[%s2737_s0 + $0x50] sm:$0xf] }
  0x32   :  { %976 = vmatmul.bf16.gmra.mxu1 %v1397_v1  ;;  %1114 = vmatpush.bf16.msrb.mxu0 %v1969_v21  ;;  %v1525_v1 = vor.u32 %v1910_v58, %v1522_v59  ;;  %v1930_v21 = vld [vmem:[%s2737_s0 + $0x1dc] sm:$0xf0]  ;;  %v1884_v58 = vld [vmem:[%s2737_s0 + $0x6c] sm:$0xf0]  ;;  %v1880_v59 = vld [vmem:[%s2737_s0 + $0x54] sm:$0xf] }
  0x33   :  { %1025 = vmatmul.bf16.gmra.mxu2 %v1401_v2  ;;  %1163 = vmatpush.bf16.msrb.mxu1 %v1977_v23  ;;  %v1529_v2 = vor.u32 %v1915_v61, %v1528_v60  ;;  %v1586_v23 = vld [vmem:[%s2737_s0 + $0x1e0] sm:$0xf0]  ;;  %v1410_v60 = vld [vmem:[%s2737_s0 + $0x70] sm:$0xf0]  ;;  %v1416_v61 = vld [vmem:[%s2737_s0 + $0x58] sm:$0xf] }
  0x34   :  { %1074 = vmatmul.bf16.gmra.mxu3 %v1405_v3  ;;  %1212 = vmatpush.bf16.msrb.mxu2 %v1985_v20  ;;  %v1533_v3 = vor.u32 %v1911_v62, %v1530_v63  ;;  %v1584_v20 = vld [vmem:[%s2737_s0 + $0x1c0] sm:$0xf]  ;;  %v1885_v62 = vld [vmem:[%s2737_s0 + $0x74] sm:$0xf0]  ;;  %v1881_v63 = vld [vmem:[%s2737_s0 + $0x5c] sm:$0xf] }
  0x35   :  { %1261 = vmatpush.bf16.msrb.mxu3 %v1993_v22  ;;  %v1926_v22 = vld [vmem:[%s2737_s0 + $0x1c4] sm:$0xf]  ;;  %v1585_v28 = vor.u32 %v1930_v21, %v1584_v20  ;;  %v1440_v21 = vld [vmem:[%s2737_s0 + $0x90] sm:$0xf] }
  0x36   :  { %1115 = vmatpush.bf16.msrb.mxu0 %v1968_v37  ;;  %v1589_v29 = vor.u32 %v1926_v22, %v1586_v23  ;;  %v1384_v37 = vld [vmem:[%s2737_s0 + $0x18] sm:$0xf]  ;;  %v1892_v22 = vld [vmem:[%s2737_s0 + $0xac] sm:$0xf0]  ;;  %v1888_v23 = vld [vmem:[%s2737_s0 + $0x94] sm:$0xf] }
  0x37   :  { %1164 = vmatpush.bf16.msrb.mxu1 %v1976_v39  ;;  %v1873_v39 = vld [vmem:[%s2737_s0 + $0x1c] sm:$0xf] }
  0x38   :  { %1213 = vmatpush.bf16.msrb.mxu2 %v1984_v36  ;;  %v1378_v36 = vld [vmem:[%s2737_s0 + $0x30] sm:$0xf0]  ;;  %v1389_v46 = vor.u32 %v1873_v39, %v1386_v40 }
  0x39   :  { %1262 = vmatpush.bf16.msrb.mxu3 %v1992_v38  ;;  %v1877_v38 = vld [vmem:[%s2737_s0 + $0x34] sm:$0xf0] }
  0x3a   :  { %1116 = vmatpush.bf16.msrb.mxu0 %v1967_v53  ;;  %v1385_v45 = vor.u32 %v1877_v38, %v1384_v37  ;;  %v1449_v37 = vor.u32 %v1893_v26, %v1448_v25 }
  0x3b   :  { %1165 = vmatpush.bf16.msrb.mxu1 %v1975_v55 }
  0x3c   :  { %1214 = vmatpush.bf16.msrb.mxu2 %v1983_v52 }
  0x3d   :  { %1263 = vmatpush.bf16.msrb.mxu3 %v1991_v54 }
  0x3e   :  { %1117 = vmatpush.bf16.msrb.mxu0 %v1966_v5 }
  0x3f   :  { %1166 = vmatpush.bf16.msrb.mxu1 %v1974_v7 }
  0x40   :  { %1215 = vmatpush.bf16.msrb.mxu2 %v1982_v4  ;;  %v1413_v4 = vor.u32 %v1880_v59, %v1410_v60 }
  0x41   :  { %932 = vmatmul.bf16.gmra.mxu0 %v1425_v16  ;;  %1264 = vmatpush.bf16.msrb.mxu3 %v1990_v6  ;;  %v1553_v16 = vor.u32 %v1922_v9, %v1552_v8  ;;  %v1417_v8 = vor.u32 %v1885_v62, %v1416_v61 }
  0x42   :  { %981 = vmatmul.bf16.gmra.mxu1 %v1429_v17  ;;  %v1557_v17 = vor.u32 %v1918_v10, %v1554_v11 }
  0x43   :  { %1030 = vmatmul.bf16.gmra.mxu2 %v1433_v18  ;;  %v1561_v18 = vor.u32 %v1923_v13, %v1560_v12 }
  0x44   :  { %1079 = vmatmul.bf16.gmra.mxu3 %v1437_v19  ;;  %v1565_v19 = vor.u32 %v1919_v14, %v1562_v15 }
  0x51   :  { %937 = vmatmul.bf16.gmra.mxu0 %v1457_v32  ;;  %v2453_v32 = vld [vmem:[%s2736_s2] ss:$0 sm:$0xff] }
  0x52   :  { %986 = vmatmul.bf16.gmra.mxu1 %v1461_v33  ;;  %v1376_v33 = vld [vmem:[%s2737_s0 + $0x10] sm:$0xf] }
  0x53   :  { %1035 = vmatmul.bf16.gmra.mxu2 %v1465_v34  ;;  %v1876_v34 = vld [vmem:[%s2737_s0 + $0x2c] sm:$0xf0] }
  0x54   :  { %1084 = vmatmul.bf16.gmra.mxu3 %v1469_v35  ;;  %v1872_v35 = vld [vmem:[%s2737_s0 + $0x14] sm:$0xf]  ;;  %v1377_v41 = vor.u32 %v1876_v34, %v1376_v33  ;;  %v1445_v33 = vor.u32 %v1888_v23, %v1442_v24  ;;  %v1905_v23 = vld [vmem:[%s2737_s0 + $0x11c] sm:$0xf] }
  0x55   :  { %v1381_v42 = vor.u32 %v1872_v35, %v1378_v36  ;;  %v1514_v24 = vld [vmem:[%s2737_s0 + $0x138] sm:$0xf0] }
  0x61   :  { %942 = vmatmul.bf16.gmra.mxu0 %v1489_v48 }
  0x62   :  { %991 = vmatmul.bf16.gmra.mxu1 %v1493_v49 }
  0x63   :  { %1040 = vmatmul.bf16.gmra.mxu2 %v1497_v50 }
  0x64   :  { %1089 = vmatmul.bf16.gmra.mxu3 %v1501_v51 }
  0x71   :  { %947 = vmatmul.bf16.gmra.mxu0 %v1521_v0  ;;  %v1418_v0 = vld [vmem:[%s2737_s0 + $0x78] sm:$0xf0] }
  0x72   :  { %996 = vmatmul.bf16.gmra.mxu1 %v1525_v1  ;;  %v1421_v9 = vor.u32 %v1881_v63, %v1418_v0 }
  0x73   :  { %1045 = vmatmul.bf16.gmra.mxu2 %v1529_v2 }
  0x74   :  { %1094 = vmatmul.bf16.gmra.mxu3 %v1533_v3  ;;  %v1409_v3 = vor.u32 %v1884_v58, %v1408_v57  ;;  %v1897_v57 = vld [vmem:[%s2737_s0 + $0xdc] sm:$0xf] }
  0x75   :  { %v1482_v58 = vld [vmem:[%s2737_s0 + $0xf8] sm:$0xf0] }
  0x81   :  { %952 = vmatmul.bf16.gmra.mxu0 %v1553_v16 }
  0x82   :  { %1001 = vmatmul.bf16.gmra.mxu1 %v1557_v17 }
  0x83   :  { %1050 = vmatmul.bf16.gmra.mxu2 %v1561_v18 }
  0x84   :  { %1099 = vmatmul.bf16.gmra.mxu3 %v1565_v19 }
  0x91   :  { %957 = vmatmul.bf16.gmra.mxu0 %v1585_v28  ;;  %v1450_v28 = vld [vmem:[%s2737_s0 + $0xb8] sm:$0xf0] }
  0x92   :  { %1006 = vmatmul.bf16.gmra.mxu1 %v1589_v29  ;;  %v1453_v38 = vor.u32 %v1889_v27, %v1450_v28 }
  0x93   :  { %1055 = vmatmul.bf16.gmra.mxu2 %v1593_v30 }
  0x94   :  { %1104 = vmatmul.bf16.gmra.mxu3 %v1597_v31  ;;  %v1441_v31 = vor.u32 %v1892_v22, %v1440_v21  ;;  %v1512_v21 = vld [vmem:[%s2737_s0 + $0x118] sm:$0xf] }
  0x95   :  { %v1909_v22 = vld [vmem:[%s2737_s0 + $0x134] sm:$0xf0] }
  0x9e   :  { %v923_v43 = vpop.f32.mrf.mxu0 }
  0x9f   :  { %v972_v44 = vpop.f32.mrf.mxu1  ;;  %v924_v47 = vadd.f32 %v2453_v32, %v923_v43 }
  0xa1   :  { %v973_v48 = vadd.f32 %v972_v44, %v924_v47  ;;  %1118 = vmatmul.bf16.vlgmr.msrb.gmra.mxu0 %v1377_v41 }
  0xa2   :  { %1167 = vmatmul.bf16.vlgmr.msrb.gmra.mxu1 %v1381_v42 }
  0xa3   :  { %1216 = vmatmul.bf16.vlgmr.msrb.gmra.mxu2 %v1385_v45 }
  0xa4   :  { %1265 = vmatmul.bf16.vlgmr.msrb.gmra.mxu3 %v1389_v46 }
  0xa6   :  { %v1021_v49 = vpop.f32.mrf.mxu2  ;;  %v925_v52 = vpop.f32.mrf.mxu0 }
  0xa7   :  { %v1070_v50 = vpop.f32.mrf.mxu3  ;;  %v1022_v51 = vadd.f32 %v1021_v49, %v973_v48  ;;  %v974_v53 = vpop.f32.mrf.mxu1  ;;  %v926_v54 = vadd.f32 %v2453_v32, %v925_v52  ;;  %v1896_v52 = vld [vmem:[%s2737_s0 + $0xd4] sm:$0xf] }
  0xa9   :  { %v2481_v55 = vadd.f32 %v1070_v50, %v1022_v51  ;;  %v975_v56 = vadd.f32 %v974_v53, %v926_v54  ;;  %v1472_v50 = vld [vmem:[%s2737_s0 + $0xd0] sm:$0xf]  ;;  %v1474_v53 = vld [vmem:[%s2737_s0 + $0xf0] sm:$0xf0]  ;;  %v1480_v54 = vld [vmem:[%s2737_s0 + $0xd8] sm:$0xf] }
  0xaa   :  { %v1900_v51 = vld [vmem:[%s2737_s0 + $0xec] sm:$0xf0]  ;;  %v1477_v62 = vor.u32 %v1896_v52, %v1474_v53  ;;  %v1544_v52 = vld [vmem:[%s2737_s0 + $0x158] sm:$0xf] }
  0xab   :  { %v1473_v61 = vor.u32 %v1900_v51, %v1472_v50  ;;  %v1912_v50 = vld [vmem:[%s2737_s0 + $0x154] sm:$0xf]  ;;  %v1917_v53 = vld [vmem:[%s2737_s0 + $0x174] sm:$0xf0] }
  0xac   :  { %v1538_v51 = vld [vmem:[%s2737_s0 + $0x170] sm:$0xf0] }
  0xae   :  { %v1023_v1 = vpop.f32.mrf.mxu2  ;;  %v928_v6 = vpop.f32.mrf.mxu0 }
  0xaf   :  { %v1072_v2 = vpop.f32.mrf.mxu3  ;;  %v1024_v5 = vadd.f32 %v1023_v1, %v975_v56  ;;  %v977_v7 = vpop.f32.mrf.mxu1  ;;  %v929_v10 = vadd.f32 %v2453_v32, %v928_v6  ;;  %v1901_v56 = vld [vmem:[%s2737_s0 + $0xf4] sm:$0xf0] }
  0xb1   :  { %v2508_v11 = vadd.f32 %v1072_v2, %v1024_v5  ;;  %v978_v12 = vadd.f32 %v977_v7, %v929_v10  ;;  %1123 = vmatmul.bf16.gmra.mxu0 %v1409_v3  ;;  %v1481_v2 = vor.u32 %v1901_v56, %v1480_v54  ;;  %v1485_v3 = vor.u32 %v1897_v57, %v1482_v58  ;;  %v1913_v54 = vld [vmem:[%s2737_s0 + $0x15c] sm:$0xf] }
  0xb2   :  { %1172 = vmatmul.bf16.gmra.mxu1 %v1413_v4  ;;  %v1546_v56 = vld [vmem:[%s2737_s0 + $0x178] sm:$0xf0] }
  0xb3   :  { %1221 = vmatmul.bf16.gmra.mxu2 %v1417_v8 }
  0xb4   :  { %1270 = vmatmul.bf16.gmra.mxu3 %v1421_v9 }
  0xb6   :  { %v1026_v13 = vpop.f32.mrf.mxu2  ;;  %v930_v16 = vpop.f32.mrf.mxu0 }
  0xb7   :  { %v1075_v14 = vpop.f32.mrf.mxu3  ;;  %v1027_v15 = vadd.f32 %v1026_v13, %v978_v12  ;;  %v979_v17 = vpop.f32.mrf.mxu1  ;;  %v931_v18 = vadd.f32 %v2453_v32, %v930_v16  ;;  %v1504_v16 = vld [vmem:[%s2737_s0 + $0x110] sm:$0xf] }
  0xb9   :  { %v2511_v19 = vadd.f32 %v1075_v14, %v1027_v15  ;;  %v980_v20 = vadd.f32 %v979_v17, %v931_v18  ;;  %v1908_v17 = vld [vmem:[%s2737_s0 + $0x12c] sm:$0xf0]  ;;  %v1904_v18 = vld [vmem:[%s2737_s0 + $0x114] sm:$0xf] }
  0xba   :  { %v1505_v27 = vor.u32 %v1908_v17, %v1504_v16  ;;  %v1568_v16 = vld [vmem:[%s2737_s0 + $0x190] sm:$0xf] }
  0xbb   :  { %v1924_v17 = vld [vmem:[%s2737_s0 + $0x1ac] sm:$0xf0] }
  0xbe   :  { %v1028_v29 = vpop.f32.mrf.mxu2  ;;  %v933_v35 = vpop.f32.mrf.mxu0 }
  0xbf   :  { %v1077_v30 = vpop.f32.mrf.mxu3  ;;  %v1029_v34 = vadd.f32 %v1028_v29, %v980_v20  ;;  %v982_v36 = vpop.f32.mrf.mxu1  ;;  %v934_v39 = vadd.f32 %v2453_v32, %v933_v35  ;;  %v1506_v20 = vld [vmem:[%s2737_s0 + $0x130] sm:$0xf0] }
  0xc0   :  { %v1509_v28 = vor.u32 %v1904_v18, %v1506_v20  ;;  %v1920_v18 = vld [vmem:[%s2737_s0 + $0x194] sm:$0xf] }
  0xc1   :  { %v2538_v40 = vadd.f32 %v1077_v30, %v1029_v34  ;;  %v983_v41 = vadd.f32 %v982_v36, %v934_v39  ;;  %1128 = vmatmul.bf16.gmra.mxu0 %v1441_v31  ;;  %v1517_v34 = vor.u32 %v1905_v23, %v1514_v24  ;;  %v1570_v20 = vld [vmem:[%s2737_s0 + $0x1b0] sm:$0xf0]  ;;  %v1921_v23 = vld [vmem:[%s2737_s0 + $0x19c] sm:$0xf] }
  0xc2   :  { %1177 = vmatmul.bf16.gmra.mxu1 %v1445_v33  ;;  %v1513_v33 = vor.u32 %v1909_v22, %v1512_v21  ;;  %v1576_v21 = vld [vmem:[%s2737_s0 + $0x198] sm:$0xf]  ;;  %v1578_v24 = vld [vmem:[%s2737_s0 + $0x1b8] sm:$0xf0] }
  0xc3   :  { %1226 = vmatmul.bf16.gmra.mxu2 %v1449_v37  ;;  %v1925_v22 = vld [vmem:[%s2737_s0 + $0x1b4] sm:$0xf0] }
  0xc4   :  { %1275 = vmatmul.bf16.gmra.mxu3 %v1453_v38 }
  0xc6   :  { %v1031_v42 = vpop.f32.mrf.mxu2  ;;  %v935_v45 = vpop.f32.mrf.mxu0 }
  0xc7   :  { %v1080_v43 = vpop.f32.mrf.mxu3  ;;  %v1032_v44 = vadd.f32 %v1031_v42, %v983_v41  ;;  %v984_v46 = vpop.f32.mrf.mxu1  ;;  %v936_v47 = vadd.f32 %v2453_v32, %v935_v45 }
  0xc9   :  { %v2541_v48 = vadd.f32 %v1080_v43, %v1032_v44  ;;  %v985_v49 = vadd.f32 %v984_v46, %v936_v47  ;;  %v1536_v47 = vld [vmem:[%s2737_s0 + $0x150] sm:$0xf] }
  0xce   :  { %v1033_v59 = vpop.f32.mrf.mxu2  ;;  %v938_v0 = vpop.f32.mrf.mxu0 }
  0xcf   :  { %v1082_v60 = vpop.f32.mrf.mxu3  ;;  %v1034_v63 = vadd.f32 %v1033_v59, %v985_v49  ;;  %v987_v1 = vpop.f32.mrf.mxu1  ;;  %v939_v4 = vadd.f32 %v2453_v32, %v938_v0  ;;  %v1916_v49 = vld [vmem:[%s2737_s0 + $0x16c] sm:$0xf0]  ;;  %v1545_v0 = vor.u32 %v1917_v53, %v1544_v52  ;;  %v1928_v52 = vld [vmem:[%s2737_s0 + $0x1d4] sm:$0xf] }
  0xd0   :  { %v1537_v59 = vor.u32 %v1916_v49, %v1536_v47  ;;  %v1602_v53 = vld [vmem:[%s2737_s0 + $0x1f0] sm:$0xf0] }
  0xd1   :  { %v2568_v5 = vadd.f32 %v1082_v60, %v1034_v63  ;;  %v988_v6 = vadd.f32 %v987_v1, %v939_v4  ;;  %1133 = vmatmul.bf16.gmra.mxu0 %v1473_v61  ;;  %v1541_v60 = vor.u32 %v1912_v50, %v1538_v51  ;;  %v1549_v1 = vor.u32 %v1913_v54, %v1546_v56  ;;  %v1600_v50 = vld [vmem:[%s2737_s0 + $0x1d0] sm:$0xf]  ;;  %v1608_v54 = vld [vmem:[%s2737_s0 + $0x1d8] sm:$0xf] }
  0xd2   :  { %1182 = vmatmul.bf16.gmra.mxu1 %v1477_v62  ;;  %v1932_v51 = vld [vmem:[%s2737_s0 + $0x1ec] sm:$0xf0]  ;;  %v1933_v56 = vld [vmem:[%s2737_s0 + $0x1f4] sm:$0xf0] }
  0xd3   :  { %1231 = vmatmul.bf16.gmra.mxu2 %v1481_v2 }
  0xd4   :  { %1280 = vmatmul.bf16.gmra.mxu3 %v1485_v3 }
  0xd6   :  { %v1036_v7 = vpop.f32.mrf.mxu2  ;;  %v940_v10 = vpop.f32.mrf.mxu0 }
  0xd7   :  { %v1085_v8 = vpop.f32.mrf.mxu3  ;;  %v1037_v9 = vadd.f32 %v1036_v7, %v988_v6  ;;  %v989_v12 = vpop.f32.mrf.mxu1  ;;  %v941_v13 = vadd.f32 %v2453_v32, %v940_v10 }
  0xd9   :  { %v2571_v14 = vadd.f32 %v1085_v8, %v1037_v9  ;;  %v990_v15 = vadd.f32 %v989_v12, %v941_v13 }
  0xde   :  { %v1038_v25 = vpop.f32.mrf.mxu2  ;;  %v943_v30 = vpop.f32.mrf.mxu0 }
  0xdf   :  { %v1087_v26 = vpop.f32.mrf.mxu3  ;;  %v1039_v29 = vadd.f32 %v1038_v25, %v990_v15  ;;  %v992_v31 = vpop.f32.mrf.mxu1  ;;  %v944_v35 = vadd.f32 %v2453_v32, %v943_v30 }
  0xe1   :  { %v2598_v36 = vadd.f32 %v1087_v26, %v1039_v29  ;;  %v993_v37 = vadd.f32 %v992_v31, %v944_v35  ;;  %1138 = vmatmul.bf16.gmra.mxu0 %v1505_v27  ;;  %v1569_v27 = vor.u32 %v1924_v17, %v1568_v16 }
  0xe2   :  { %1187 = vmatmul.bf16.gmra.mxu1 %v1509_v28  ;;  %v1573_v28 = vor.u32 %v1920_v18, %v1570_v20 }
  0xe3   :  { %1236 = vmatmul.bf16.gmra.mxu2 %v1513_v33  ;;  %v1577_v33 = vor.u32 %v1925_v22, %v1576_v21 }
  0xe4   :  { %1285 = vmatmul.bf16.gmra.mxu3 %v1517_v34  ;;  %v1581_v34 = vor.u32 %v1921_v23, %v1578_v24 }
  0xe6   :  { %v1041_v38 = vpop.f32.mrf.mxu2  ;;  %v945_v42 = vpop.f32.mrf.mxu0 }
  0xe7   :  { %v1090_v39 = vpop.f32.mrf.mxu3  ;;  %v1042_v41 = vadd.f32 %v1041_v38, %v993_v37  ;;  %v994_v43 = vpop.f32.mrf.mxu1  ;;  %v946_v44 = vadd.f32 %v2453_v32, %v945_v42 }
  0xe9   :  { %v2601_v45 = vadd.f32 %v1090_v39, %v1042_v41  ;;  %v995_v46 = vadd.f32 %v994_v43, %v946_v44 }
  0xee   :  { %v1043_v57 = vpop.f32.mrf.mxu2  ;;  %v948_v62 = vpop.f32.mrf.mxu0 }
  0xef   :  { %v1092_v58 = vpop.f32.mrf.mxu3  ;;  %v1044_v61 = vadd.f32 %v1043_v57, %v995_v46  ;;  %v997_v63 = vpop.f32.mrf.mxu1  ;;  %v949_v2 = vadd.f32 %v2453_v32, %v948_v62  ;;  %v1929_v57 = vld [vmem:[%s2737_s0 + $0x1dc] sm:$0xf]  ;;  %v1605_v62 = vor.u32 %v1928_v52, %v1602_v53 }
  0xf1   :  { %v2628_v3 = vadd.f32 %v1092_v58, %v1044_v61  ;;  %v998_v4 = vadd.f32 %v997_v63, %v949_v2  ;;  %1143 = vmatmul.bf16.gmra.mxu0 %v1537_v59  ;;  %v1610_v58 = vld [vmem:[%s2737_s0 + $0x1f8] sm:$0xf0]  ;;  %v1601_v61 = vor.u32 %v1932_v51, %v1600_v50  ;;  %v1609_v2 = vor.u32 %v1933_v56, %v1608_v54 }
  0xf2   :  { %1192 = vmatmul.bf16.gmra.mxu1 %v1541_v60 }
  0xf3   :  { %1241 = vmatmul.bf16.gmra.mxu2 %v1545_v0 }
  0xf4   :  { %1290 = vmatmul.bf16.gmra.mxu3 %v1549_v1 }
  0xf6   :  { %v1046_v6 = vpop.f32.mrf.mxu2  ;;  %v950_v9 = vpop.f32.mrf.mxu0 }
  0xf7   :  { %v1095_v7 = vpop.f32.mrf.mxu3  ;;  %v1047_v8 = vadd.f32 %v1046_v6, %v998_v4  ;;  %v999_v10 = vpop.f32.mrf.mxu1  ;;  %v951_v12 = vadd.f32 %v2453_v32, %v950_v9  ;;  %v1613_v4 = vor.u32 %v1929_v57, %v1610_v58 }
  0xf9   :  { %v2631_v13 = vadd.f32 %v1095_v7, %v1047_v8  ;;  %v1000_v15 = vadd.f32 %v999_v10, %v951_v12 }
  0xfe   :  { %v1048_v25 = vpop.f32.mrf.mxu2  ;;  %v953_v30 = vpop.f32.mrf.mxu0 }
  0xff   :  { %v1097_v26 = vpop.f32.mrf.mxu3  ;;  %v1049_v29 = vadd.f32 %v1048_v25, %v1000_v15  ;;  %v1002_v31 = vpop.f32.mrf.mxu1  ;;  %v954_v35 = vadd.f32 %v2453_v32, %v953_v30 }
 0x101   :  { %v2658_v37 = vadd.f32 %v1097_v26, %v1049_v29  ;;  %v1003_v38 = vadd.f32 %v1002_v31, %v954_v35  ;;  %1148 = vmatmul.bf16.gmra.mxu0 %v1569_v27 }
 0x102   :  { %1197 = vmatmul.bf16.gmra.mxu1 %v1573_v28 }
 0x103   :  { %1246 = vmatmul.bf16.gmra.mxu2 %v1577_v33 }
 0x104   :  { %1295 = vmatmul.bf16.gmra.mxu3 %v1581_v34 }
 0x106   :  { %v1051_v39 = vpop.f32.mrf.mxu2  ;;  %v955_v43 = vpop.f32.mrf.mxu0 }
 0x107   :  { %v1100_v41 = vpop.f32.mrf.mxu3  ;;  %v1052_v42 = vadd.f32 %v1051_v39, %v1003_v38  ;;  %v1004_v44 = vpop.f32.mrf.mxu1  ;;  %v956_v46 = vadd.f32 %v2453_v32, %v955_v43 }
 0x109   :  { %v2661_v47 = vadd.f32 %v1100_v41, %v1052_v42  ;;  %v1005_v49 = vadd.f32 %v1004_v44, %v956_v46 }
 0x10e   :  { %v1053_v59 = vpop.f32.mrf.mxu2  ;;  %v958_v0 = vpop.f32.mrf.mxu0 }
 0x10f   :  { %v1102_v60 = vpop.f32.mrf.mxu3  ;;  %v1054_v63 = vadd.f32 %v1053_v59, %v1005_v49  ;;  %v1007_v1 = vpop.f32.mrf.mxu1  ;;  %v959_v6 = vadd.f32 %v2453_v32, %v958_v0 }
 0x111   :  { %v2688_v7 = vadd.f32 %v1102_v60, %v1054_v63  ;;  %v1008_v8 = vadd.f32 %v1007_v1, %v959_v6  ;;  %1153 = vmatmul.bf16.gmra.mxu0 %v1601_v61 }
 0x112   :  { %1202 = vmatmul.bf16.gmra.mxu1 %v1605_v62 }
 0x113   :  { %1251 = vmatmul.bf16.gmra.mxu2 %v1609_v2 }
 0x114   :  { %1300 = vmatmul.bf16.gmra.mxu3 %v1613_v4 }
 0x116   :  { %v1056_v9 = vpop.f32.mrf.mxu2  ;;  %v960_v15 = vpop.f32.mrf.mxu0 }
 0x117   :  { %v1105_v10 = vpop.f32.mrf.mxu3  ;;  %v1057_v12 = vadd.f32 %v1056_v9, %v1008_v8  ;;  %v1009_v16 = vpop.f32.mrf.mxu1  ;;  %v961_v17 = vadd.f32 %v2453_v32, %v960_v15 }
 0x119   :  { %v2691_v18 = vadd.f32 %v1105_v10, %v1057_v12  ;;  %v1010_v20 = vadd.f32 %v1009_v16, %v961_v17 }
 0x11e   :  { %v1058_v21 = vpop.f32.mrf.mxu2  ;;  %v1119_v24 = vpop.f32.mrf.mxu0 }
 0x11f   :  { %v1107_v22 = vpop.f32.mrf.mxu3  ;;  %v1059_v23 = vadd.f32 %v1058_v21, %v1010_v20  ;;  %v1168_v25 = vpop.f32.mrf.mxu1  ;;  %v1120_v27 = vadd.f32 %v1119_v24, %v2481_v55 }
 0x121   :  { %v2693_v26 = vadd.f32 %v1107_v22, %v1059_v23  ;;  %v1169_v33 = vadd.f32 %v1168_v25, %v1120_v27 }
 0x126   :  { %v1217_v28 = vpop.f32.mrf.mxu2  ;;  %v1121_v30 = vpop.f32.mrf.mxu0 }
 0x127   :  { %v1266_v29 = vpop.f32.mrf.mxu3  ;;  %v1170_v31 = vpop.f32.mrf.mxu1  ;;  %v1122_v34 = vadd.f32 %v1121_v30, %v2508_v11  ;;  %v1218_v32 = vadd.f32 %v1217_v28, %v1169_v33 }
 0x129   :  { %v1171_v35 = vadd.f32 %v1170_v31, %v1122_v34  ;;  %v1267_v41 = vadd.f32 %v1266_v29, %v1218_v32 }
 0x12b   :  { %v1306_v49 = vmax.f32 %v1267_v41, 0.0 }
 0x12e   :  { %v1219_v38 = vpop.f32.mrf.mxu2  ;;  %v1124_v43 = vpop.f32.mrf.mxu0 }
 0x12f   :  { %v1268_v39 = vpop.f32.mrf.mxu3  ;;  %v1220_v42 = vadd.f32 %v1219_v38, %v1171_v35  ;;  %v1173_v44 = vpop.f32.mrf.mxu1  ;;  %v1125_v55 = vadd.f32 %v1124_v43, %v2511_v19 }
 0x131   :  { %v1269_v46 = vadd.f32 %v1268_v39, %v1220_v42  ;;  %v1174_v56 = vadd.f32 %v1173_v44, %v1125_v55 }
 0x133   :  { %v1307_v50 = vmax.f32 %v1269_v46, 0.0 }
 0x135   :  { %v2001_v51 = vpack.c.bf16 %v1307_v50, %v1306_v49 }
 0x136   :  { %v1222_v52 = vpop.f32.mrf.mxu2  ;;  %v1126_v11 = vpop.f32.mrf.mxu0 }
 0x137   :  { %v1271_v53 = vpop.f32.mrf.mxu3  ;;  %2002 = vst [vmem:[%s2738_s3] sm:$0xff] %v2001_v51   ;;  %v1175_v54 = vpop.f32.mrf.mxu1  ;;  %v1127_v57 = vadd.f32 %v1126_v11, %v2538_v40  ;;  %v1223_v58 = vadd.f32 %v1222_v52, %v1174_v56 }
 0x139   :  { %v1176_v59 = vadd.f32 %v1175_v54, %v1127_v57  ;;  %v1272_v62 = vadd.f32 %v1271_v53, %v1223_v58 }
 0x13b   :  { %v1308_v2 = vmax.f32 %v1272_v62, 0.0 }
 0x13e   :  { %v1224_v60 = vpop.f32.mrf.mxu2  ;;  %v1129_v0 = vpop.f32.mrf.mxu0 }
 0x13f   :  { %v1273_v61 = vpop.f32.mrf.mxu3  ;;  %v1225_v63 = vadd.f32 %v1224_v60, %v1176_v59  ;;  %v1178_v1 = vpop.f32.mrf.mxu1  ;;  %v1130_v8 = vadd.f32 %v1129_v0, %v2541_v48 }
 0x141   :  { %v1274_v19 = vadd.f32 %v1273_v61, %v1225_v63  ;;  %v1179_v15 = vadd.f32 %v1178_v1, %v1130_v8 }
 0x143   :  { %v1309_v4 = vmax.f32 %v1274_v19, 0.0 }
 0x145   :  { %v2006_v6 = vpack.c.bf16 %v1309_v4, %v1308_v2 }
 0x146   :  { %v1227_v9 = vpop.f32.mrf.mxu2  ;;  %v1131_v40 = vpop.f32.mrf.mxu0 }
 0x147   :  { %v1276_v10 = vpop.f32.mrf.mxu3  ;;  %2038 = vst [vmem:[%s2738_s3 + $0x8] sm:$0xff] %v2006_v6   ;;  %v1180_v12 = vpop.f32.mrf.mxu1  ;;  %v1132_v16 = vadd.f32 %v1131_v40, %v2568_v5  ;;  %v1228_v17 = vadd.f32 %v1227_v9, %v1179_v15 }
 0x149   :  { %v1181_v20 = vadd.f32 %v1180_v12, %v1132_v16  ;;  %v1277_v23 = vadd.f32 %v1276_v10, %v1228_v17 }
 0x14b   :  { %v1310_v28 = vmax.f32 %v1277_v23, 0.0 }
 0x14e   :  { %v1229_v21 = vpop.f32.mrf.mxu2  ;;  %v1134_v25 = vpop.f32.mrf.mxu0 }
 0x14f   :  { %v1278_v22 = vpop.f32.mrf.mxu3  ;;  %v1230_v24 = vadd.f32 %v1229_v21, %v1181_v20  ;;  %v1183_v27 = vpop.f32.mrf.mxu1  ;;  %v1135_v31 = vadd.f32 %v1134_v25, %v2571_v14 }
 0x151   :  { %v1279_v48 = vadd.f32 %v1278_v22, %v1230_v24  ;;  %v1184_v35 = vadd.f32 %v1183_v27, %v1135_v31 }
 0x153   :  { %v1311_v29 = vmax.f32 %v1279_v48, 0.0 }
 0x155   :  { %v2011_v30 = vpack.c.bf16 %v1311_v29, %v1310_v28 }
 0x156   :  { %v1232_v33 = vpop.f32.mrf.mxu2  ;;  %v1136_v5 = vpop.f32.mrf.mxu0 }
 0x157   :  { %v1281_v34 = vpop.f32.mrf.mxu3  ;;  %2039 = vst [vmem:[%s2738_s3 + $0x10] sm:$0xff] %v2011_v30   ;;  %v1185_v32 = vpop.f32.mrf.mxu1  ;;  %v1137_v38 = vadd.f32 %v1136_v5, %v2598_v36  ;;  %v1233_v39 = vadd.f32 %v1232_v33, %v1184_v35 }
 0x159   :  { %v1186_v41 = vadd.f32 %v1185_v32, %v1137_v38  ;;  %v1282_v44 = vadd.f32 %v1281_v34, %v1233_v39 }
 0x15b   :  { %v1312_v51 = vmax.f32 %v1282_v44, 0.0 }
 0x15e   :  { %v1234_v42 = vpop.f32.mrf.mxu2  ;;  %v1139_v49 = vpop.f32.mrf.mxu0 }
 0x15f   :  { %v1283_v43 = vpop.f32.mrf.mxu3  ;;  %v1235_v46 = vadd.f32 %v1234_v42, %v1186_v41  ;;  %v1188_v50 = vpop.f32.mrf.mxu1  ;;  %v1140_v53 = vadd.f32 %v1139_v49, %v2601_v45 }
 0x161   :  { %v1284_v14 = vadd.f32 %v1283_v43, %v1235_v46  ;;  %v1189_v57 = vadd.f32 %v1188_v50, %v1140_v53 }
 0x163   :  { %v1313_v55 = vmax.f32 %v1284_v14, 0.0 }
 0x165   :  { %v2016_v52 = vpack.c.bf16 %v1313_v55, %v1312_v51 }
 0x166   :  { %v1237_v11 = vpop.f32.mrf.mxu2  ;;  %v1141_v36 = vpop.f32.mrf.mxu0 }
 0x167   :  { %v1286_v54 = vpop.f32.mrf.mxu3  ;;  %2040 = vst [vmem:[%s2738_s3 + $0x18] sm:$0xff] %v2016_v52   ;;  %v1190_v56 = vpop.f32.mrf.mxu1  ;;  %v1142_v58 = vadd.f32 %v1141_v36, %v2628_v3  ;;  %v1238_v59 = vadd.f32 %v1237_v11, %v1189_v57 }
 0x169   :  { %v1191_v60 = vadd.f32 %v1190_v56, %v1142_v58  ;;  %v1287_v63 = vadd.f32 %v1286_v54, %v1238_v59 }
 0x16b   :  { %v1314_v2 = vmax.f32 %v1287_v63, 0.0 }
 0x16e   :  { %v1239_v61 = vpop.f32.mrf.mxu2  ;;  %v1144_v1 = vpop.f32.mrf.mxu0 }
 0x16f   :  { %v1288_v62 = vpop.f32.mrf.mxu3  ;;  %v1240_v0 = vadd.f32 %v1239_v61, %v1191_v60  ;;  %v1193_v19 = vpop.f32.mrf.mxu1  ;;  %v1145_v8 = vadd.f32 %v1144_v1, %v2631_v13 }
 0x171   :  { %v1289_v45 = vadd.f32 %v1288_v62, %v1240_v0  ;;  %v1194_v12 = vadd.f32 %v1193_v19, %v1145_v8 }
 0x173   :  { %v1315_v4 = vmax.f32 %v1289_v45, 0.0 }
 0x175   :  { %v2021_v6 = vpack.c.bf16 %v1315_v4, %v1314_v2 }
 0x176   :  { %v1242_v9 = vpop.f32.mrf.mxu2  ;;  %v1146_v3 = vpop.f32.mrf.mxu0 }
 0x177   :  { %v1291_v10 = vpop.f32.mrf.mxu3  ;;  %2041 = vst [vmem:[%s2738_s3 + $0x20] sm:$0xff] %v2021_v6   ;;  %v1195_v40 = vpop.f32.mrf.mxu1  ;;  %v1147_v15 = vadd.f32 %v1146_v3, %v2658_v37  ;;  %v1243_v16 = vadd.f32 %v1242_v9, %v1194_v12 }
 0x179   :  { %v1196_v17 = vadd.f32 %v1195_v40, %v1147_v15  ;;  %v1292_v22 = vadd.f32 %v1291_v10, %v1243_v16 }
 0x17b   :  { %v1316_v27 = vmax.f32 %v1292_v22, 0.0 }
 0x17e   :  { %v1244_v20 = vpop.f32.mrf.mxu2  ;;  %v1149_v24 = vpop.f32.mrf.mxu0 }
 0x17f   :  { %v1293_v21 = vpop.f32.mrf.mxu3  ;;  %v1245_v23 = vadd.f32 %v1244_v20, %v1196_v17  ;;  %v1198_v25 = vpop.f32.mrf.mxu1  ;;  %v1150_v29 = vadd.f32 %v1149_v24, %v2661_v47 }
 0x181   :  { %v1294_v13 = vadd.f32 %v1293_v21, %v1245_v23  ;;  %v1199_v34 = vadd.f32 %v1198_v25, %v1150_v29 }
 0x183   :  { %v1317_v48 = vmax.f32 %v1294_v13, 0.0 }
 0x185   :  { %v2026_v28 = vpack.c.bf16 %v1317_v48, %v1316_v27 }
 0x186   :  { %v1247_v30 = vpop.f32.mrf.mxu2  ;;  %v1151_v37 = vpop.f32.mrf.mxu0 }
 0x187   :  { %v1296_v31 = vpop.f32.mrf.mxu3  ;;  %2042 = vst [vmem:[%s2738_s3 + $0x28] sm:$0xff] %v2026_v28   ;;  %v1200_v33 = vpop.f32.mrf.mxu1  ;;  %v1152_v5 = vadd.f32 %v1151_v37, %v2688_v7  ;;  %v1248_v32 = vadd.f32 %v1247_v30, %v1199_v34 }
 0x189   :  { %v1201_v35 = vadd.f32 %v1200_v33, %v1152_v5  ;;  %v1297_v41 = vadd.f32 %v1296_v31, %v1248_v32 }
 0x18b   :  { %v1318_v46 = vmax.f32 %v1297_v41, 0.0 }
 0x18e   :  { %v1249_v38 = vpop.f32.mrf.mxu2  ;;  %v1154_v43 = vpop.f32.mrf.mxu0 }
 0x18f   :  { %v1298_v39 = vpop.f32.mrf.mxu3  ;;  %v1250_v42 = vadd.f32 %v1249_v38, %v1201_v35  ;;  %v1203_v47 = vpop.f32.mrf.mxu1  ;;  %v1155_v14 = vadd.f32 %v1154_v43, %v2691_v18 }
 0x191   :  { %v1299_v44 = vadd.f32 %v1298_v39, %v1250_v42  ;;  %v1204_v52 = vadd.f32 %v1203_v47, %v1155_v14 }
 0x193   :  { %v1319_v49 = vmax.f32 %v1299_v44, 0.0 }
 0x195   :  { %v2031_v50 = vpack.c.bf16 %v1319_v49, %v1318_v46 }
 0x196   :  { %v1252_v51 = vpop.f32.mrf.mxu2  ;;  %v1156_v7 = vpop.f32.mrf.mxu0 }
 0x197   :  { %v1301_v55 = vpop.f32.mrf.mxu3  ;;  %2043 = vst [vmem:[%s2738_s3 + $0x30] sm:$0xff] %v2031_v50   ;;  %v1157_v53 = vadd.f32 %v1156_v7, %v2693_v26  ;;  %v1253_v11 = vadd.f32 %v1252_v51, %v1204_v52  ;;  %v1205_v54 = vpop.f32.mrf.mxu1 }
 0x199   :  { %v1206_v36 = vadd.f32 %v1205_v54, %v1157_v53  ;;  %v1302_v57 = vadd.f32 %v1301_v55, %v1253_v11 }
 0x19b   :  { %v1320_v61 = vmax.f32 %v1302_v57, 0.0 }
 0x19e   :  { %v1254_v56 = vpop.f32.mrf.mxu2 }
 0x19f   :  { %v1255_v58 = vadd.f32 %v1254_v56, %v1206_v36  ;;  %v1303_v59 = vpop.f32.mrf.mxu3 }
 0x1a1   :  { %v1304_v60 = vadd.f32 %v1303_v59, %v1255_v58 }
 0x1a3   :  { %v1321_v18 = vmax.f32 %v1304_v60, 0.0 }
 0x1a5   :  { %v2036_v62 = vpack.c.bf16 %v1321_v18, %v1320_v61 }
 0x1a7   :  { %2044 = vst [vmem:[%s2738_s3 + $0x38] sm:$0xff] %v2036_v62  }

// kernel: model_forward.23
= control target key start
LH: loop header
LB: loop body
LE: loop exit
PB: predicated region body
PF: predicated region fallthrough
CT: control target
= control target key end

     0   :  { %s1410_s12 = smov 0   ;;  %s1412_s13 = smov 0   ;;  %s1529_s0 = inlined_call_operand.vmem [shape: bf16[2,8192], index: 0, kind: input, shape index: {}]   ;;  %s1530_s1 = inlined_call_operand.vmem [shape: bf16[8192,128], index: 1, kind: input, shape index: {}]   ;;  %s1531_s2 = inlined_call_operand.vmem [shape: f32[1,128], index: 2, kind: input, shape index: {}]   ;;  %s1532_s3 = inlined_call_operand.vmem [shape: bf16[2,128], index: 3, kind: output, shape index: {}]  }
   0x1   :  { %s1414_s14 = smov 0  }
   0x2 LB: > { %s25_s15 = sadd.s32 1, %s1383_s13  ;;  %p1010_p0 = scmp.ge.s32.totalorder %s1387_s14, 1  ;;  %s1387_s14 = sphi %s1414_s14, %s13_s14   ;;  %s1383_s13 = sphi %s1412_s13, %s1534_s13   ;;  %s1379_s12 = sphi %s1410_s12, %s1533_s12  }
   0x3   : > { %p26_p1 = scmp.ge.s32.totalorder %s25_s15, 8  ;;  %p188_p2 = scmp.lt.s32.totalorder %s1387_s14, 9 }
   0x5   : > { %s1536_s15 = smov (%p26_p1, %s25_s15), 0  ;;  %p189_p3 = pnand %p1010_p0, %p188_p2 }
   0x6   : > { %s1011_s16 = sshll.u32 (!%p189_p3), %s1379_s12, 3  ;;  %s1012_s17 = sshll.u32 (!%p189_p3), %s1379_s12, 7 }
   0x7   : > { %192 = sbr.rel (%p189_p3) target bundleno = 240 (0xf0), region = 32  ;;  %p230_p4 = scmp.lt.s32.totalorder (!%p189_p3), %s1011_s16, 63 }
   0x8   : > { %p237_p5 = scmp.lt.s32.totalorder (!%p189_p3), %s1012_s17, 1023  ;;  %p1014_p6 = scmp.ne.s32.totalorder (!%p189_p3), %s1379_s12, 0 }
   0xc   : > { %s1538_s16 = smov (!%p230_p4, %s1011_s16), 63  ;;  %s1540_s17 = smov (!%p237_p5, %s1012_s17), 1023 }
   0xd   : > { %s234_s20 = scalar_lea.vmem %s1529_s0, %s1538_s16  ;;  %s1013_s21 = sshll.u32 %s1540_s17, 2 }
   0xe   : > { %s1441_s24 = scalar_lea.vmem %s1530_s1, %s1013_s21  ;;  %257 = sbr.rel (%p1014_p6) target bundleno = 21 (0x15), region = 36 }
  0x13   : > { %v1389_v0 = vmov 0.0  }
  0x14   : > { %258 = vst [vmem:[#allocation2] sm:$0x3] %v1389_v0 }
  0x15 PF: > { %v1282_v1 = vld [vmem:[%s1441_s24 + $0x38] sm:$0xff]  ;;  %v1281_v5 = vld [vmem:[%s1441_s24 + $0x30] sm:$0xff]  ;;  %v1280_v9 = vld [vmem:[%s1441_s24 + $0x28] sm:$0xff]  ;;  %p1271_p7 = scmp.ne.s32.totalorder %s1379_s12, 7 }
  0x16   : > { %v1290_v2 = vld [vmem:[%s1441_s24 + $0x78] sm:$0xff]  ;;  %791 = vmatpush.bf16.msra.mxu0 %v1282_v1  ;;  %v1289_v6 = vld [vmem:[%s1441_s24 + $0x70] sm:$0xff]  ;;  %v1288_v10 = vld [vmem:[%s1441_s24 + $0x68] sm:$0xff] }
  0x17   : > { %v1298_v3 = vld [vmem:[%s1441_s24 + $0xb8] sm:$0xff]  ;;  %804 = vmatpush.bf16.msra.mxu1 %v1290_v2  ;;  %v1297_v7 = vld [vmem:[%s1441_s24 + $0xb0] sm:$0xff]  ;;  %v1296_v11 = vld [vmem:[%s1441_s24 + $0xa8] sm:$0xff] }
  0x18   : > { %v1306_v4 = vld [vmem:[%s1441_s24 + $0xf8] sm:$0xff]  ;;  %817 = vmatpush.bf16.msra.mxu2 %v1298_v3  ;;  %v1305_v8 = vld [vmem:[%s1441_s24 + $0xf0] sm:$0xff]  ;;  %v1304_v12 = vld [vmem:[%s1441_s24 + $0xe8] sm:$0xff] }
  0x19   : > { %830 = vmatpush.bf16.msra.mxu3 %v1306_v4  ;;  %v1279_v13 = vld [vmem:[%s1441_s24 + $0x20] sm:$0xff]  ;;  %v1278_v18 = vld [vmem:[%s1441_s24 + $0x18] sm:$0xff]  ;;  %v1277_v22 = vld [vmem:[%s1441_s24 + $0x10] sm:$0xff] }
  0x1a   : > { %792 = vmatpush.bf16.msra.mxu0 %v1281_v5  ;;  %v1287_v14 = vld [vmem:[%s1441_s24 + $0x60] sm:$0xff]  ;;  %v1286_v19 = vld [vmem:[%s1441_s24 + $0x58] sm:$0xff]  ;;  %v1285_v23 = vld [vmem:[%s1441_s24 + $0x50] sm:$0xff] }
  0x1b   : > { %805 = vmatpush.bf16.msra.mxu1 %v1289_v6  ;;  %v1295_v15 = vld [vmem:[%s1441_s24 + $0xa0] sm:$0xff]  ;;  %v1294_v20 = vld [vmem:[%s1441_s24 + $0x98] sm:$0xff]  ;;  %v1293_v24 = vld [vmem:[%s1441_s24 + $0x90] sm:$0xff] }
  0x1c   : > { %818 = vmatpush.bf16.msra.mxu2 %v1297_v7  ;;  %v1303_v16 = vld [vmem:[%s1441_s24 + $0xe0] sm:$0xff]  ;;  %v1302_v21 = vld [vmem:[%s1441_s24 + $0xd8] sm:$0xff]  ;;  %v1301_v25 = vld [vmem:[%s1441_s24 + $0xd0] sm:$0xff] }
  0x1d   : > { %831 = vmatpush.bf16.msra.mxu3 %v1305_v8  ;;  %v260_v17 = vld [vmem:[%s234_s20] sm:$0xff]  ;;  %v1276_v26 = vld [vmem:[%s1441_s24 + $0x8] sm:$0xff]  ;;  %v1314_v34 = vld [vmem:[%s1441_s24 + $0x138] sm:$0xff] }
  0x1e   : > { %793 = vmatpush.bf16.msra.mxu0 %v1280_v9  ;;  %390 = vst [vmem:[#allocation1] ss:$9 sm:$0xff] %v260_v17  ;;  %v1284_v27 = vld [vmem:[%s1441_s24 + $0x48] sm:$0xff]  ;;  %v1275_v30 = vld [vmem:[%s1441_s24] sm:$0xff]  ;;  %v1322_v35 = vld [vmem:[%s1441_s24 + $0x178] sm:$0xff] }
  0x1f   : > { %806 = vmatpush.bf16.msra.mxu1 %v1288_v10  ;;  %v1292_v28 = vld [vmem:[%s1441_s24 + $0x88] sm:$0xff]  ;;  %v1283_v31 = vld [vmem:[%s1441_s24 + $0x40] sm:$0xff]  ;;  %v1330_v36 = vld [vmem:[%s1441_s24 + $0x1b8] sm:$0xff] }
  0x20   : > { %819 = vmatpush.bf16.msra.mxu2 %v1296_v11  ;;  %v1300_v29 = vld [vmem:[%s1441_s24 + $0xc8] sm:$0xff]  ;;  %v1291_v32 = vld [vmem:[%s1441_s24 + $0x80] sm:$0xff]  ;;  %v1338_v37 = vld [vmem:[%s1441_s24 + $0x1f8] sm:$0xff] }
  0x21   : > { %832 = vmatpush.bf16.msra.mxu3 %v1304_v12  ;;  %v1299_v33 = vld [vmem:[%s1441_s24 + $0xc0] sm:$0xff]  ;;  %v1313_v38 = vld [vmem:[%s1441_s24 + $0x130] sm:$0xff]  ;;  %v1312_v46 = vld [vmem:[%s1441_s24 + $0x128] sm:$0xff] }
  0x22   : > { %794 = vmatpush.bf16.msra.mxu0 %v1279_v13  ;;  %v1321_v41 = vld [vmem:[%s1441_s24 + $0x170] sm:$0xff]  ;;  %v1320_v47 = vld [vmem:[%s1441_s24 + $0x168] sm:$0xff]  ;;  %v1311_v50 = vld [vmem:[%s1441_s24 + $0x120] sm:$0xff] }
  0x23   : > { %807 = vmatpush.bf16.msra.mxu1 %v1287_v14  ;;  %v1329_v44 = vld [vmem:[%s1441_s24 + $0x1b0] sm:$0xff]  ;;  %v1328_v48 = vld [vmem:[%s1441_s24 + $0x1a8] sm:$0xff]  ;;  %v1319_v51 = vld [vmem:[%s1441_s24 + $0x160] sm:$0xff] }
  0x24   : > { %820 = vmatpush.bf16.msra.mxu2 %v1295_v15  ;;  %v1337_v45 = vld [vmem:[%s1441_s24 + $0x1f0] sm:$0xff]  ;;  %v1336_v49 = vld [vmem:[%s1441_s24 + $0x1e8] sm:$0xff]  ;;  %v1327_v52 = vld [vmem:[%s1441_s24 + $0x1a0] sm:$0xff] }
  0x25   : > { %833 = vmatpush.bf16.msra.mxu3 %v1303_v16  ;;  %v393_v39 = vld [vmem:[#allocation1 + $0x12] sm:$0xff]  ;;  %v394_v40 = vld [vmem:[#allocation1 + $0x1b] sm:$0xff]  ;;  %v392_v43 = vld [vmem:[#allocation1 + $0x9] sm:$0xff] }
  0x26   : > { %795 = vmatpush.bf16.msra.mxu0 %v1278_v18  ;;  %v391_v42 = vld [vmem:[#allocation1] sm:$0xff]  ;;  %v1310_v54 = vld [vmem:[%s1441_s24 + $0x118] sm:$0xff]  ;;  %v1309_v58 = vld [vmem:[%s1441_s24 + $0x110] sm:$0xff] }
  0x27   : > { %808 = vmatpush.bf16.msra.mxu1 %v1286_v19  ;;  %v1335_v53 = vld [vmem:[%s1441_s24 + $0x1e0] sm:$0xff]  ;;  %v1318_v55 = vld [vmem:[%s1441_s24 + $0x158] sm:$0xff]  ;;  %v1317_v59 = vld [vmem:[%s1441_s24 + $0x150] sm:$0xff] }
  0x28   : > { %821 = vmatpush.bf16.msra.mxu2 %v1294_v20  ;;  %v1326_v56 = vld [vmem:[%s1441_s24 + $0x198] sm:$0xff]  ;;  %v1325_v60 = vld [vmem:[%s1441_s24 + $0x190] sm:$0xff]  ;;  %v1308_v62 = vld [vmem:[%s1441_s24 + $0x108] sm:$0xff] }
  0x29   : > { %834 = vmatpush.bf16.msra.mxu3 %v1302_v21  ;;  %v1334_v57 = vld [vmem:[%s1441_s24 + $0x1d8] sm:$0xff]  ;;  %v1333_v61 = vld [vmem:[%s1441_s24 + $0x1d0] sm:$0xff]  ;;  %v1316_v63 = vld [vmem:[%s1441_s24 + $0x148] sm:$0xff] }
  0x2a   : > { %796 = vmatpush.bf16.msra.mxu0 %v1277_v22  ;;  %v1324_v0 = vld [vmem:[%s1441_s24 + $0x188] sm:$0xff]  ;;  %v1307_v2 = vld [vmem:[%s1441_s24 + $0x100] sm:$0xff]  ;;  %v397_v8 = vld [vmem:[#allocation1 + $0x36] sm:$0xff] }
  0x2b   : > { %809 = vmatpush.bf16.msra.mxu1 %v1285_v23  ;;  %v1332_v1 = vld [vmem:[%s1441_s24 + $0x1c8] sm:$0xff]  ;;  %v1315_v3 = vld [vmem:[%s1441_s24 + $0x140] sm:$0xff] }
  0x2c   : > { %822 = vmatpush.bf16.msra.mxu2 %v1293_v24  ;;  %v1323_v4 = vld [vmem:[%s1441_s24 + $0x180] sm:$0xff]  ;;  %v396_v7 = vld [vmem:[#allocation1 + $0x2d] sm:$0xff] }
  0x2d   : > { %835 = vmatpush.bf16.msra.mxu3 %v1301_v25  ;;  %v1331_v5 = vld [vmem:[%s1441_s24 + $0x1c0] sm:$0xff] }
  0x2e   : > { %797 = vmatpush.bf16.msra.mxu0 %v1276_v26  ;;  %v395_v6 = vld [vmem:[#allocation1 + $0x24] sm:$0xff] }
  0x2f   : > { %810 = vmatpush.bf16.msra.mxu1 %v1284_v27  ;;  %v398_v9 = vld [vmem:[#allocation1 + $0x3f] sm:$0xff] }
  0x30   : > { %823 = vmatpush.bf16.msra.mxu2 %v1292_v28 }
  0x31   : > { %836 = vmatpush.bf16.msra.mxu3 %v1300_v29 }
  0x32   : > { %798 = vmatpush.bf16.msra.mxu0 %v1275_v30  ;;  %v259_v30 = vld [vmem:[#allocation2] sm:$0x3] }
  0x33   : > { %811 = vmatpush.bf16.msra.mxu1 %v1283_v31 }
  0x34   : > { %824 = vmatpush.bf16.msra.mxu2 %v1291_v32 }
  0x35   : > { %837 = vmatpush.bf16.msra.mxu3 %v1299_v33  ;;  %799 = vmatmul.bf16.vlgmr.msra.gmra.mxu0 %v391_v42 }
  0x36   : > { %843 = vmatpush.bf16.msrb.mxu0 %v1314_v34  ;;  %812 = vmatmul.bf16.vlgmr.msra.gmra.mxu1 %v392_v43 }
  0x37   : > { %856 = vmatpush.bf16.msrb.mxu1 %v1322_v35  ;;  %825 = vmatmul.bf16.vlgmr.msra.gmra.mxu2 %v393_v39 }
  0x38   : > { %869 = vmatpush.bf16.msrb.mxu2 %v1330_v36  ;;  %838 = vmatmul.bf16.vlgmr.msra.gmra.mxu3 %v394_v40 }
  0x39   : > { %882 = vmatpush.bf16.msrb.mxu3 %v1338_v37 }
  0x3a   : > { %844 = vmatpush.bf16.msrb.mxu0 %v1313_v38 }
  0x3b   : > { %857 = vmatpush.bf16.msrb.mxu1 %v1321_v41 }
  0x3c   : > { %870 = vmatpush.bf16.msrb.mxu2 %v1329_v44 }
  0x3d   : > { %883 = vmatpush.bf16.msrb.mxu3 %v1337_v45 }
  0x3e   : > { %845 = vmatpush.bf16.msrb.mxu0 %v1312_v46 }
  0x3f   : > { %858 = vmatpush.bf16.msrb.mxu1 %v1320_v47 }
  0x40   : > { %871 = vmatpush.bf16.msrb.mxu2 %v1328_v48 }
  0x41   : > { %884 = vmatpush.bf16.msrb.mxu3 %v1336_v49 }
  0x42   : > { %846 = vmatpush.bf16.msrb.mxu0 %v1311_v50 }
  0x43   : > { %859 = vmatpush.bf16.msrb.mxu1 %v1319_v51 }
  0x44   : > { %872 = vmatpush.bf16.msrb.mxu2 %v1327_v52 }
  0x45   : > { %885 = vmatpush.bf16.msrb.mxu3 %v1335_v53 }
  0x46   : > { %847 = vmatpush.bf16.msrb.mxu0 %v1310_v54 }
  0x47   : > { %860 = vmatpush.bf16.msrb.mxu1 %v1318_v55 }
  0x48   : > { %873 = vmatpush.bf16.msrb.mxu2 %v1326_v56 }
  0x49   : > { %886 = vmatpush.bf16.msrb.mxu3 %v1334_v57 }
  0x4a   : > { %848 = vmatpush.bf16.msrb.mxu0 %v1309_v58 }
  0x4b   : > { %861 = vmatpush.bf16.msrb.mxu1 %v1317_v59 }
  0x4c   : > { %874 = vmatpush.bf16.msrb.mxu2 %v1325_v60 }
  0x4d   : > { %887 = vmatpush.bf16.msrb.mxu3 %v1333_v61 }
  0x4e   : > { %849 = vmatpush.bf16.msrb.mxu0 %v1308_v62 }
  0x4f   : > { %862 = vmatpush.bf16.msrb.mxu1 %v1316_v63 }
  0x50   : > { %875 = vmatpush.bf16.msrb.mxu2 %v1324_v0 }
  0x51   : > { %888 = vmatpush.bf16.msrb.mxu3 %v1332_v1 }
  0x52   : > { %850 = vmatpush.bf16.msrb.mxu0 %v1307_v2 }
  0x53   : > { %863 = vmatpush.bf16.msrb.mxu1 %v1315_v3 }
  0x54   : > { %876 = vmatpush.bf16.msrb.mxu2 %v1323_v4 }
  0x55   : > { %889 = vmatpush.bf16.msrb.mxu3 %v1331_v5  ;;  %851 = vmatmul.bf16.vlgmr.msrb.gmra.mxu0 %v395_v6 }
  0x56   : > { %864 = vmatmul.bf16.vlgmr.msrb.gmra.mxu1 %v396_v7 }
  0x57   : > { %877 = vmatmul.bf16.vlgmr.msrb.gmra.mxu2 %v397_v8 }
  0x58   : > { %890 = vmatmul.bf16.vlgmr.msrb.gmra.mxu3 %v398_v9 }
  0xb2   : > { %v800_v10 = vpop.f32.mrf.mxu0 }
  0xb3   : > { %v813_v11 = vpop.f32.mrf.mxu1 }
  0xb4   : > { %v814_v18 = vadd.f32 %v813_v11, %v800_v10 }
  0xba   : > { %v826_v12 = vpop.f32.mrf.mxu2  ;;  %v802_v14 = vpop.f32.mrf.mxu0 }
  0xbb   : > { %v839_v13 = vpop.f32.mrf.mxu3  ;;  %v815_v15 = vpop.f32.mrf.mxu1  ;;  %v827_v19 = vadd.f32 %v826_v12, %v814_v18 }
  0xbd   : > { %v840_v20 = vadd.f32 %v839_v13, %v827_v19 }
  0xc2   : > { %v828_v16 = vpop.f32.mrf.mxu2 }
  0xc3   : > { %v841_v17 = vpop.f32.mrf.mxu3 }
  0xd2   : > { %v852_v21 = vpop.f32.mrf.mxu0 }
  0xd3   : > { %v865_v22 = vpop.f32.mrf.mxu1  ;;  %v853_v23 = vadd.f32 %v852_v21, %v840_v20 }
  0xd5   : > { %v866_v24 = vadd.f32 %v865_v22, %v853_v23 }
  0xda   : > { %v878_v25 = vpop.f32.mrf.mxu2  ;;  %v854_v28 = vpop.f32.mrf.mxu0 }
  0xdb   : > { %v891_v26 = vpop.f32.mrf.mxu3  ;;  %v879_v27 = vadd.f32 %v878_v25, %v866_v24  ;;  %v867_v29 = vpop.f32.mrf.mxu1 }
  0xdd   : > { %v892_v31 = vadd.f32 %v891_v26, %v879_v27 }
  0xdf   : > { %v895_v32 = vadd.f32 %v892_v31, %v259_v30  ;;  %900 = sbr.rel (%p1271_p7) target bundleno = 240 (0xf0), region = 40 }
  0xe1   : > { %896 = vst [vmem:[#allocation2] sm:$0x3] %v895_v32 }
  0xe2   : > { %v880_v33 = vpop.f32.mrf.mxu2 }
  0xe3   : > { %v893_v34 = vpop.f32.mrf.mxu3 }
  0xe4   : > { %v1364_v36 = vld [vmem:[%s1531_s2] ss:$0 sm:$0xff] }
  0xe8   : > { %v901_v35 = vld [vmem:[#allocation2] sm:$0x3] }
  0xe9   : > { %v906_v37 = vadd.f32 %v1364_v36, %v901_v35 }
  0xeb   : > { %v907_v38 = vmax.f32 %v906_v37, 0.0 }
  0xed   : > { %v908_v39 = vpack.c.bf16 %v907_v38, %v907_v38 }
  0xef   : > { %909 = vst [vmem:[%s1532_s3] sm:$0x1] %v908_v39 }
  0xf0 PF: > { %s13_s14 = sadd.s32 1, %s1387_s14   ;;  %s1533_s12 = smov %s1383_s13 }
  0xf1   : > { %p10_p8 = scmp.ge.s32.totalorder %s13_s14, 10   ;;  %s1534_s13 = smov %s1536_s15 }
  0xf3   :  { %12 = sbr.rel (!%p10_p8) target bundleno = 2 (0x2), region = 76 }

// kernel: model_forward.24
= control target key start
LH: loop header
LB: loop body
LE: loop exit
PB: predicated region body
PF: predicated region fallthrough
CT: control target
= control target key end

     0   :  { %vm98_vm0 = vcmask 516096   ;;  %s198_s1 = inlined_call_operand.vmem [shape: bf16[128,64], index: 1, kind: input, shape index: {}]   ;;  %s199_s2 = inlined_call_operand.vmem [shape: f32[1,64], index: 2, kind: input, shape index: {}]   ;;  %s200_s0 = inlined_call_operand.vmem [shape: bf16[2,128], index: 0, kind: input, shape index: {}]   ;;  %s201_s3 = inlined_call_operand.vmem [shape: bf16[2,64], index: 3, kind: output, shape index: {}]  }
   0x1   :  { %v143_v0 = vld [vmem:[%s198_s1 + $0x38] sm:$0xff]  ;;  %v142_v1 = vld [vmem:[%s198_s1 + $0x30] sm:$0xff]  ;;  %v141_v2 = vld [vmem:[%s198_s1 + $0x28] sm:$0xff] }
   0x2   :  { %83 = vmatpush.bf16.msra.mxu0 %v143_v0  ;;  %v140_v3 = vld [vmem:[%s198_s1 + $0x20] sm:$0xff]  ;;  %v139_v4 = vld [vmem:[%s198_s1 + $0x18] sm:$0xff]  ;;  %v138_v5 = vld [vmem:[%s198_s1 + $0x10] sm:$0xff] }
   0x3   :  { %v137_v6 = vld [vmem:[%s198_s1 + $0x8] sm:$0xff]  ;;  %v136_v7 = vld [vmem:[%s198_s1] sm:$0xff] }
   0x4   :  { %v14_v8 = vld [vmem:[%s200_s0] sm:$0x1] }
   0x5   :  { %v144_v9 = vld [vmem:[%s199_s2] ss:$0 sm:$0xff] }
   0x6   :  { %84 = vmatpush.bf16.msra.mxu0 %v142_v1 }
   0xa   :  { %85 = vmatpush.bf16.msra.mxu0 %v141_v2 }
   0xe   :  { %86 = vmatpush.bf16.msra.mxu0 %v140_v3 }
  0x12   :  { %87 = vmatpush.bf16.msra.mxu0 %v139_v4 }
  0x16   :  { %88 = vmatpush.bf16.msra.mxu0 %v138_v5 }
  0x1a   :  { %89 = vmatpush.bf16.msra.mxu0 %v137_v6 }
  0x1e   :  { %90 = vmatpush.bf16.msra.mxu0 %v136_v7 }
  0x21   :  { %91 = vmatmul.bf16.vlgmr.msra.gmra.mxu0 %v14_v8 }
  0x9e   :  { %v92_v10 = vpop.f32.mrf.mxu0 }
  0x9f   :  { %v93_v11 = vadd.f32 %v144_v9, %v92_v10 }
  0xa1   :  { %v96_v12 = vmax.f32 %v93_v11, 0.0 }
  0xa3   :  { %v97_v13 = vpack.c.bf16 %v96_v12, %v96_v12 }
  0xa5   :  { %99 = vst.msk [vmem:[%s201_s3] sm:$0x1] %vm98_vm0, %v97_v13 }
  0xa6   :  { %v94_v14 = vpop.f32.mrf.mxu0 }

// kernel: model_forward.25
= control target key start
LH: loop header
LB: loop body
LE: loop exit
PB: predicated region body
PF: predicated region fallthrough
CT: control target
= control target key end

     0   :  { %s179_s0 = inlined_call_operand.vmem [shape: bf16[2,64], index: 0, kind: input, shape index: {}]   ;;  %s180_s1 = inlined_call_operand.vmem [shape: bf16[64,10], index: 1, kind: input, shape index: {}]   ;;  %s181_s2 = inlined_call_operand.vmem [shape: f32[1,10], index: 2, kind: input, shape index: {}]   ;;  %s182_s3 = inlined_call_operand.hbm [shape: f32[2,10], index: 3, kind: output, shape index: {}]  }
   0x1   :  { %v108_v0 = vld [vmem:[%s180_s1 + $0x18] sm:$0xff]  ;;  %v107_v1 = vld [vmem:[%s180_s1 + $0x10] sm:$0xff] }
   0x2   :  { %61 = vmatpush.bf16.msra.mxu0 %v108_v0 }
   0x3   :  { %8 = vsyncpa [#allocation3], 0  ;;  %v106_v2 = vld [vmem:[%s180_s1 + $0x8] sm:$0xff]  ;;  %v105_v3 = vld [vmem:[%s180_s1] sm:$0xff]  ;;  %vm53_vm0 = vcmask 523264   ;;  %s137_s24 = smov [#allocation2]  }
   0x4   :  { %v16_v4 = vld [vmem:[%s179_s0] sm:$0x1]  ;;  %s77_s25 = sshll.u32 %s137_s24, 4  ;;  %s79_s28 = sshll.u32 %s182_s3, 4  ;;  %vm70_vm1 = vcmask 74752   ;;  %s78_s25 = int_to_ptr.vmem [resolvable:$true] %s77_s25  ;;  %s80_s28 = int_to_ptr.hbm [resolvable:$true] %s79_s28 }
   0x5   :  { %v110_v5 = vld [vmem:[%s181_s2] ss:$0 sm:$0xff] }
   0x6   :  { %62 = vmatpush.bf16.msra.mxu0 %v107_v1 }
   0xa   :  { %63 = vmatpush.bf16.msra.mxu0 %v106_v2 }
   0xe   :  { %64 = vmatpush.bf16.msra.mxu0 %v105_v3 }
  0x11   :  { %104 = vmatmul.msk.bf16.vlgmr.msra.gmra.mxu0 %vm53_vm0, %v16_v4 }
  0x8e   :  { %v66_v6 = vpop.f32.mrf.mxu0 }
  0x8f   :  { %v67_v7 = vadd.f32 %v110_v5, %v66_v6 }
  0x91   :  { %71 = vst.msk [vmem:[#allocation2] sm:$0x3] %vm70_vm1, %v67_v7 }
  0x92   :  { %82 = dma.vmem_to_hbm [thread:$0]  %s78_s25, 32, %s80_s28, [#allocation3]  }
  0x96   :  { %v68_v8 = vpop.f32.mrf.mxu0 }
  0x97   :  { %135 = dma.done.wait [#allocation3], 32  }
  0x98   :  { %136 = vsyncadd [#allocation3], 4294967264 }
  0x99   :  { %87 = vsyncpa [#allocation3], 1 }

</bundles_post_ra>
